<compile_context>
chip_gen: v5e
topology: v5e:2x2
jax: 0.10.0
libtpu: 0.0.40
codegen_flags: <defaults>
</compile_context>

<pallas_src>
import functools

import jax
import jax.numpy as jnp
from jax.experimental import pallas as pl
from jax.experimental.pallas import tpu as pltpu


# Logical (PyTorch) sizes for the cifar10 variant.
IN_DIM = 3072
H1 = 300
H2 = 100
N_OUT = 10

# Lane-padded sizes used inside the kernel.
H1P = 384   # 3 * 128
H2P = 128


def _round_up(x, m):
    return ((x + m - 1) // m) * m


def mlp_kernel(x_ref, w1_ref, b1_ref, w2_ref, b2_ref, w3_ref, b3_ref, out_ref):
    # x tile: (TB, 3072) bf16; weights bf16; biases f32.
    x = x_ref[...]

    # fc1 + relu  (f32 accumulation, back to bf16 for the next MXU pass)
    h1 = jnp.dot(x, w1_ref[...], preferred_element_type=jnp.float32) + b1_ref[...]
    h1 = jnp.maximum(h1, 0.0).astype(jnp.bfloat16)            # (TB, 384)

    # fc2 + relu
    h2 = jnp.dot(h1, w2_ref[...], preferred_element_type=jnp.float32) + b2_ref[...]
    h2 = jnp.maximum(h2, 0.0).astype(jnp.bfloat16)            # (TB, 128)

    # fc3
    logits = jnp.dot(h2, w3_ref[...], preferred_element_type=jnp.float32) + b3_ref[...]
    # (TB, 10)

    # log_softmax along the last dim (numerically stable, all f32)
    m = jnp.max(logits, axis=-1, keepdims=True)
    z = logits - m
    lse = jnp.log(jnp.sum(jnp.exp(z), axis=-1, keepdims=True))
    out_ref[...] = z - lse


def _pad_params(params):
    """Zero-pad hidden widths to lane multiples and cast weights to bf16."""
    w1, b1, w2, b2, w3, b3 = params

    w1p = jnp.zeros((IN_DIM, H1P), jnp.bfloat16).at[:, :H1].set(w1.astype(jnp.bfloat16))
    b1p = jnp.zeros((1, H1P), jnp.float32).at[:, :H1].set(b1.astype(jnp.float32))

    w2p = jnp.zeros((H1P, H2P), jnp.bfloat16).at[:H1, :H2].set(w2.astype(jnp.bfloat16))
    b2p = jnp.zeros((1, H2P), jnp.float32).at[:, :H2].set(b2.astype(jnp.float32))

    w3p = jnp.zeros((H2P, N_OUT), jnp.bfloat16).at[:H2, :].set(w3.astype(jnp.bfloat16))
    b3p = b3.astype(jnp.float32)

    return w1p, b1p, w2p, b2p, w3p, b3p


@functools.partial(jax.jit, static_argnames=("tile_b",))
def mlp_general_forward(x_nchw, params, *, tile_b=512):
    """x_nchw: (B, 3, 32, 32).  Returns (B, 10) log-probabilities (f32)."""
    B = x_nchw.shape[0]

    # Flatten exactly like torch x.view(B, -1); cast to bf16 for the MXU.
    x_flat = x_nchw.reshape(B, -1).astype(jnp.bfloat16)        # (B, 3072)

    # Choose the batch tile: <=512 rows (safe for v7x's 64 MiB VMEM with
    # double buffering), at least sublane-aligned (multiple of 8).
    tb = min(tile_b, _round_up(B, 8))
    b_pad = _round_up(B, tb)
    if b_pad != B:
        # Zero rows are harmless: logits = bias only, log_softmax stays finite.
        x_flat = jnp.pad(x_flat, ((0, b_pad - B), (0, 0)))

    w1, b1, w2, b2, w3, b3 = _pad_params(params)

    grid = (b_pad // tb,)

    weight_bytes = (IN_DIM * H1P + H1P * H2P + H2P * N_OUT) * 2 \
                   + (H1P + H2P + N_OUT) * 4
    cost = pl.CostEstimate(
        flops=2 * b_pad * (IN_DIM * H1P + H1P * H2P + H2P * N_OUT),
        transcendentals=b_pad * N_OUT,
        bytes_accessed=b_pad * IN_DIM * 2 + weight_bytes + b_pad * N_OUT * 4,
    )

    out = pl.pallas_call(
        mlp_kernel,
        out_shape=jax.ShapeDtypeStruct((b_pad, N_OUT), jnp.float32),
        grid=grid,
        in_specs=[
            pl.BlockSpec((tb, IN_DIM), lambda i: (i, 0)),    # x tile
            pl.BlockSpec((IN_DIM, H1P), lambda i: (0, 0)),   # w1 (resident)
            pl.BlockSpec((1, H1P), lambda i: (0, 0)),        # b1
            pl.BlockSpec((H1P, H2P), lambda i: (0, 0)),      # w2
            pl.BlockSpec((1, H2P), lambda i: (0, 0)),        # b2
            pl.BlockSpec((H2P, N_OUT), lambda i: (0, 0)),    # w3
            pl.BlockSpec((1, N_OUT), lambda i: (0, 0)),      # b3
        ],
        out_specs=pl.BlockSpec((tb, N_OUT), lambda i: (i, 0)),
        compiler_params=pltpu.CompilerParams(
            dimension_semantics=("parallel",),
        ),
        cost_estimate=cost,
    )(x_flat, w1, b1, w2, b2, w3, b3)

    return out[:B]


def init_params(key, in_dim=IN_DIM, h1=H1, h2=H2, n_out=N_OUT):
    """Deterministic PyTorch-style uniform(-1/sqrt(fan_in), 1/sqrt(fan_in)) init.

    Weights are stored as (in_features, out_features) so x @ W + b equals
    torch's x @ W.T + b with W of shape (out, in).
    """
    ks = jax.random.split(key, 6)

    def lin(kw, kb, fan_in, fan_out):
        bound = 1.0 / jnp.sqrt(jnp.float32(fan_in))
        w = jax.random.uniform(kw, (fan_in, fan_out), jnp.float32, -bound, bound)
        b = jax.random.uniform(kb, (1, fan_out), jnp.float32, -bound, bound)
        return w, b

    w1, b1 = lin(ks[0], ks[1], in_dim, h1)
    w2, b2 = lin(ks[2], ks[3], h1, h2)
    w3, b3 = lin(ks[4], ks[5], h2, n_out)
    return (w1, b1, w2, b2, w3, b3)


def _reference_forward(x_nchw, params):
    """Pure-JAX f32 reference mirroring the PyTorch module."""
    w1, b1, w2, b2, w3, b3 = params
    x = x_nchw.reshape(x_nchw.shape[0], -1).astype(jnp.float32)
    h1 = jnp.maximum(x @ w1 + b1, 0.0)
    h2 = jnp.maximum(h1 @ w2 + b2, 0.0)
    logits = h2 @ w3 + b3
    return jax.nn.log_softmax(logits, axis=-1)


if __name__ == "__main__":
    key = jax.random.PRNGKey(0)
    k_x, k_p = jax.random.split(key)

    # cifar10-shaped input, small batch (the grid/tile logic handles any B).
    x = jax.random.normal(k_x, (2, 3, 32, 32), dtype=jnp.float32)
    params = init_params(k_p)

    out = mlp_general_forward(x, params)
    out = jax.block_until_ready(out)

    assert out.shape == (2, N_OUT)

    # log_softmax rows must exp-sum to 1
    row_sums = jnp.sum(jnp.exp(out), axis=1)
    assert bool(jnp.all(jnp.abs(row_sums - 1.0) < 1e-3)), row_sums

    # loose check against the f32 reference (bf16 matmuls => small drift)
    ref = _reference_forward(x, params)
    max_err = float(jnp.max(jnp.abs(out - ref)))
    assert max_err < 5e-2, f"max |diff| vs reference = {max_err}"

    print("KERNEL_OK")
</pallas_src>

<mosaic_0001>
module attributes {stable_mosaic.version = 11 : i64} {
  func.func @mlp_kernel(%arg0: i32, %arg1: memref<8x3072xbf16, #tpu.memory_space<vmem>>, %arg2: memref<3072x384xbf16, #tpu.memory_space<vmem>>, %arg3: memref<1x384xf32, #tpu.memory_space<vmem>>, %arg4: memref<384x128xbf16, #tpu.memory_space<vmem>>, %arg5: memref<1x128xf32, #tpu.memory_space<vmem>>, %arg6: memref<128x10xbf16, #tpu.memory_space<vmem>>, %arg7: memref<1x10xf32, #tpu.memory_space<vmem>>, %arg8: memref<8x10xf32, #tpu.memory_space<vmem>>) attributes {dimension_semantics = [#tpu.dimension_semantics<parallel>], iteration_bounds = array<i64: 1>, scalar_prefetch = 0 : i64, scratch_operands = 0 : i64, tpu.core_type = #tpu.core_type<tc>, window_params = [{transform_indices = @transform_0, window_bounds = array<i64: 8, 3072>}, {pipeline_mode = #tpu.pipeline_mode<synchronous>, transform_indices = @transform_1, window_bounds = array<i64: 3072, 384>}, {pipeline_mode = #tpu.pipeline_mode<synchronous>, transform_indices = @transform_2, window_bounds = array<i64: 1, 384>}, {pipeline_mode = #tpu.pipeline_mode<synchronous>, transform_indices = @transform_3, window_bounds = array<i64: 384, 128>}, {pipeline_mode = #tpu.pipeline_mode<synchronous>, transform_indices = @transform_4, window_bounds = array<i64: 1, 128>}, {pipeline_mode = #tpu.pipeline_mode<synchronous>, transform_indices = @transform_5, window_bounds = array<i64: 128, 10>}, {pipeline_mode = #tpu.pipeline_mode<synchronous>, transform_indices = @transform_6, window_bounds = array<i64: 1, 10>}, {transform_indices = @transform_7, window_bounds = array<i64: 8, 10>}]} {
    %c0 = arith.constant 0 : index
    %c0_0 = arith.constant 0 : index
    %0 = vector.load %arg1[%c0, %c0_0] : memref<8x3072xbf16, #tpu.memory_space<vmem>>, vector<8x3072xbf16>
    %c0_1 = arith.constant 0 : index
    %c0_2 = arith.constant 0 : index
    %1 = vector.load %arg2[%c0_1, %c0_2] : memref<3072x384xbf16, #tpu.memory_space<vmem>>, vector<3072x384xbf16>
    %cst = arith.constant dense<0.000000e+00> : vector<8x384xf32>
    %2 = tpu.matmul %0, %1, %cst {dimension_numbers = #tpu.dot_dimension_numbers<[1], [0], [0], [1], [0, 0, 1, 1], [], []>} : vector<8x3072xbf16>, vector<3072x384xbf16>, vector<8x384xf32> -> vector<8x384xf32>
    %c0_3 = arith.constant 0 : index
    %c0_4 = arith.constant 0 : index
    %3 = vector.load %arg3[%c0_3, %c0_4] : memref<1x384xf32, #tpu.memory_space<vmem>>, vector<1x384xf32>
    %4 = vector.broadcast %3 : vector<1x384xf32> to vector<8x384xf32>
    %5 = arith.addf %2, %4 : vector<8x384xf32>
    %cst_5 = arith.constant 0.000000e+00 : f32
    %6 = vector.broadcast %cst_5 : f32 to vector<8x384xf32>
    %7 = arith.maximumf %5, %6 : vector<8x384xf32>
    %8 = arith.truncf %7 : vector<8x384xf32> to vector<8x384xbf16>
    %c0_6 = arith.constant 0 : index
    %c0_7 = arith.constant 0 : index
    %9 = vector.load %arg4[%c0_6, %c0_7] : memref<384x128xbf16, #tpu.memory_space<vmem>>, vector<384x128xbf16>
    %cst_8 = arith.constant dense<0.000000e+00> : vector<8x128xf32>
    %10 = tpu.matmul %8, %9, %cst_8 {dimension_numbers = #tpu.dot_dimension_numbers<[1], [0], [0], [1], [0, 0, 1, 1], [], []>} : vector<8x384xbf16>, vector<384x128xbf16>, vector<8x128xf32> -> vector<8x128xf32>
    %c0_9 = arith.constant 0 : index
    %c0_10 = arith.constant 0 : index
    %11 = vector.load %arg5[%c0_9, %c0_10] : memref<1x128xf32, #tpu.memory_space<vmem>>, vector<1x128xf32>
    %12 = vector.broadcast %11 : vector<1x128xf32> to vector<8x128xf32>
    %13 = arith.addf %10, %12 : vector<8x128xf32>
    %cst_11 = arith.constant 0.000000e+00 : f32
    %14 = vector.broadcast %cst_11 : f32 to vector<8x128xf32>
    %15 = arith.maximumf %13, %14 : vector<8x128xf32>
    %16 = arith.truncf %15 : vector<8x128xf32> to vector<8x128xbf16>
    %c0_12 = arith.constant 0 : index
    %c0_13 = arith.constant 0 : index
    %17 = vector.load %arg6[%c0_12, %c0_13] : memref<128x10xbf16, #tpu.memory_space<vmem>>, vector<128x10xbf16>
    %cst_14 = arith.constant dense<0.000000e+00> : vector<8x10xf32>
    %18 = tpu.matmul %16, %17, %cst_14 {dimension_numbers = #tpu.dot_dimension_numbers<[1], [0], [0], [1], [0, 0, 1, 1], [], []>} : vector<8x128xbf16>, vector<128x10xbf16>, vector<8x10xf32> -> vector<8x10xf32>
    %c0_15 = arith.constant 0 : index
    %c0_16 = arith.constant 0 : index
    %19 = vector.load %arg7[%c0_15, %c0_16] : memref<1x10xf32, #tpu.memory_space<vmem>>, vector<1x10xf32>
    %20 = vector.broadcast %19 : vector<1x10xf32> to vector<8x10xf32>
    %21 = arith.addf %18, %20 : vector<8x10xf32>
    %cst_17 = arith.constant dense<0xFF800000> : vector<8xf32>
    %22 = vector.multi_reduction <maximumf>, %21, %cst_17 [1] : vector<8x10xf32> to vector<8xf32>
    %23 = vector.shape_cast %22 : vector<8xf32> to vector<8x1xf32>
    %24 = vector.broadcast %23 : vector<8x1xf32> to vector<8x10xf32>
    %25 = arith.subf %21, %24 : vector<8x10xf32>
    %26 = math.exp %25 : vector<8x10xf32>
    %cst_18 = arith.constant dense<0.000000e+00> : vector<8xf32>
    %27 = vector.multi_reduction <add>, %26, %cst_18 [1] : vector<8x10xf32> to vector<8xf32>
    %28 = vector.shape_cast %27 : vector<8xf32> to vector<8x1xf32>
    %29 = math.log %28 : vector<8x1xf32>
    %30 = vector.broadcast %29 : vector<8x1xf32> to vector<8x10xf32>
    %31 = arith.subf %25, %30 : vector<8x10xf32>
    %c0_19 = arith.constant 0 : index
    %c0_20 = arith.constant 0 : index
    %32 = vector.load %arg8[%c0_19, %c0_20] : memref<8x10xf32, #tpu.memory_space<vmem>>, vector<8x10xf32>
    tpu.vector_store %arg8[%c0_19, %c0_20], %31 {strides = array<i32>} : memref<8x10xf32, #tpu.memory_space<vmem>>, vector<8x10xf32>,
    return
  }
  func.func @transform_0(%arg0: i32) -> (i32, i32) {
    %c0_i32 = arith.constant 0 : i32
    %c0_i32_0 = arith.constant 0 : i32
    return %arg0, %c0_i32 : i32, i32
  }
  func.func @transform_1(%arg0: i32) -> (i32, i32) {
    %c0_i32 = arith.constant 0 : i32
    %c0_i32_0 = arith.constant 0 : i32
    %c0_i32_1 = arith.constant 0 : i32
    return %c0_i32, %c0_i32_0 : i32, i32
  }
  func.func @transform_2(%arg0: i32) -> (i32, i32) {
    %c0_i32 = arith.constant 0 : i32
    %c0_i32_0 = arith.constant 0 : i32
    %c0_i32_1 = arith.constant 0 : i32
    return %c0_i32, %c0_i32_0 : i32, i32
  }
  func.func @transform_3(%arg0: i32) -> (i32, i32) {
    %c0_i32 = arith.constant 0 : i32
    %c0_i32_0 = arith.constant 0 : i32
    %c0_i32_1 = arith.constant 0 : i32
    return %c0_i32, %c0_i32_0 : i32, i32
  }
  func.func @transform_4(%arg0: i32) -> (i32, i32) {
    %c0_i32 = arith.constant 0 : i32
    %c0_i32_0 = arith.constant 0 : i32
    %c0_i32_1 = arith.constant 0 : i32
    return %c0_i32, %c0_i32_0 : i32, i32
  }
  func.func @transform_5(%arg0: i32) -> (i32, i32) {
    %c0_i32 = arith.constant 0 : i32
    %c0_i32_0 = arith.constant 0 : i32
    %c0_i32_1 = arith.constant 0 : i32
    return %c0_i32, %c0_i32_0 : i32, i32
  }
  func.func @transform_6(%arg0: i32) -> (i32, i32) {
    %c0_i32 = arith.constant 0 : i32
    %c0_i32_0 = arith.constant 0 : i32
    %c0_i32_1 = arith.constant 0 : i32
    return %c0_i32, %c0_i32_0 : i32, i32
  }
  func.func @transform_7(%arg0: i32) -> (i32, i32) {
    %c0_i32 = arith.constant 0 : i32
    %c0_i32_0 = arith.constant 0 : i32
    return %arg0, %c0_i32 : i32, i32
  }
}

</mosaic_0001>

<bundles_post_ra>
// kernel: mlp_general_forward.1
= control target key start
LH: loop header
LB: loop body
LE: loop exit
PB: predicated region body
PF: predicated region fallthrough
CT: control target
= control target key end

     0   :  { %vm5230_vm0 = vcmask 80896   ;;  %s12104_s1 = inlined_call_operand.vmem [shape: bf16[3072,384], index: 1, kind: input, shape index: {}]   ;;  %s12105_s0 = inlined_call_operand.vmem [shape: bf16[8,3072], index: 0, kind: input, shape index: {}]   ;;  %s12106_s2 = inlined_call_operand.vmem [shape: f32[1,384], index: 2, kind: input, shape index: {}]   ;;  %s12107_s3 = inlined_call_operand.vmem [shape: bf16[384,128], index: 3, kind: input, shape index: {}]   ;;  %s12108_s4 = inlined_call_operand.vmem [shape: f32[1,128], index: 4, kind: input, shape index: {}]   ;;  %s12109_s5 = inlined_call_operand.vmem [shape: bf16[128,10], index: 5, kind: input, shape index: {}]   ;;  %s12110_s6 = inlined_call_operand.vmem [shape: f32[1,10], index: 6, kind: input, shape index: {}]   ;;  %s12111_s7 = inlined_call_operand.vmem [shape: f32[8,10], index: 7, kind: output, shape index: {}]  }
   0x1   :  { %v5334_v0 = vld [vmem:[%s12104_s1 + $0xa8] sm:$0xf]  ;;  %v7702_v1 = vld [vmem:[%s12104_s1 + $0xb0] sm:$0xf0]  ;;  %v5322_v11 = vld [vmem:[%s12104_s1 + $0x90] sm:$0xf] }
   0x2   :  { %v5430_v2 = vld [vmem:[%s12104_s1 + $0x168] sm:$0xf]  ;;  %v5335_v3 = vor.u32 %v7702_v1, %v5334_v0  ;;  %v7726_v4 = vld [vmem:[%s12104_s1 + $0x170] sm:$0xf0]  ;;  %v7699_v13 = vld [vmem:[%s12104_s1 + $0x98] sm:$0xf0] }
   0x3   :  { %v5526_v5 = vld [vmem:[%s12104_s1 + $0x228] sm:$0xf]  ;;  %v7750_v6 = vld [vmem:[%s12104_s1 + $0x230] sm:$0xf0]  ;;  %v5431_v7 = vor.u32 %v7726_v4, %v5430_v2  ;;  %v5418_v14 = vld [vmem:[%s12104_s1 + $0x150] sm:$0xf]  ;;  %v5323_v16 = vor.u32 %v7699_v13, %v5322_v11 }
   0x4   :  { %v5527_v8 = vor.u32 %v7750_v6, %v5526_v5  ;;  %v5622_v9 = vld [vmem:[%s12104_s1 + $0x2e8] sm:$0xf]  ;;  %v7774_v10 = vld [vmem:[%s12104_s1 + $0x2f0] sm:$0xf0]  ;;  %3970 = vmatpush.bf16.msra.mxu0 %v5335_v3  ;;  %v7723_v15 = vld [vmem:[%s12104_s1 + $0x158] sm:$0xf0] }
   0x5   :  { %v5623_v12 = vor.u32 %v7774_v10, %v5622_v9  ;;  %3983 = vmatpush.bf16.msra.mxu1 %v5431_v7  ;;  %v5419_v17 = vor.u32 %v7723_v15, %v5418_v14  ;;  %v5514_v18 = vld [vmem:[%s12104_s1 + $0x210] sm:$0xf]  ;;  %v7747_v19 = vld [vmem:[%s12104_s1 + $0x218] sm:$0xf0]  ;;  %v5310_v23 = vld [vmem:[%s12104_s1 + $0x78] sm:$0xf] }
   0x6   :  { %3996 = vmatpush.bf16.msra.mxu2 %v5527_v8  ;;  %v5610_v20 = vld [vmem:[%s12104_s1 + $0x2d0] sm:$0xf]  ;;  %v5515_v21 = vor.u32 %v7747_v19, %v5514_v18  ;;  %v7771_v22 = vld [vmem:[%s12104_s1 + $0x2d8] sm:$0xf0]  ;;  %v7696_v24 = vld [vmem:[%s12104_s1 + $0x80] sm:$0xf0] }
   0x7   :  { %4009 = vmatpush.bf16.msra.mxu3 %v5623_v12  ;;  %v5611_v25 = vor.u32 %v7771_v22, %v5610_v20  ;;  %v5406_v26 = vld [vmem:[%s12104_s1 + $0x138] sm:$0xf]  ;;  %v7720_v27 = vld [vmem:[%s12104_s1 + $0x140] sm:$0xf0]  ;;  %v5311_v29 = vor.u32 %v7696_v24, %v5310_v23  ;;  %v5298_v35 = vld [vmem:[%s12104_s1 + $0x60] sm:$0xf] }
   0x8   :  { %v5502_v28 = vld [vmem:[%s12104_s1 + $0x1f8] sm:$0xf]  ;;  %3971 = vmatpush.bf16.msra.mxu0 %v5323_v16  ;;  %v7744_v30 = vld [vmem:[%s12104_s1 + $0x200] sm:$0xf0]  ;;  %v5407_v33 = vor.u32 %v7720_v27, %v5406_v26  ;;  %v7693_v36 = vld [vmem:[%s12104_s1 + $0x68] sm:$0xf0] }
   0x9   :  { %v5598_v31 = vld [vmem:[%s12104_s1 + $0x2b8] sm:$0xf]  ;;  %v7768_v32 = vld [vmem:[%s12104_s1 + $0x2c0] sm:$0xf0]  ;;  %3984 = vmatpush.bf16.msra.mxu1 %v5419_v17  ;;  %v5503_v34 = vor.u32 %v7744_v30, %v5502_v28  ;;  %v5394_v37 = vld [vmem:[%s12104_s1 + $0x120] sm:$0xf]  ;;  %v5299_v44 = vor.u32 %v7693_v36, %v5298_v35 }
   0xa   :  { %3997 = vmatpush.bf16.msra.mxu2 %v5515_v21  ;;  %v5599_v38 = vor.u32 %v7768_v32, %v5598_v31  ;;  %v7717_v39 = vld [vmem:[%s12104_s1 + $0x128] sm:$0xf0]  ;;  %v5490_v40 = vld [vmem:[%s12104_s1 + $0x1e0] sm:$0xf]  ;;  %v5286_v47 = vld [vmem:[%s12104_s1 + $0x48] sm:$0xf] }
   0xb   :  { %4010 = vmatpush.bf16.msra.mxu3 %v5611_v25  ;;  %v7741_v41 = vld [vmem:[%s12104_s1 + $0x1e8] sm:$0xf0]  ;;  %v5586_v42 = vld [vmem:[%s12104_s1 + $0x2a0] sm:$0xf]  ;;  %v5395_v45 = vor.u32 %v7717_v39, %v5394_v37  ;;  %v7690_v48 = vld [vmem:[%s12104_s1 + $0x50] sm:$0xf0] }
   0xc   :  { %v7765_v43 = vld [vmem:[%s12104_s1 + $0x2a8] sm:$0xf0]  ;;  %3972 = vmatpush.bf16.msra.mxu0 %v5311_v29  ;;  %v5491_v46 = vor.u32 %v7741_v41, %v5490_v40  ;;  %v5382_v49 = vld [vmem:[%s12104_s1 + $0x108] sm:$0xf]  ;;  %v7714_v51 = vld [vmem:[%s12104_s1 + $0x110] sm:$0xf0]  ;;  %v5287_v56 = vor.u32 %v7690_v48, %v5286_v47 }
   0xd   :  { %3985 = vmatpush.bf16.msra.mxu1 %v5407_v33  ;;  %v5587_v50 = vor.u32 %v7765_v43, %v5586_v42  ;;  %v5478_v52 = vld [vmem:[%s12104_s1 + $0x1c8] sm:$0xf]  ;;  %v7738_v53 = vld [vmem:[%s12104_s1 + $0x1d0] sm:$0xf0]  ;;  %v5383_v57 = vor.u32 %v7714_v51, %v5382_v49  ;;  %v5274_v59 = vld [vmem:[%s12104_s1 + $0x30] sm:$0xf] }
   0xe   :  { %3998 = vmatpush.bf16.msra.mxu2 %v5503_v34  ;;  %v5574_v54 = vld [vmem:[%s12104_s1 + $0x288] sm:$0xf]  ;;  %v7762_v55 = vld [vmem:[%s12104_s1 + $0x290] sm:$0xf0]  ;;  %v5479_v58 = vor.u32 %v7738_v53, %v5478_v52  ;;  %v7687_v60 = vld [vmem:[%s12104_s1 + $0x38] sm:$0xf0] }
   0xf   :  { %4011 = vmatpush.bf16.msra.mxu3 %v5599_v38  ;;  %v5370_v61 = vld [vmem:[%s12104_s1 + $0xf0] sm:$0xf]  ;;  %v5575_v62 = vor.u32 %v7762_v55, %v5574_v54  ;;  %v7711_v63 = vld [vmem:[%s12104_s1 + $0xf8] sm:$0xf0]  ;;  %v5275_v4 = vor.u32 %v7687_v60, %v5274_v59  ;;  %v5262_v7 = vld [vmem:[%s12104_s1 + $0x18] sm:$0xf] }
  0x10   :  { %3973 = vmatpush.bf16.msra.mxu0 %v5299_v44  ;;  %v5466_v0 = vld [vmem:[%s12104_s1 + $0x1b0] sm:$0xf]  ;;  %v7735_v1 = vld [vmem:[%s12104_s1 + $0x1b8] sm:$0xf0]  ;;  %v5371_v5 = vor.u32 %v7711_v63, %v5370_v61  ;;  %v7684_v8 = vld [vmem:[%s12104_s1 + $0x20] sm:$0xf0] }
  0x11   :  { %3986 = vmatpush.bf16.msra.mxu1 %v5395_v45  ;;  %v5562_v2 = vld [vmem:[%s12104_s1 + $0x270] sm:$0xf]  ;;  %v7759_v3 = vld [vmem:[%s12104_s1 + $0x278] sm:$0xf0]  ;;  %v5467_v6 = vor.u32 %v7735_v1, %v5466_v0  ;;  %v5358_v9 = vld [vmem:[%s12104_s1 + $0xd8] sm:$0xf]  ;;  %v5263_v16 = vor.u32 %v7684_v8, %v5262_v7 }
  0x12   :  { %3999 = vmatpush.bf16.msra.mxu2 %v5491_v46  ;;  %v5563_v10 = vor.u32 %v7759_v3, %v5562_v2  ;;  %v7708_v11 = vld [vmem:[%s12104_s1 + $0xe0] sm:$0xf0]  ;;  %v5454_v12 = vld [vmem:[%s12104_s1 + $0x198] sm:$0xf]  ;;  %v5250_v17 = vld [vmem:[%s12104_s1] sm:$0xf] }
  0x13   :  { %4012 = vmatpush.bf16.msra.mxu3 %v5587_v50  ;;  %v7732_v13 = vld [vmem:[%s12104_s1 + $0x1a0] sm:$0xf0]  ;;  %v5550_v14 = vld [vmem:[%s12104_s1 + $0x258] sm:$0xf]  ;;  %v7681_v18 = vld [vmem:[%s12104_s1 + $0x8] sm:$0xf0]  ;;  %v5359_v19 = vor.u32 %v7708_v11, %v5358_v9 }
  0x14   :  { %3974 = vmatpush.bf16.msra.mxu0 %v5287_v56  ;;  %v7756_v15 = vld [vmem:[%s12104_s1 + $0x260] sm:$0xf0]  ;;  %v5455_v20 = vor.u32 %v7732_v13, %v5454_v12  ;;  %v5346_v21 = vld [vmem:[%s12104_s1 + $0xc0] sm:$0xf]  ;;  %v7705_v22 = vld [vmem:[%s12104_s1 + $0xc8] sm:$0xf0]  ;;  %v5251_v31 = vor.u32 %v7681_v18, %v5250_v17 }
  0x15   :  { %3987 = vmatpush.bf16.msra.mxu1 %v5383_v57  ;;  %v5442_v23 = vld [vmem:[%s12104_s1 + $0x180] sm:$0xf]  ;;  %v5551_v24 = vor.u32 %v7756_v15, %v5550_v14  ;;  %v7729_v25 = vld [vmem:[%s12104_s1 + $0x188] sm:$0xf0]  ;;  %v5718_v28 = vld [vmem:[%s12104_s1 + $0x3a8] sm:$0xf]  ;;  %v5347_v35 = vor.u32 %v7705_v22, %v5346_v21 }
  0x16   :  { %4000 = vmatpush.bf16.msra.mxu2 %v5479_v58  ;;  %v5538_v26 = vld [vmem:[%s12104_s1 + $0x240] sm:$0xf]  ;;  %v7753_v27 = vld [vmem:[%s12104_s1 + $0x248] sm:$0xf0]  ;;  %v7798_v29 = vld [vmem:[%s12104_s1 + $0x3b0] sm:$0xf0]  ;;  %v5443_v36 = vor.u32 %v7729_v25, %v5442_v23 }
  0x17   :  { %4013 = vmatpush.bf16.msra.mxu3 %v5575_v62  ;;  %v5814_v30 = vld [vmem:[%s12104_s1 + $0x468] sm:$0xf]  ;;  %v7822_v32 = vld [vmem:[%s12104_s1 + $0x470] sm:$0xf0]  ;;  %v5539_v39 = vor.u32 %v7753_v27, %v5538_v26  ;;  %v5719_v40 = vor.u32 %v7798_v29, %v5718_v28  ;;  %v5706_v43 = vld [vmem:[%s12104_s1 + $0x390] sm:$0xf] }
  0x18   :  { %3975 = vmatpush.bf16.msra.mxu0 %v5275_v4  ;;  %v5910_v33 = vld [vmem:[%s12104_s1 + $0x528] sm:$0xf]  ;;  %v7846_v34 = vld [vmem:[%s12104_s1 + $0x530] sm:$0xf0]  ;;  %v5815_v41 = vor.u32 %v7822_v32, %v5814_v30  ;;  %v7795_v44 = vld [vmem:[%s12104_s1 + $0x398] sm:$0xf0] }
  0x19   :  { %3988 = vmatpush.bf16.msra.mxu1 %v5371_v5  ;;  %v6006_v37 = vld [vmem:[%s12104_s1 + $0x5e8] sm:$0xf]  ;;  %v7870_v38 = vld [vmem:[%s12104_s1 + $0x5f0] sm:$0xf0]  ;;  %v5911_v42 = vor.u32 %v7846_v34, %v5910_v33  ;;  %v5802_v45 = vld [vmem:[%s12104_s1 + $0x450] sm:$0xf]  ;;  %v5707_v52 = vor.u32 %v7795_v44, %v5706_v43 }
  0x1a   :  { %4001 = vmatpush.bf16.msra.mxu2 %v5467_v6  ;;  %v6007_v46 = vor.u32 %v7870_v38, %v6006_v37  ;;  %v7819_v47 = vld [vmem:[%s12104_s1 + $0x458] sm:$0xf0]  ;;  %v5898_v48 = vld [vmem:[%s12104_s1 + $0x510] sm:$0xf]  ;;  %v5694_v53 = vld [vmem:[%s12104_s1 + $0x378] sm:$0xf] }
  0x1b   :  { %4014 = vmatpush.bf16.msra.mxu3 %v5563_v10  ;;  %v7843_v49 = vld [vmem:[%s12104_s1 + $0x518] sm:$0xf0]  ;;  %v5994_v50 = vld [vmem:[%s12104_s1 + $0x5d0] sm:$0xf]  ;;  %v5803_v54 = vor.u32 %v7819_v47, %v5802_v45  ;;  %v7792_v56 = vld [vmem:[%s12104_s1 + $0x380] sm:$0xf0] }
  0x1c   :  { %3976 = vmatpush.bf16.msra.mxu0 %v5263_v16  ;;  %v7867_v51 = vld [vmem:[%s12104_s1 + $0x5d8] sm:$0xf0]  ;;  %v5899_v55 = vor.u32 %v7843_v49, %v5898_v48  ;;  %v5790_v57 = vld [vmem:[%s12104_s1 + $0x438] sm:$0xf]  ;;  %v7816_v58 = vld [vmem:[%s12104_s1 + $0x440] sm:$0xf0]  ;;  %v5695_v0 = vor.u32 %v7792_v56, %v5694_v53 }
  0x1d   :  { %3989 = vmatpush.bf16.msra.mxu1 %v5359_v19  ;;  %v5995_v59 = vor.u32 %v7867_v51, %v5994_v50  ;;  %v5886_v60 = vld [vmem:[%s12104_s1 + $0x4f8] sm:$0xf]  ;;  %v7840_v61 = vld [vmem:[%s12104_s1 + $0x500] sm:$0xf0]  ;;  %v5791_v1 = vor.u32 %v7816_v58, %v5790_v57  ;;  %v27_v2 = vld [vmem:[%s12105_s0 + $0x8] sm:$0xff] }
  0x1e   :  { %4002 = vmatpush.bf16.msra.mxu2 %v5455_v20  ;;  %v5982_v62 = vld [vmem:[%s12104_s1 + $0x5b8] sm:$0xf]  ;;  %v7864_v63 = vld [vmem:[%s12104_s1 + $0x5c0] sm:$0xf0]  ;;  %v5887_v4 = vor.u32 %v7840_v61, %v5886_v60  ;;  %v5682_v5 = vld [vmem:[%s12104_s1 + $0x360] sm:$0xf]  ;;  %v828_v8 = vunpack.c.l.b16 %v27_v2  ;;  %v829_v10 = vunpack.c.h.b16 %v27_v2 }
  0x1f   :  { %4015 = vmatpush.bf16.msra.mxu3 %v5551_v24  ;;  %v26_v3 = vld [vmem:[%s12105_s0] sm:$0xff]  ;;  %v7789_v6 = vld [vmem:[%s12104_s1 + $0x368] sm:$0xf0]  ;;  %v5983_v11 = vor.u32 %v7864_v63, %v5982_v62  ;;  %v5670_v25 = vld [vmem:[%s12104_s1 + $0x348] sm:$0xf] }
  0x20   :  { %3977 = vmatpush.bf16.msra.mxu0 %v5251_v31  ;;  %v5778_v7 = vld [vmem:[%s12104_s1 + $0x420] sm:$0xf]  ;;  %v826_v9 = vunpack.c.l.b16 %v26_v3  ;;  %v7813_v12 = vld [vmem:[%s12104_s1 + $0x428] sm:$0xf0]  ;;  %v827_v15 = vunpack.c.h.b16 %v26_v3  ;;  %v8630_v18 = vpack.c.b16 %v828_v8, %v828_v8  ;;  %v8634_v20 = vpack.c.b16 %v829_v10, %v829_v10  ;;  %v7786_v26 = vld [vmem:[%s12104_s1 + $0x350] sm:$0xf0] }
  0x21   :  { %3990 = vmatpush.bf16.msra.mxu1 %v5347_v35  ;;  %v5874_v13 = vld [vmem:[%s12104_s1 + $0x4e0] sm:$0xf]  ;;  %v7837_v14 = vld [vmem:[%s12104_s1 + $0x4e8] sm:$0xf0]  ;;  %v5683_v21 = vor.u32 %v7789_v6, %v5682_v5  ;;  %v5779_v23 = vor.u32 %v7813_v12, %v5778_v7  ;;  %v5766_v27 = vld [vmem:[%s12104_s1 + $0x408] sm:$0xf]  ;;  %v5671_v34 = vor.u32 %v7786_v26, %v5670_v25 }
  0x22   :  { %4003 = vmatpush.bf16.msra.mxu2 %v5443_v36  ;;  %v5970_v16 = vld [vmem:[%s12104_s1 + $0x5a0] sm:$0xf]  ;;  %v7861_v17 = vld [vmem:[%s12104_s1 + $0x5a8] sm:$0xf0]  ;;  %v8632_v19 = vpack.c.b16 %v826_v9, %v826_v9  ;;  %v8636_v22 = vpack.c.b16 %v827_v15, %v827_v15  ;;  %v5875_v24 = vor.u32 %v7837_v14, %v5874_v13  ;;  %v7810_v29 = vld [vmem:[%s12104_s1 + $0x410] sm:$0xf0] }
  0x23   :  { %4016 = vmatpush.bf16.msra.mxu3 %v5539_v39  ;;  %v5971_v28 = vor.u32 %v7861_v17, %v5970_v16  ;;  %v5862_v30 = vld [vmem:[%s12104_s1 + $0x4c8] sm:$0xf]  ;;  %v7834_v31 = vld [vmem:[%s12104_s1 + $0x4d0] sm:$0xf0]  ;;  %v5767_v35 = vor.u32 %v7810_v29, %v5766_v27  ;;  %v5658_v37 = vld [vmem:[%s12104_s1 + $0x330] sm:$0xf] }
  0x24   :  { %4022 = vmatpush.bf16.msrb.mxu0 %v5719_v40  ;;  %v5958_v32 = vld [vmem:[%s12104_s1 + $0x588] sm:$0xf]  ;;  %v7858_v33 = vld [vmem:[%s12104_s1 + $0x590] sm:$0xf0]  ;;  %3991 = vmatmul.bf16.vlgmr.msra.gmra.mxu1 %v8636_v22  ;;  %v5863_v36 = vor.u32 %v7834_v31, %v5862_v30  ;;  %v7783_v38 = vld [vmem:[%s12104_s1 + $0x338] sm:$0xf0] }
  0x25   :  { %4035 = vmatpush.bf16.msrb.mxu1 %v5815_v41  ;;  %4004 = vmatmul.bf16.vlgmr.msra.gmra.mxu2 %v8630_v18  ;;  %v5754_v39 = vld [vmem:[%s12104_s1 + $0x3f0] sm:$0xf]  ;;  %v5959_v40 = vor.u32 %v7858_v33, %v5958_v32  ;;  %v7807_v41 = vld [vmem:[%s12104_s1 + $0x3f8] sm:$0xf0]  ;;  %v5646_v49 = vld [vmem:[%s12104_s1 + $0x318] sm:$0xf] }
  0x26   :  { %4048 = vmatpush.bf16.msrb.mxu2 %v5911_v42  ;;  %3978 = vmatmul.bf16.vlgmr.msra.gmra.mxu0 %v8632_v19  ;;  %v5850_v42 = vld [vmem:[%s12104_s1 + $0x4b0] sm:$0xf]  ;;  %v7831_v43 = vld [vmem:[%s12104_s1 + $0x4b8] sm:$0xf0]  ;;  %v5755_v47 = vor.u32 %v7807_v41, %v5754_v39  ;;  %v7780_v50 = vld [vmem:[%s12104_s1 + $0x320] sm:$0xf0] }
  0x27   :  { %4061 = vmatpush.bf16.msrb.mxu3 %v6007_v46  ;;  %v5946_v44 = vld [vmem:[%s12104_s1 + $0x570] sm:$0xf]  ;;  %v7855_v45 = vld [vmem:[%s12104_s1 + $0x578] sm:$0xf0]  ;;  %v5659_v46 = vor.u32 %v7783_v38, %v5658_v37  ;;  %v5851_v48 = vor.u32 %v7831_v43, %v5850_v42  ;;  %v5742_v51 = vld [vmem:[%s12104_s1 + $0x3d8] sm:$0xf] }
  0x28   :  { %4023 = vmatpush.bf16.msrb.mxu0 %v5707_v52  ;;  %4017 = vmatmul.bf16.vlgmr.msra.gmra.mxu3 %v8634_v20  ;;  %v5947_v52 = vor.u32 %v7855_v45, %v5946_v44  ;;  %v7804_v53 = vld [vmem:[%s12104_s1 + $0x3e0] sm:$0xf0]  ;;  %v5934_v56 = vld [vmem:[%s12104_s1 + $0x558] sm:$0xf]  ;;  %v5634_v58 = vld [vmem:[%s12104_s1 + $0x300] sm:$0xf] }
  0x29   :  { %4036 = vmatpush.bf16.msrb.mxu1 %v5803_v54  ;;  %v5838_v54 = vld [vmem:[%s12104_s1 + $0x498] sm:$0xf]  ;;  %v7852_v57 = vld [vmem:[%s12104_s1 + $0x560] sm:$0xf0]  ;;  %v7777_v60 = vld [vmem:[%s12104_s1 + $0x308] sm:$0xf0]  ;;  %v5743_v63 = vor.u32 %v7804_v53, %v5742_v51 }
  0x2a   :  { %4049 = vmatpush.bf16.msrb.mxu2 %v5899_v55  ;;  %v7828_v55 = vld [vmem:[%s12104_s1 + $0x4a0] sm:$0xf0]  ;;  %v5730_v61 = vld [vmem:[%s12104_s1 + $0x3c0] sm:$0xf]  ;;  %v7801_v62 = vld [vmem:[%s12104_s1 + $0x3c8] sm:$0xf0] }
  0x2b   :  { %4062 = vmatpush.bf16.msrb.mxu3 %v5995_v59  ;;  %v5647_v59 = vor.u32 %v7780_v50, %v5646_v49  ;;  %v7825_v2 = vld [vmem:[%s12104_s1 + $0x488] sm:$0xf0]  ;;  %v29_v3 = vld [vmem:[%s12105_s0 + $0x18] sm:$0xff]  ;;  %v5922_v5 = vld [vmem:[%s12104_s1 + $0x540] sm:$0xf]  ;;  %v5731_v16 = vor.u32 %v7801_v62, %v5730_v61 }
  0x2c   :  { %4024 = vmatpush.bf16.msrb.mxu0 %v5695_v0  ;;  %v5839_v0 = vor.u32 %v7828_v55, %v5838_v54  ;;  %v7849_v6 = vld [vmem:[%s12104_s1 + $0x548] sm:$0xf0]  ;;  %v28_v7 = vld [vmem:[%s12105_s0 + $0x10] sm:$0xff]  ;;  %v6102_v8 = vld [vmem:[%s12104_s1 + $0x6a8] sm:$0xf]  ;;  %v832_v15 = vunpack.c.l.b16 %v29_v3  ;;  %v833_v25 = vunpack.c.h.b16 %v29_v3 }
  0x2d   :  { %4037 = vmatpush.bf16.msrb.mxu1 %v5791_v1  ;;  %v5826_v1 = vld [vmem:[%s12104_s1 + $0x480] sm:$0xf]  ;;  %v7894_v9 = vld [vmem:[%s12104_s1 + $0x6b0] sm:$0xf0]  ;;  %v6198_v10 = vld [vmem:[%s12104_s1 + $0x768] sm:$0xf]  ;;  %v5923_v26 = vor.u32 %v7849_v6, %v5922_v5 }
  0x2e   :  { %4050 = vmatpush.bf16.msrb.mxu2 %v5887_v4  ;;  %v5935_v4 = vor.u32 %v7852_v57, %v5934_v56  ;;  %v7918_v12 = vld [vmem:[%s12104_s1 + $0x770] sm:$0xf0]  ;;  %v6294_v13 = vld [vmem:[%s12104_s1 + $0x828] sm:$0xf]  ;;  %v5827_v17 = vor.u32 %v7825_v2, %v5826_v1  ;;  %v6103_v27 = vor.u32 %v7894_v9, %v6102_v8  ;;  %v6090_v31 = vld [vmem:[%s12104_s1 + $0x690] sm:$0xf]  ;;  %v8786_v38 = vpack.c.b16 %v832_v15, %v832_v15 }
  0x2f   :  { %4063 = vmatpush.bf16.msrb.mxu3 %v5983_v11  ;;  %v5635_v11 = vor.u32 %v7777_v60, %v5634_v58  ;;  %v7942_v14 = vld [vmem:[%s12104_s1 + $0x830] sm:$0xf0]  ;;  %v6199_v29 = vor.u32 %v7918_v12, %v6198_v10  ;;  %v7891_v32 = vld [vmem:[%s12104_s1 + $0x698] sm:$0xf0]  ;;  %v6186_v33 = vld [vmem:[%s12104_s1 + $0x750] sm:$0xf]  ;;  %v8796_v42 = vpack.c.b16 %v833_v25, %v833_v25 }
  0x30   :  { %4025 = vmatpush.bf16.msrb.mxu0 %v5683_v21  ;;  %v6390_v21 = vld [vmem:[%s12104_s1 + $0x8e8] sm:$0xf]  ;;  %v6295_v30 = vor.u32 %v7942_v14, %v6294_v13  ;;  %v7939_v37 = vld [vmem:[%s12104_s1 + $0x818] sm:$0xf0]  ;;  %v6378_v39 = vld [vmem:[%s12104_s1 + $0x8d0] sm:$0xf]  ;;  %v6091_v43 = vor.u32 %v7891_v32, %v6090_v31 }
  0x31   :  { %4038 = vmatpush.bf16.msrb.mxu1 %v5779_v23  ;;  %v7966_v23 = vld [vmem:[%s12104_s1 + $0x8f0] sm:$0xf0]  ;;  %v6174_v49 = vld [vmem:[%s12104_s1 + $0x738] sm:$0xf]  ;;  %v7912_v51 = vld [vmem:[%s12104_s1 + $0x740] sm:$0xf0] }
  0x32   :  { %4051 = vmatpush.bf16.msrb.mxu2 %v5875_v24  ;;  %v830_v24 = vunpack.c.l.b16 %v28_v7  ;;  %v7936_v53 = vld [vmem:[%s12104_s1 + $0x800] sm:$0xf0]  ;;  %v6366_v54 = vld [vmem:[%s12104_s1 + $0x8b8] sm:$0xf]  ;;  %v6175_v57 = vor.u32 %v7912_v51, %v6174_v49  ;;  %v7885_v60 = vld [vmem:[%s12104_s1 + $0x668] sm:$0xf0] }
  0x33   :  { %4064 = vmatpush.bf16.msrb.mxu3 %v5971_v28  ;;  %v831_v28 = vunpack.c.h.b16 %v28_v7  ;;  %v7960_v55 = vld [vmem:[%s12104_s1 + $0x8c0] sm:$0xf0]  ;;  %v6162_v61 = vld [vmem:[%s12104_s1 + $0x720] sm:$0xf]  ;;  %v7933_v1 = vld [vmem:[%s12104_s1 + $0x7e8] sm:$0xf0] }
  0x34   :  { %4026 = vmatpush.bf16.msrb.mxu0 %v5671_v34  ;;  %v6391_v34 = vor.u32 %v7966_v23, %v6390_v21  ;;  %v8794_v41 = vpack.c.b16 %v830_v24, %v830_v24  ;;  %v6367_v62 = vor.u32 %v7960_v55, %v6366_v54  ;;  %v6354_v2 = vld [vmem:[%s12104_s1 + $0x8a0] sm:$0xf]  ;;  %v7957_v3 = vld [vmem:[%s12104_s1 + $0x8a8] sm:$0xf0]  ;;  %v6054_v7 = vld [vmem:[%s12104_s1 + $0x648] sm:$0xf] }
  0x35   :  { %4039 = vmatpush.bf16.msrb.mxu1 %v5767_v35  ;;  %v7915_v35 = vld [vmem:[%s12104_s1 + $0x758] sm:$0xf0]  ;;  %v8798_v44 = vpack.c.b16 %v831_v28, %v831_v28  ;;  %v7882_v8 = vld [vmem:[%s12104_s1 + $0x650] sm:$0xf0]  ;;  %v6150_v9 = vld [vmem:[%s12104_s1 + $0x708] sm:$0xf]  ;;  %v6355_v10 = vor.u32 %v7957_v3, %v6354_v2 }
  0x36   :  { %4052 = vmatpush.bf16.msrb.mxu2 %v5863_v36  ;;  %v6282_v36 = vld [vmem:[%s12104_s1 + $0x810] sm:$0xf]  ;;  %v6187_v45 = vor.u32 %v7915_v35, %v6186_v33  ;;  %v6246_v12 = vld [vmem:[%s12104_s1 + $0x7c8] sm:$0xf]  ;;  %v7930_v13 = vld [vmem:[%s12104_s1 + $0x7d0] sm:$0xf0] }
  0x37   :  { %4065 = vmatpush.bf16.msrb.mxu3 %v5959_v40  ;;  %v7963_v40 = vld [vmem:[%s12104_s1 + $0x8d8] sm:$0xf0]  ;;  %v6342_v14 = vld [vmem:[%s12104_s1 + $0x888] sm:$0xf]  ;;  %v7954_v15 = vld [vmem:[%s12104_s1 + $0x890] sm:$0xf0]  ;;  %v6247_v21 = vor.u32 %v7930_v13, %v6246_v12 }
  0x38   :  { %4027 = vmatpush.bf16.msrb.mxu0 %v5659_v46  ;;  %v6283_v46 = vor.u32 %v7939_v37, %v6282_v36  ;;  %v6379_v50 = vor.u32 %v7963_v40, %v6378_v39  ;;  %v6042_v23 = vld [vmem:[%s12104_s1 + $0x630] sm:$0xf]  ;;  %v7879_v24 = vld [vmem:[%s12104_s1 + $0x638] sm:$0xf0]  ;;  %v6030_v35 = vld [vmem:[%s12104_s1 + $0x618] sm:$0xf] }
  0x39   :  { %4040 = vmatpush.bf16.msrb.mxu1 %v5755_v47  ;;  %v6078_v47 = vld [vmem:[%s12104_s1 + $0x678] sm:$0xf]  ;;  %v6138_v25 = vld [vmem:[%s12104_s1 + $0x6f0] sm:$0xf]  ;;  %v7951_v31 = vld [vmem:[%s12104_s1 + $0x878] sm:$0xf0]  ;;  %v6043_v32 = vor.u32 %v7879_v24, %v6042_v23 }
  0x3a   :  { %4053 = vmatpush.bf16.msrb.mxu2 %v5851_v48  ;;  %v7888_v48 = vld [vmem:[%s12104_s1 + $0x680] sm:$0xf0]  ;;  %v6234_v28 = vld [vmem:[%s12104_s1 + $0x7b0] sm:$0xf]  ;;  %v6126_v37 = vld [vmem:[%s12104_s1 + $0x6d8] sm:$0xf] }
  0x3b   :  { %4066 = vmatpush.bf16.msrb.mxu3 %v5947_v52  ;;  %v6270_v52 = vld [vmem:[%s12104_s1 + $0x7f8] sm:$0xf]  ;;  %v6079_v56 = vor.u32 %v7888_v48, %v6078_v47  ;;  %v7876_v36 = vld [vmem:[%s12104_s1 + $0x620] sm:$0xf0]  ;;  %v6018_v48 = vld [vmem:[%s12104_s1 + $0x600] sm:$0xf] }
  0x3c   :  { %4028 = vmatpush.bf16.msrb.mxu0 %v5647_v59  ;;  %v6271_v58 = vor.u32 %v7936_v53, %v6270_v52  ;;  %v6066_v59 = vld [vmem:[%s12104_s1 + $0x660] sm:$0xf]  ;;  %v7900_v40 = vld [vmem:[%s12104_s1 + $0x6e0] sm:$0xf0]  ;;  %v6031_v49 = vor.u32 %v7876_v36, %v6030_v35  ;;  %v7897_v52 = vld [vmem:[%s12104_s1 + $0x6c8] sm:$0xf0] }
  0x3d   :  { %4041 = vmatpush.bf16.msrb.mxu1 %v5743_v63  ;;  %v7909_v63 = vld [vmem:[%s12104_s1 + $0x728] sm:$0xf0]  ;;  %v7948_v47 = vld [vmem:[%s12104_s1 + $0x860] sm:$0xf0]  ;;  %v6114_v51 = vld [vmem:[%s12104_s1 + $0x6c0] sm:$0xf]  ;;  %v6127_v53 = vor.u32 %v7900_v40, %v6126_v37 }
  0x3e   :  { %4054 = vmatpush.bf16.msrb.mxu2 %v5839_v0  ;;  %v6258_v0 = vld [vmem:[%s12104_s1 + $0x7e0] sm:$0xf]  ;;  %v6163_v5 = vor.u32 %v7909_v63, %v6162_v61  ;;  %v31_v61 = vld [vmem:[%s12105_s0 + $0x28] sm:$0xff]  ;;  %v7990_v63 = vld [vmem:[%s12104_s1 + $0x9b0] sm:$0xf0] }
  0x3f   :  { %4067 = vmatpush.bf16.msrb.mxu3 %v5935_v4  ;;  %v6067_v4 = vor.u32 %v7885_v60, %v6066_v59  ;;  %v6259_v6 = vor.u32 %v7933_v1, %v6258_v0  ;;  %v6210_v55 = vld [vmem:[%s12104_s1 + $0x780] sm:$0xf]  ;;  %v7945_v60 = vld [vmem:[%s12104_s1 + $0x848] sm:$0xf0]  ;;  %v6582_v0 = vld [vmem:[%s12104_s1 + $0xa68] sm:$0xf] }
  0x40   :  { %4029 = vmatpush.bf16.msrb.mxu0 %v5635_v11  ;;  %v7906_v11 = vld [vmem:[%s12104_s1 + $0x710] sm:$0xf0]  ;;  %v6306_v59 = vld [vmem:[%s12104_s1 + $0x840] sm:$0xf]  ;;  %v6678_v3 = vld [vmem:[%s12104_s1 + $0xb28] sm:$0xf] }
  0x41   :  { %4042 = vmatpush.bf16.msrb.mxu1 %v5731_v16  ;;  %v6055_v16 = vor.u32 %v7882_v8, %v6054_v7  ;;  %v8014_v2 = vld [vmem:[%s12104_s1 + $0xa70] sm:$0xf0]  ;;  %v6774_v8 = vld [vmem:[%s12104_s1 + $0xbe8] sm:$0xf]  ;;  %v6307_v12 = vor.u32 %v7945_v60, %v6306_v59  ;;  %v6570_v23 = vld [vmem:[%s12104_s1 + $0xa50] sm:$0xf] }
  0x42   :  { %4055 = vmatpush.bf16.msrb.mxu2 %v5827_v17  ;;  %v6151_v17 = vor.u32 %v7906_v11, %v6150_v9  ;;  %v8062_v9 = vld [vmem:[%s12104_s1 + $0xbf0] sm:$0xf0]  ;;  %v6462_v37 = vld [vmem:[%s12104_s1 + $0x978] sm:$0xf]  ;;  %v8029_v59 = vld [vmem:[%s12104_s1 + $0xae8] sm:$0xf0] }
  0x43   :  { %4068 = vmatpush.bf16.msrb.mxu3 %v5923_v26  ;;  %4030 = vmatmul.bf16.vlgmr.msrb.gmra.mxu0 %v8794_v41  ;;  %v6343_v26 = vor.u32 %v7954_v15, %v6342_v14  ;;  %v837_v14 = vunpack.c.h.b16 %v31_v61  ;;  %v6583_v15 = vor.u32 %v8014_v2, %v6582_v0  ;;  %v6775_v24 = vor.u32 %v8062_v9, %v6774_v8  ;;  %v6558_v40 = vld [vmem:[%s12104_s1 + $0xa38] sm:$0xf]  ;;  %v6738_v60 = vld [vmem:[%s12104_s1 + $0xba0] sm:$0xf]  ;;  %v7978_v2 = vld [vmem:[%s12104_s1 + $0x950] sm:$0xf0] }
  0x44   :  { %4074 = vmatpush.bf16.msra.mxu0 %v6103_v27  ;;  %4043 = vmatmul.bf16.vlgmr.msrb.gmra.mxu1 %v8798_v44  ;;  %v7903_v27 = vld [vmem:[%s12104_s1 + $0x6f8] sm:$0xf0]  ;;  %v6726_v8 = vld [vmem:[%s12104_s1 + $0xb88] sm:$0xf]  ;;  %v8050_v9 = vld [vmem:[%s12104_s1 + $0xb90] sm:$0xf0] }
  0x45   :  { %4087 = vmatpush.bf16.msra.mxu1 %v6199_v29  ;;  %4056 = vmatmul.bf16.vlgmr.msrb.gmra.mxu2 %v8786_v38  ;;  %v7927_v29 = vld [vmem:[%s12104_s1 + $0x7b8] sm:$0xf0]  ;;  %v6139_v33 = vor.u32 %v7903_v27, %v6138_v25  ;;  %v6666_v27 = vld [vmem:[%s12104_s1 + $0xb10] sm:$0xf] }
  0x46   :  { %4100 = vmatpush.bf16.msra.mxu2 %v6295_v30  ;;  %4069 = vmatmul.bf16.vlgmr.msrb.gmra.mxu3 %v8796_v42  ;;  %v6330_v30 = vld [vmem:[%s12104_s1 + $0x870] sm:$0xf] }
  0x47   :  { %4113 = vmatpush.bf16.msra.mxu3 %v6391_v34  ;;  %v6235_v34 = vor.u32 %v7927_v29, %v6234_v28  ;;  %v6331_v39 = vor.u32 %v7951_v31, %v6330_v30  ;;  %v8035_v28 = vld [vmem:[%s12104_s1 + $0xb18] sm:$0xf0]  ;;  %v6762_v31 = vld [vmem:[%s12104_s1 + $0xbd0] sm:$0xf] }
  0x48   :  { %4075 = vmatpush.bf16.msra.mxu0 %v6091_v43  ;;  %v6222_v43 = vld [vmem:[%s12104_s1 + $0x798] sm:$0xf]  ;;  %v6667_v36 = vor.u32 %v8035_v28, %v6666_v27 }
  0x49   :  { %4088 = vmatpush.bf16.msra.mxu1 %v6187_v45  ;;  %v7924_v45 = vld [vmem:[%s12104_s1 + $0x7a0] sm:$0xf0] }
  0x4a   :  { %4101 = vmatpush.bf16.msra.mxu2 %v6283_v46  ;;  %v6318_v46 = vld [vmem:[%s12104_s1 + $0x858] sm:$0xf]  ;;  %v6223_v54 = vor.u32 %v7924_v45, %v6222_v43  ;;  %v8008_v45 = vld [vmem:[%s12104_s1 + $0xa40] sm:$0xf0] }
  0x4b   :  { %4114 = vmatpush.bf16.msra.mxu3 %v6379_v50  ;;  %v7873_v50 = vld [vmem:[%s12104_s1 + $0x608] sm:$0xf0] }
  0x4c   :  { %4076 = vmatpush.bf16.msra.mxu0 %v6079_v56  ;;  %v7921_v56 = vld [vmem:[%s12104_s1 + $0x788] sm:$0xf0]  ;;  %v6019_v1 = vor.u32 %v7873_v50, %v6018_v48  ;;  %v6750_v48 = vld [vmem:[%s12104_s1 + $0xbb8] sm:$0xf] }
  0x4d   :  { %4089 = vmatpush.bf16.msra.mxu1 %v6175_v57  ;;  %v30_v57 = vld [vmem:[%s12105_s0 + $0x20] sm:$0xff]  ;;  %v6211_v7 = vor.u32 %v7921_v56, %v6210_v55 }
  0x4e   :  { %4102 = vmatpush.bf16.msra.mxu2 %v6271_v58  ;;  %v6319_v58 = vor.u32 %v7948_v47, %v6318_v46  ;;  %v835_v11 = vunpack.c.h.b16 %v30_v57  ;;  %v6654_v46 = vld [vmem:[%s12104_s1 + $0xaf8] sm:$0xf]  ;;  %v8032_v47 = vld [vmem:[%s12104_s1 + $0xb00] sm:$0xf0]  ;;  %v6546_v55 = vld [vmem:[%s12104_s1 + $0xa20] sm:$0xf] }
  0x4f   :  { %4115 = vmatpush.bf16.msra.mxu3 %v6367_v62  ;;  %v6486_v62 = vld [vmem:[%s12104_s1 + $0x9a8] sm:$0xf] }
  0x50   :  { %4077 = vmatpush.bf16.msra.mxu0 %v6067_v4  ;;  %v8038_v4 = vld [vmem:[%s12104_s1 + $0xb30] sm:$0xf0]  ;;  %v6487_v13 = vor.u32 %v7990_v63, %v6486_v62  ;;  %v9000_v30 = vpack.c.b16 %v835_v11, %v835_v11 }
  0x51   :  { %4090 = vmatpush.bf16.msra.mxu1 %v6163_v5  ;;  %v834_v5 = vunpack.c.l.b16 %v30_v57  ;;  %v8005_v57 = vld [vmem:[%s12104_s1 + $0xa28] sm:$0xf0] }
  0x52   :  { %4103 = vmatpush.bf16.msra.mxu2 %v6259_v6  ;;  %v6115_v6 = vor.u32 %v7897_v52, %v6114_v51  ;;  %v6559_v51 = vor.u32 %v8008_v45, %v6558_v40  ;;  %v6655_v52 = vor.u32 %v8032_v47, %v6654_v46  ;;  %v6547_v63 = vor.u32 %v8005_v57, %v6546_v55  ;;  %v8020_v40 = vld [vmem:[%s12104_s1 + $0xaa0] sm:$0xf0]  ;;  %v6402_v46 = vld [vmem:[%s12104_s1 + $0x900] sm:$0xf]  ;;  %v32_v55 = vld [vmem:[%s12105_s0 + $0x30] sm:$0xff] }
  0x53   :  { %4116 = vmatpush.bf16.msra.mxu3 %v6355_v10  ;;  %v836_v10 = vunpack.c.l.b16 %v31_v61  ;;  %v8987_v25 = vpack.c.b16 %v834_v5, %v834_v5  ;;  %v8053_v61 = vld [vmem:[%s12104_s1 + $0xba8] sm:$0xf0]  ;;  %v8002_v5 = vld [vmem:[%s12104_s1 + $0xa10] sm:$0xf0]  ;;  %v8044_v45 = vld [vmem:[%s12104_s1 + $0xb60] sm:$0xf0] }
  0x54   :  { %4078 = vmatpush.bf16.msra.mxu0 %v6055_v16  ;;  %v6679_v16 = vor.u32 %v8038_v4, %v6678_v3  ;;  %v6534_v3 = vld [vmem:[%s12104_s1 + $0xa08] sm:$0xf]  ;;  %v6739_v4 = vor.u32 %v8053_v61, %v6738_v60  ;;  %v6690_v57 = vld [vmem:[%s12104_s1 + $0xb40] sm:$0xf]  ;;  %v8086_v61 = vld [vmem:[%s12104_s1 + $0xcb0] sm:$0xf0] }
  0x55   :  { %4091 = vmatpush.bf16.msra.mxu1 %v6151_v17  ;;  %v6474_v17 = vld [vmem:[%s12104_s1 + $0x990] sm:$0xf]  ;;  %v8998_v29 = vpack.c.b16 %v836_v10, %v836_v10  ;;  %v6535_v11 = vor.u32 %v8002_v5, %v6534_v3  ;;  %v6870_v60 = vld [vmem:[%s12104_s1 + $0xca8] sm:$0xf]  ;;  %v838_v3 = vunpack.c.l.b16 %v32_v55 }
  0x56   :  { %4104 = vmatpush.bf16.msra.mxu2 %v6247_v21  ;;  %v7987_v21 = vld [vmem:[%s12104_s1 + $0x998] sm:$0xf0] }
  0x57   :  { %4117 = vmatpush.bf16.msra.mxu3 %v6343_v26  ;;  %v8011_v26 = vld [vmem:[%s12104_s1 + $0xa58] sm:$0xf0] }
  0x58   :  { %4079 = vmatpush.bf16.msra.mxu0 %v6043_v32  ;;  %v8059_v32 = vld [vmem:[%s12104_s1 + $0xbd8] sm:$0xf0]  ;;  %v6571_v35 = vor.u32 %v8011_v26, %v6570_v23 }
  0x59   :  { %4092 = vmatpush.bf16.msra.mxu1 %v6139_v33  ;;  %v9008_v33 = vpack.c.b16 %v837_v14, %v837_v14  ;;  %v6763_v43 = vor.u32 %v8059_v32, %v6762_v31  ;;  %v7975_v14 = vld [vmem:[%s12104_s1 + $0x938] sm:$0xf0]  ;;  %v6414_v32 = vld [vmem:[%s12104_s1 + $0x918] sm:$0xf] }
  0x5a   :  { %4105 = vmatpush.bf16.msra.mxu2 %v6235_v34  ;;  %v6475_v34 = vor.u32 %v7987_v21, %v6474_v17  ;;  %v7999_v17 = vld [vmem:[%s12104_s1 + $0x9f8] sm:$0xf0]  ;;  %v6618_v21 = vld [vmem:[%s12104_s1 + $0xab0] sm:$0xf] }
  0x5b   :  { %4118 = vmatpush.bf16.msra.mxu3 %v6331_v39  ;;  %v7984_v39 = vld [vmem:[%s12104_s1 + $0x980] sm:$0xf0]  ;;  %v8023_v23 = vld [vmem:[%s12104_s1 + $0xab8] sm:$0xf0] }
  0x5c   :  { %4080 = vmatpush.bf16.msra.mxu0 %v6031_v49  ;;  %v8056_v49 = vld [vmem:[%s12104_s1 + $0xbc0] sm:$0xf0]  ;;  %v6463_v50 = vor.u32 %v7984_v39, %v6462_v37  ;;  %v8047_v26 = vld [vmem:[%s12104_s1 + $0xb78] sm:$0xf0]  ;;  %v6619_v31 = vor.u32 %v8023_v23, %v6618_v21  ;;  %v6606_v39 = vld [vmem:[%s12104_s1 + $0xa98] sm:$0xf]  ;;  %v9197_v23 = vpack.c.b16 %v838_v3, %v838_v3 }
  0x5d   :  { %4093 = vmatpush.bf16.msra.mxu1 %v6127_v53  ;;  %v6450_v53 = vld [vmem:[%s12104_s1 + $0x960] sm:$0xf]  ;;  %v6751_v56 = vor.u32 %v8056_v49, %v6750_v48  ;;  %v7996_v37 = vld [vmem:[%s12104_s1 + $0x9e0] sm:$0xf0]  ;;  %v7969_v48 = vld [vmem:[%s12104_s1 + $0x908] sm:$0xf0] }
  0x5e   :  { %4106 = vmatpush.bf16.msra.mxu2 %v6223_v54  ;;  %v7981_v54 = vld [vmem:[%s12104_s1 + $0x968] sm:$0xf0]  ;;  %v6498_v49 = vld [vmem:[%s12104_s1 + $0x9c0] sm:$0xf]  ;;  %v6822_v3 = vld [vmem:[%s12104_s1 + $0xc48] sm:$0xf] }
  0x5f   :  { %4119 = vmatpush.bf16.msra.mxu3 %v6319_v58  ;;  %v6642_v58 = vld [vmem:[%s12104_s1 + $0xae0] sm:$0xf]  ;;  %v6451_v62 = vor.u32 %v7981_v54, %v6450_v53  ;;  %v8017_v54 = vld [vmem:[%s12104_s1 + $0xa88] sm:$0xf0] }
  0x60   :  { %4081 = vmatpush.bf16.msra.mxu0 %v6019_v1  ;;  %v6643_v0 = vor.u32 %v8029_v59, %v6642_v58  ;;  %v6438_v1 = vld [vmem:[%s12104_s1 + $0x948] sm:$0xf]  ;;  %v6594_v53 = vld [vmem:[%s12104_s1 + $0xa80] sm:$0xf]  ;;  %v8041_v58 = vld [vmem:[%s12104_s1 + $0xb48] sm:$0xf0] }
  0x61   :  { %4094 = vmatpush.bf16.msra.mxu1 %v6115_v6  ;;  %v6630_v6 = vld [vmem:[%s12104_s1 + $0xac8] sm:$0xf]  ;;  %v6439_v10 = vor.u32 %v7978_v2, %v6438_v1  ;;  %v33_v59 = vld [vmem:[%s12105_s0 + $0x38] sm:$0xff]  ;;  %v8134_v2 = vld [vmem:[%s12104_s1 + $0xe30] sm:$0xf0]  ;;  %v6595_v5 = vor.u32 %v8017_v54, %v6594_v53 }
  0x62   :  { %4107 = vmatpush.bf16.msra.mxu2 %v6211_v7  ;;  %v8026_v7 = vld [vmem:[%s12104_s1 + $0xad0] sm:$0xf0]  ;;  %v7062_v1 = vld [vmem:[%s12104_s1 + $0xe28] sm:$0xf] }
  0x63   :  { %4120 = vmatpush.bf16.msra.mxu3 %v6307_v12  ;;  %4082 = vmatmul.bf16.vlgmr.msra.gmra.mxu0 %v8987_v25  ;;  %v6631_v12 = vor.u32 %v8026_v7, %v6630_v6  ;;  %v7158_v6 = vld [vmem:[%s12104_s1 + $0xee8] sm:$0xf]  ;;  %v8158_v7 = vld [vmem:[%s12104_s1 + $0xef0] sm:$0xf0] }
  0x64   :  { %4126 = vmatpush.bf16.msrb.mxu0 %v6487_v13  ;;  %4095 = vmatmul.bf16.vlgmr.msra.gmra.mxu1 %v9000_v30  ;;  %v6426_v13 = vld [vmem:[%s12104_s1 + $0x930] sm:$0xf]  ;;  %v7159_v21 = vor.u32 %v8158_v7, %v7158_v6  ;;  %v8098_v7 = vld [vmem:[%s12104_s1 + $0xd10] sm:$0xf0] }
  0x65   :  { %4139 = vmatpush.bf16.msrb.mxu1 %v6583_v15  ;;  %4108 = vmatmul.bf16.vlgmr.msra.gmra.mxu2 %v8998_v29  ;;  %v6522_v15 = vld [vmem:[%s12104_s1 + $0x9f0] sm:$0xf]  ;;  %v6427_v27 = vor.u32 %v7975_v14, %v6426_v13  ;;  %v7063_v14 = vor.u32 %v8134_v2, %v7062_v1 }
  0x66   :  { %4152 = vmatpush.bf16.msrb.mxu2 %v6679_v16  ;;  %4121 = vmatmul.bf16.vlgmr.msra.gmra.mxu3 %v9008_v33  ;;  %v6727_v16 = vor.u32 %v8050_v9, %v6726_v8  ;;  %v6523_v28 = vor.u32 %v7999_v17, %v6522_v15  ;;  %v840_v8 = vunpack.c.l.b16 %v33_v59  ;;  %v839_v9 = vunpack.c.h.b16 %v32_v55  ;;  %v6858_v15 = vld [vmem:[%s12104_s1 + $0xc90] sm:$0xf]  ;;  %v6834_v55 = vld [vmem:[%s12104_s1 + $0xc60] sm:$0xf] }
  0x67   :  { %4165 = vmatpush.bf16.msrb.mxu3 %v6775_v24  ;;  %v6714_v24 = vld [vmem:[%s12104_s1 + $0xb70] sm:$0xf] }
  0x68   :  { %4127 = vmatpush.bf16.msrb.mxu0 %v6475_v34  ;;  %v7972_v34 = vld [vmem:[%s12104_s1 + $0x920] sm:$0xf0]  ;;  %v6954_v17 = vld [vmem:[%s12104_s1 + $0xd50] sm:$0xf] }
  0x69   :  { %4140 = vmatpush.bf16.msrb.mxu1 %v6571_v35  ;;  %v6510_v35 = vld [vmem:[%s12104_s1 + $0x9d8] sm:$0xf]  ;;  %v6415_v47 = vor.u32 %v7972_v34, %v6414_v32  ;;  %v7146_v32 = vld [vmem:[%s12104_s1 + $0xed0] sm:$0xf]  ;;  %v8155_v34 = vld [vmem:[%s12104_s1 + $0xed8] sm:$0xf0] }
  0x6a   :  { %4153 = vmatpush.bf16.msrb.mxu2 %v6667_v36  ;;  %v6715_v36 = vor.u32 %v8047_v26, %v6714_v24  ;;  %v8107_v24 = vld [vmem:[%s12104_s1 + $0xd58] sm:$0xf0]  ;;  %v7050_v26 = vld [vmem:[%s12104_s1 + $0xe10] sm:$0xf] }
  0x6b   :  { %4166 = vmatpush.bf16.msrb.mxu3 %v6763_v43  ;;  %v6702_v43 = vld [vmem:[%s12104_s1 + $0xb58] sm:$0xf] }
  0x6c   :  { %4128 = vmatpush.bf16.msrb.mxu0 %v6463_v50  ;;  %v7993_v50 = vld [vmem:[%s12104_s1 + $0x9c8] sm:$0xf0] }
  0x6d   :  { %4141 = vmatpush.bf16.msrb.mxu1 %v6559_v51  ;;  %v6511_v51 = vor.u32 %v7996_v37, %v6510_v35  ;;  %v6955_v37 = vor.u32 %v8107_v24, %v6954_v17  ;;  %v6906_v17 = vld [vmem:[%s12104_s1 + $0xcf0] sm:$0xf]  ;;  %v8095_v24 = vld [vmem:[%s12104_s1 + $0xcf8] sm:$0xf0] }
  0x6e   :  { %4154 = vmatpush.bf16.msrb.mxu2 %v6655_v52  ;;  %v6607_v52 = vor.u32 %v8020_v40, %v6606_v39  ;;  %v6846_v40 = vld [vmem:[%s12104_s1 + $0xc78] sm:$0xf] }
  0x6f   :  { %4167 = vmatpush.bf16.msrb.mxu3 %v6751_v56  ;;  %v6703_v56 = vor.u32 %v8044_v45, %v6702_v43  ;;  %v8080_v43 = vld [vmem:[%s12104_s1 + $0xc80] sm:$0xf0]  ;;  %v6942_v45 = vld [vmem:[%s12104_s1 + $0xd38] sm:$0xf] }
  0x70   :  { %4129 = vmatpush.bf16.msrb.mxu0 %v6451_v62  ;;  %v6966_v62 = vld [vmem:[%s12104_s1 + $0xd68] sm:$0xf] }
  0x71   :  { %4142 = vmatpush.bf16.msrb.mxu1 %v6547_v63  ;;  %v6403_v63 = vor.u32 %v7969_v48, %v6402_v46  ;;  %v7147_v46 = vor.u32 %v8155_v34, %v7146_v32  ;;  %v7038_v48 = vld [vmem:[%s12104_s1 + $0xdf8] sm:$0xf]  ;;  %v7098_v32 = vld [vmem:[%s12104_s1 + $0xe70] sm:$0xf]  ;;  %v8143_v34 = vld [vmem:[%s12104_s1 + $0xe78] sm:$0xf0] }
  0x72   :  { %4155 = vmatpush.bf16.msrb.mxu2 %v6643_v0  ;;  %v8110_v0 = vld [vmem:[%s12104_s1 + $0xd70] sm:$0xf0] }
  0x73   :  { %4168 = vmatpush.bf16.msrb.mxu3 %v6739_v4  ;;  %v6499_v4 = vor.u32 %v7993_v50, %v6498_v49  ;;  %v6967_v13 = vor.u32 %v8110_v0, %v6966_v62  ;;  %v8128_v49 = vld [vmem:[%s12104_s1 + $0xe00] sm:$0xf0]  ;;  %v7134_v50 = vld [vmem:[%s12104_s1 + $0xeb8] sm:$0xf]  ;;  %v7122_v62 = vld [vmem:[%s12104_s1 + $0xea0] sm:$0xf] }
  0x74   :  { %4130 = vmatpush.bf16.msrb.mxu0 %v6439_v10  ;;  %v6691_v10 = vor.u32 %v8041_v58, %v6690_v57  ;;  %v7039_v54 = vor.u32 %v8128_v49, %v7038_v48  ;;  %v6930_v57 = vld [vmem:[%s12104_s1 + $0xd20] sm:$0xf]  ;;  %v6990_v48 = vld [vmem:[%s12104_s1 + $0xd98] sm:$0xf]  ;;  %v8116_v49 = vld [vmem:[%s12104_s1 + $0xda0] sm:$0xf0] }
  0x75   :  { %4143 = vmatpush.bf16.msrb.mxu1 %v6535_v11  ;;  %v6871_v11 = vor.u32 %v8086_v61, %v6870_v60  ;;  %v7026_v60 = vld [vmem:[%s12104_s1 + $0xde0] sm:$0xf]  ;;  %v8125_v61 = vld [vmem:[%s12104_s1 + $0xde8] sm:$0xf0] }
  0x76   :  { %4156 = vmatpush.bf16.msrb.mxu2 %v6631_v12  ;;  %v841_v12 = vunpack.c.h.b16 %v33_v59  ;;  %v8101_v59 = vld [vmem:[%s12104_s1 + $0xd28] sm:$0xf0]  ;;  %v7027_v2 = vor.u32 %v8125_v61, %v7026_v60  ;;  %v34_v61 = vld [vmem:[%s12105_s0 + $0x40] sm:$0xff] }
  0x77   :  { %4169 = vmatpush.bf16.msrb.mxu3 %v6727_v16  ;;  %v8083_v16 = vld [vmem:[%s12104_s1 + $0xc98] sm:$0xf0]  ;;  %v6931_v1 = vor.u32 %v8101_v59, %v6930_v57  ;;  %v6978_v59 = vld [vmem:[%s12104_s1 + $0xd80] sm:$0xf]  ;;  %v8113_v60 = vld [vmem:[%s12104_s1 + $0xd88] sm:$0xf0] }
  0x78   :  { %4131 = vmatpush.bf16.msrb.mxu0 %v6427_v27  ;;  %v8131_v27 = vld [vmem:[%s12104_s1 + $0xe18] sm:$0xf0]  ;;  %v9218_v35 = vpack.c.b16 %v841_v12, %v841_v12 }
  0x79   :  { %4144 = vmatpush.bf16.msrb.mxu1 %v6523_v28  ;;  %v9208_v28 = vpack.c.b16 %v840_v8, %v840_v8  ;;  %v7051_v39 = vor.u32 %v8131_v27, %v7050_v26  ;;  %v7014_v8 = vld [vmem:[%s12104_s1 + $0xdc8] sm:$0xf]  ;;  %v7002_v26 = vld [vmem:[%s12104_s1 + $0xdb0] sm:$0xf]  ;;  %v8119_v27 = vld [vmem:[%s12104_s1 + $0xdb8] sm:$0xf0] }
  0x7a   :  { %4157 = vmatpush.bf16.msrb.mxu2 %v6619_v31  ;;  %v9210_v31 = vpack.c.b16 %v839_v9, %v839_v9  ;;  %v8122_v9 = vld [vmem:[%s12104_s1 + $0xdd0] sm:$0xf0] }
  0x7b   :  { %4170 = vmatpush.bf16.msrb.mxu3 %v6715_v36  ;;  %v6859_v36 = vor.u32 %v8083_v16, %v6858_v15  ;;  %v6810_v15 = vld [vmem:[%s12104_s1 + $0xc30] sm:$0xf]  ;;  %v8071_v16 = vld [vmem:[%s12104_s1 + $0xc38] sm:$0xf0] }
  0x7c   :  { %4132 = vmatpush.bf16.msrb.mxu0 %v6415_v47  ;;  %v8104_v47 = vld [vmem:[%s12104_s1 + $0xd40] sm:$0xf0] }
  0x7d   :  { %4145 = vmatpush.bf16.msrb.mxu1 %v6511_v51  ;;  %v8152_v51 = vld [vmem:[%s12104_s1 + $0xec0] sm:$0xf0]  ;;  %v6943_v53 = vor.u32 %v8104_v47, %v6942_v45  ;;  %v6894_v45 = vld [vmem:[%s12104_s1 + $0xcd8] sm:$0xf] }
  0x7e   :  { %4158 = vmatpush.bf16.msrb.mxu2 %v6607_v52  ;;  %v6847_v52 = vor.u32 %v8080_v43, %v6846_v40  ;;  %v7135_v58 = vor.u32 %v8152_v51, %v7134_v50  ;;  %v6798_v40 = vld [vmem:[%s12104_s1 + $0xc18] sm:$0xf]  ;;  %v8068_v43 = vld [vmem:[%s12104_s1 + $0xc20] sm:$0xf0] }
  0x7f   :  { %4171 = vmatpush.bf16.msrb.mxu3 %v6703_v56  ;;  %v8077_v56 = vld [vmem:[%s12104_s1 + $0xc68] sm:$0xf0]  ;;  %v8092_v47 = vld [vmem:[%s12104_s1 + $0xce0] sm:$0xf0]  ;;  %v7086_v50 = vld [vmem:[%s12104_s1 + $0xe58] sm:$0xf] }
  0x80   :  { %4133 = vmatpush.bf16.msrb.mxu0 %v6403_v63  ;;  %v8149_v63 = vld [vmem:[%s12104_s1 + $0xea8] sm:$0xf0]  ;;  %v6835_v0 = vor.u32 %v8077_v56, %v6834_v55  ;;  %v8140_v51 = vld [vmem:[%s12104_s1 + $0xe60] sm:$0xf0]  ;;  %v6882_v55 = vld [vmem:[%s12104_s1 + $0xcc0] sm:$0xf]  ;;  %v6895_v57 = vor.u32 %v8092_v47, %v6894_v45 }
  0x81   :  { %4146 = vmatpush.bf16.msrb.mxu1 %v6499_v4  ;;  %v8074_v4 = vld [vmem:[%s12104_s1 + $0xc50] sm:$0xf0]  ;;  %v7123_v6 = vor.u32 %v8149_v63, %v7122_v62  ;;  %v8089_v56 = vld [vmem:[%s12104_s1 + $0xcc8] sm:$0xf0]  ;;  %v7087_v62 = vor.u32 %v8140_v51, %v7086_v50  ;;  %v7074_v63 = vld [vmem:[%s12104_s1 + $0xe40] sm:$0xf] }
  0x82   :  { %4159 = vmatpush.bf16.msrb.mxu2 %v6595_v5  ;;  %v6918_v5 = vld [vmem:[%s12104_s1 + $0xd08] sm:$0xf]  ;;  %v6823_v12 = vor.u32 %v8074_v4, %v6822_v3  ;;  %v8182_v3 = vld [vmem:[%s12104_s1 + $0xfb0] sm:$0xf0]  ;;  %v7530_v47 = vld [vmem:[%s12104_s1 + $0x11d0] sm:$0xf] }
  0x83   :  { %4172 = vmatpush.bf16.msrb.mxu3 %v6691_v10  ;;  %4134 = vmatmul.bf16.vlgmr.msrb.gmra.mxu0 %v9197_v23  ;;  %v7110_v10 = vld [vmem:[%s12104_s1 + $0xe88] sm:$0xf] }
  0x84   :  { %4178 = vmatpush.bf16.msra.mxu0 %v6871_v11  ;;  %4147 = vmatmul.bf16.vlgmr.msrb.gmra.mxu1 %v9210_v31  ;;  %v8146_v11 = vld [vmem:[%s12104_s1 + $0xe90] sm:$0xf0]  ;;  %v7350_v4 = vld [vmem:[%s12104_s1 + $0x1068] sm:$0xf] }
  0x85   :  { %4191 = vmatpush.bf16.msra.mxu1 %v6967_v13  ;;  %4160 = vmatmul.bf16.vlgmr.msrb.gmra.mxu2 %v9208_v28  ;;  %v6919_v13 = vor.u32 %v8098_v7, %v6918_v5  ;;  %v7446_v7 = vld [vmem:[%s12104_s1 + $0x1128] sm:$0xf] }
  0x86   :  { %4204 = vmatpush.bf16.msra.mxu2 %v7063_v14  ;;  %4173 = vmatmul.bf16.vlgmr.msrb.gmra.mxu3 %v9218_v35  ;;  %v7015_v14 = vor.u32 %v8122_v9, %v7014_v8  ;;  %v8230_v8 = vld [vmem:[%s12104_s1 + $0x1130] sm:$0xf0]  ;;  %v842_v9 = vunpack.c.l.b16 %v34_v61 }
  0x87   :  { %4217 = vmatpush.bf16.msra.mxu3 %v7159_v21  ;;  %v7111_v21 = vor.u32 %v8146_v11, %v7110_v10  ;;  %v6883_v10 = vor.u32 %v8089_v56, %v6882_v55  ;;  %v6979_v11 = vor.u32 %v8113_v60, %v6978_v59  ;;  %v7326_v55 = vld [vmem:[%s12104_s1 + $0x1038] sm:$0xf]  ;;  %v8224_v59 = vld [vmem:[%s12104_s1 + $0x1100] sm:$0xf0] }
  0x88   :  { %4179 = vmatpush.bf16.msra.mxu0 %v6859_v36  ;;  %v6811_v36 = vor.u32 %v8071_v16, %v6810_v15  ;;  %v843_v15 = vunpack.c.h.b16 %v34_v61  ;;  %v7518_v60 = vld [vmem:[%s12104_s1 + $0x11b8] sm:$0xf]  ;;  %v8248_v61 = vld [vmem:[%s12104_s1 + $0x11c0] sm:$0xf0] }
  0x89   :  { %4192 = vmatpush.bf16.msra.mxu1 %v6955_v37  ;;  %v6907_v37 = vor.u32 %v8095_v24, %v6906_v17 }
  0x8a   :  { %4205 = vmatpush.bf16.msra.mxu2 %v7051_v39  ;;  %v7003_v39 = vor.u32 %v8119_v27, %v7002_v26  ;;  %v7447_v26 = vor.u32 %v8230_v8, %v7446_v7  ;;  %v7242_v27 = vld [vmem:[%s12104_s1 + $0xf90] sm:$0xf]  ;;  %v8221_v7 = vld [vmem:[%s12104_s1 + $0x10e8] sm:$0xf0]  ;;  %v7506_v8 = vld [vmem:[%s12104_s1 + $0x11a0] sm:$0xf] }
  0x8b   :  { %4218 = vmatpush.bf16.msra.mxu3 %v7147_v46  ;;  %v7099_v46 = vor.u32 %v8143_v34, %v7098_v32  ;;  %v8179_v32 = vld [vmem:[%s12104_s1 + $0xf98] sm:$0xf0]  ;;  %v7338_v34 = vld [vmem:[%s12104_s1 + $0x1050] sm:$0xf] }
  0x8c   :  { %4180 = vmatpush.bf16.msra.mxu0 %v6847_v52  ;;  %v6786_v52 = vld [vmem:[%s12104_s1 + $0xc00] sm:$0xf]  ;;  %v7243_v50 = vor.u32 %v8179_v32, %v7242_v27  ;;  %v7494_v27 = vld [vmem:[%s12104_s1 + $0x1188] sm:$0xf]  ;;  %v8242_v32 = vld [vmem:[%s12104_s1 + $0x1190] sm:$0xf0] }
  0x8d   :  { %4193 = vmatpush.bf16.msra.mxu1 %v6943_v53  ;;  %v6799_v53 = vor.u32 %v8068_v43, %v6798_v40  ;;  %v7434_v40 = vld [vmem:[%s12104_s1 + $0x1110] sm:$0xf]  ;;  %v8227_v43 = vld [vmem:[%s12104_s1 + $0x1118] sm:$0xf0] }
  0x8e   :  { %4206 = vmatpush.bf16.msra.mxu2 %v7039_v54  ;;  %v8065_v54 = vld [vmem:[%s12104_s1 + $0xc08] sm:$0xf0] }
  0x8f   :  { %4219 = vmatpush.bf16.msra.mxu3 %v7135_v58  ;;  %v6991_v58 = vor.u32 %v8116_v49, %v6990_v48  ;;  %v6787_v5 = vor.u32 %v8065_v54, %v6786_v52  ;;  %v8251_v48 = vld [vmem:[%s12104_s1 + $0x11d8] sm:$0xf0]  ;;  %v7435_v52 = vor.u32 %v8227_v43, %v7434_v40  ;;  %v8176_v54 = vld [vmem:[%s12104_s1 + $0xf80] sm:$0xf0] }
  0x90   :  { %4181 = vmatpush.bf16.msra.mxu0 %v6835_v0  ;;  %v8137_v0 = vld [vmem:[%s12104_s1 + $0xe48] sm:$0xf0]  ;;  %v7531_v56 = vor.u32 %v8251_v48, %v7530_v47  ;;  %v8167_v43 = vld [vmem:[%s12104_s1 + $0xf38] sm:$0xf0]  ;;  %v7290_v47 = vld [vmem:[%s12104_s1 + $0xff0] sm:$0xf] }
  0x91   :  { %4194 = vmatpush.bf16.msra.mxu1 %v6931_v1  ;;  %v35_v1 = vld [vmem:[%s12105_s0 + $0x48] sm:$0xff]  ;;  %v7075_v16 = vor.u32 %v8137_v0, %v7074_v63 }
  0x92   :  { %4207 = vmatpush.bf16.msra.mxu2 %v7027_v2  ;;  %v7254_v2 = vld [vmem:[%s12104_s1 + $0xfa8] sm:$0xf] }
  0x93   :  { %4220 = vmatpush.bf16.msra.mxu3 %v7123_v6  ;;  %v8206_v6 = vld [vmem:[%s12104_s1 + $0x1070] sm:$0xf0]  ;;  %v7255_v17 = vor.u32 %v8182_v3, %v7254_v2  ;;  %v8173_v2 = vld [vmem:[%s12104_s1 + $0xf68] sm:$0xf0]  ;;  %v7314_v3 = vld [vmem:[%s12104_s1 + $0x1020] sm:$0xf] }
  0x94   :  { %4182 = vmatpush.bf16.msra.mxu0 %v6823_v12  ;;  %v7542_v12 = vld [vmem:[%s12104_s1 + $0x11e8] sm:$0xf]  ;;  %v7351_v24 = vor.u32 %v8206_v6, %v7350_v4  ;;  %v7519_v4 = vor.u32 %v8248_v61, %v7518_v60  ;;  %v7410_v6 = vld [vmem:[%s12104_s1 + $0x10e0] sm:$0xf]  ;;  %v7182_v60 = vld [vmem:[%s12104_s1 + $0xf18] sm:$0xf] }
  0x95   :  { %4195 = vmatpush.bf16.msra.mxu1 %v6919_v13  ;;  %v8254_v13 = vld [vmem:[%s12104_s1 + $0x11f0] sm:$0xf0]  ;;  %v8164_v61 = vld [vmem:[%s12104_s1 + $0xf20] sm:$0xf0] }
  0x96   :  { %4208 = vmatpush.bf16.msra.mxu2 %v7015_v14  ;;  %v844_v14 = vunpack.c.l.b16 %v35_v1 }
  0x97   :  { %4221 = vmatpush.bf16.msra.mxu3 %v7111_v21  ;;  %v845_v21 = vunpack.c.h.b16 %v35_v1  ;;  %v7218_v1 = vld [vmem:[%s12104_s1 + $0xf60] sm:$0xf] }
  0x98   :  { %4183 = vmatpush.bf16.msra.mxu0 %v6811_v36  ;;  %v7543_v36 = vor.u32 %v8254_v13, %v7542_v12  ;;  %v9418_v45 = vpack.c.b16 %v844_v14, %v844_v14  ;;  %v7411_v13 = vor.u32 %v8221_v7, %v7410_v6  ;;  %v8170_v14 = vld [vmem:[%s12104_s1 + $0xf50] sm:$0xf0]  ;;  %v8236_v6 = vld [vmem:[%s12104_s1 + $0x1160] sm:$0xf0]  ;;  %v7170_v7 = vld [vmem:[%s12104_s1 + $0xf00] sm:$0xf] }
  0x99   :  { %4196 = vmatpush.bf16.msra.mxu1 %v6907_v37  ;;  %v9407_v37 = vpack.c.b16 %v842_v9, %v842_v9  ;;  %v9428_v49 = vpack.c.b16 %v845_v21, %v845_v21  ;;  %v8245_v9 = vld [vmem:[%s12104_s1 + $0x11a8] sm:$0xf0]  ;;  %v7398_v21 = vld [vmem:[%s12104_s1 + $0x10c8] sm:$0xf] }
  0x9a   :  { %4209 = vmatpush.bf16.msra.mxu2 %v7003_v39  ;;  %v8203_v39 = vld [vmem:[%s12104_s1 + $0x1058] sm:$0xf0] }
  0x9b   :  { %4222 = vmatpush.bf16.msra.mxu3 %v7099_v46  ;;  %v9420_v46 = vpack.c.b16 %v843_v15, %v843_v15  ;;  %v7339_v51 = vor.u32 %v8203_v39, %v7338_v34  ;;  %v7302_v15 = vld [vmem:[%s12104_s1 + $0x1008] sm:$0xf] }
  0x9c   :  { %4184 = vmatpush.bf16.msra.mxu0 %v6799_v53  ;;  %v7230_v53 = vld [vmem:[%s12104_s1 + $0xf78] sm:$0xf] }
  0x9d   :  { %4197 = vmatpush.bf16.msra.mxu1 %v6895_v57  ;;  %v8200_v57 = vld [vmem:[%s12104_s1 + $0x1040] sm:$0xf0] }
  0x9e   :  { %4210 = vmatpush.bf16.msra.mxu2 %v6991_v58  ;;  %v7422_v58 = vld [vmem:[%s12104_s1 + $0x10f8] sm:$0xf]  ;;  %v7327_v63 = vor.u32 %v8200_v57, %v7326_v55  ;;  %v8239_v55 = vld [vmem:[%s12104_s1 + $0x1178] sm:$0xf0] }
  0x9f   :  { %4223 = vmatpush.bf16.msra.mxu3 %v7087_v62  ;;  %v7231_v62 = vor.u32 %v8176_v54, %v7230_v53  ;;  %v7423_v0 = vor.u32 %v8224_v59, %v7422_v58  ;;  %v8215_v53 = vld [vmem:[%s12104_s1 + $0x10b8] sm:$0xf0]  ;;  %v7482_v54 = vld [vmem:[%s12104_s1 + $0x1170] sm:$0xf] }
  0xa0   :  { %4185 = vmatpush.bf16.msra.mxu0 %v6787_v5  ;;  %v8197_v5 = vld [vmem:[%s12104_s1 + $0x1028] sm:$0xf0] }
  0xa1   :  { %4198 = vmatpush.bf16.msra.mxu1 %v6883_v10  ;;  %v7219_v10 = vor.u32 %v8173_v2, %v7218_v1  ;;  %v7315_v12 = vor.u32 %v8197_v5, %v7314_v3  ;;  %v7483_v1 = vor.u32 %v8239_v55, %v7482_v54  ;;  %v8188_v2 = vld [vmem:[%s12104_s1 + $0xfe0] sm:$0xf0]  ;;  %v7374_v3 = vld [vmem:[%s12104_s1 + $0x1098] sm:$0xf] }
  0xa2   :  { %4211 = vmatpush.bf16.msra.mxu2 %v6979_v11  ;;  %v7206_v11 = vld [vmem:[%s12104_s1 + $0xf48] sm:$0xf]  ;;  %v7470_v5 = vld [vmem:[%s12104_s1 + $0x1158] sm:$0xf] }
  0xa3   :  { %4224 = vmatpush.bf16.msra.mxu3 %v7075_v16  ;;  %4186 = vmatmul.bf16.vlgmr.msra.gmra.mxu0 %v9407_v37  ;;  %v8194_v16 = vld [vmem:[%s12104_s1 + $0x1010] sm:$0xf0]  ;;  %v7207_v34 = vor.u32 %v8170_v14, %v7206_v11  ;;  %v3979_v57 = vpop.f32.mrf.mxu0  ;;  %v7266_v11 = vld [vmem:[%s12104_s1 + $0xfc0] sm:$0xf] }
  0xa4   :  { %4230 = vmatpush.bf16.msrb.mxu0 %v7255_v17  ;;  %4199 = vmatmul.bf16.vlgmr.msra.gmra.mxu1 %v9420_v46  ;;  %v7507_v17 = vor.u32 %v8245_v9, %v7506_v8  ;;  %v7303_v39 = vor.u32 %v8194_v16, %v7302_v15  ;;  %v7183_v9 = vor.u32 %v8164_v61, %v7182_v60  ;;  %v7362_v15 = vld [vmem:[%s12104_s1 + $0x1080] sm:$0xf]  ;;  %v8209_v16 = vld [vmem:[%s12104_s1 + $0x1088] sm:$0xf0] }
  0xa5   :  { %4243 = vmatpush.bf16.msrb.mxu1 %v7351_v24  ;;  %4212 = vmatmul.bf16.vlgmr.msra.gmra.mxu2 %v9418_v45  ;;  %v8218_v24 = vld [vmem:[%s12104_s1 + $0x10d0] sm:$0xf0] }
  0xa6   :  { %4256 = vmatpush.bf16.msrb.mxu2 %v7447_v26  ;;  %4225 = vmatmul.bf16.vlgmr.msra.gmra.mxu3 %v9428_v49  ;;  %v806_v26 = vld [vmem:[%s12106_s2] sm:$0x7]  ;;  %v7399_v40 = vor.u32 %v8218_v24, %v7398_v21  ;;  %v7471_v24 = vor.u32 %v8236_v6, %v7470_v5  ;;  %v7722_v5 = vld [vmem:[%s12104_s1 + $0x154] sm:$0xf] }
  0xa7   :  { %4269 = vmatpush.bf16.msrb.mxu3 %v7543_v36  ;;  %v7194_v36 = vld [vmem:[%s12104_s1 + $0xf30] sm:$0xf]  ;;  %v808_v48 = vperm.slane %v806_v26, 0  ;;  %v7458_v26 = vld [vmem:[%s12104_s1 + $0x1140] sm:$0xf] }
  0xa8   :  { %4231 = vmatpush.bf16.msrb.mxu0 %v7243_v50  ;;  %v7495_v50 = vor.u32 %v8242_v32, %v7494_v27  ;;  %v4005_v21 = vpop.f32.mrf.mxu2  ;;  %v8233_v27 = vld [vmem:[%s12104_s1 + $0x1148] sm:$0xf0]  ;;  %v37_v32 = vld [vmem:[%s12105_s0 + $0x58] sm:$0xff] }
  0xa9   :  { %4244 = vmatpush.bf16.msrb.mxu1 %v7339_v51  ;;  %v8191_v51 = vld [vmem:[%s12104_s1 + $0xff8] sm:$0xf0] }
  0xaa   :  { %4257 = vmatpush.bf16.msrb.mxu2 %v7435_v52  ;;  %v7386_v52 = vld [vmem:[%s12104_s1 + $0x10b0] sm:$0xf]  ;;  %v7291_v58 = vor.u32 %v8191_v51, %v7290_v47  ;;  %v5528_v51 = vld [vmem:[%s12104_s1 + $0x234] sm:$0xf0] }
  0xab   :  { %4270 = vmatpush.bf16.msrb.mxu3 %v7531_v56  ;;  %v7195_v56 = vor.u32 %v8167_v43, %v7194_v36  ;;  %v7387_v59 = vor.u32 %v8215_v53, %v7386_v52  ;;  %v4018_v36 = vpop.f32.mrf.mxu3  ;;  %v7725_v43 = vld [vmem:[%s12104_s1 + $0x16c] sm:$0xf]  ;;  %v3981_v54 = vpop.f32.mrf.mxu0 }
  0xac   :  { %4232 = vmatpush.bf16.msrb.mxu0 %v7231_v62  ;;  %v7278_v62 = vld [vmem:[%s12104_s1 + $0xfd8] sm:$0xf]  ;;  %v7692_v54 = vld [vmem:[%s12104_s1 + $0x64] sm:$0xf] }
  0xad   :  { %4245 = vmatpush.bf16.msrb.mxu1 %v7327_v63  ;;  %v3980_v63 = vadd.f32 %v3979_v57, %v808_v48  ;;  %v5432_v48 = vld [vmem:[%s12104_s1 + $0x174] sm:$0xf0]  ;;  %v7773_v57 = vld [vmem:[%s12104_s1 + $0x2ec] sm:$0xf] }
  0xae   :  { %4258 = vmatpush.bf16.msrb.mxu2 %v7423_v0  ;;  %v3992_v0 = vpop.f32.mrf.mxu1 }
  0xaf   :  { %4271 = vmatpush.bf16.msrb.mxu3 %v7519_v4  ;;  %v8212_v4 = vld [vmem:[%s12104_s1 + $0x10a0] sm:$0xf0]  ;;  %v3993_v8 = vadd.f32 %v3992_v0, %v3980_v63  ;;  %v849_v0 = vunpack.c.h.b16 %v37_v32 }
  0xb0   :  { %4233 = vmatpush.bf16.msrb.mxu0 %v7219_v10  ;;  %v8161_v10 = vld [vmem:[%s12104_s1 + $0xf08] sm:$0xf0]  ;;  %v7375_v14 = vor.u32 %v8212_v4, %v7374_v3  ;;  %v7698_v3 = vld [vmem:[%s12104_s1 + $0x94] sm:$0xf]  ;;  %v5324_v4 = vld [vmem:[%s12104_s1 + $0x9c] sm:$0xf0] }
  0xb1   :  { %4246 = vmatpush.bf16.msrb.mxu1 %v7315_v12  ;;  %v8185_v12 = vld [vmem:[%s12104_s1 + $0xfc8] sm:$0xf0]  ;;  %v7171_v47 = vor.u32 %v8161_v10, %v7170_v7  ;;  %v5516_v10 = vld [vmem:[%s12104_s1 + $0x21c] sm:$0xf0] }
  0xb2   :  { %4259 = vmatpush.bf16.msrb.mxu2 %v7411_v13  ;;  %v7279_v13 = vor.u32 %v8188_v2, %v7278_v62  ;;  %v7267_v55 = vor.u32 %v8185_v12, %v7266_v11  ;;  %v7459_v62 = vor.u32 %v8233_v27, %v7458_v26  ;;  %v7695_v27 = vld [vmem:[%s12104_s1 + $0x7c] sm:$0xf] }
  0xb3   :  { %4272 = vmatpush.bf16.msrb.mxu3 %v7507_v17  ;;  %v36_v17 = vld [vmem:[%s12105_s0 + $0x50] sm:$0xff] }
  0xb4   :  { %4234 = vmatpush.bf16.msrb.mxu0 %v7207_v34  ;;  %v4006_v34 = vadd.f32 %v4005_v21, %v3993_v8  ;;  %v846_v52 = vunpack.c.l.b16 %v36_v17  ;;  %v847_v60 = vunpack.c.h.b16 %v36_v17  ;;  %v5420_v8 = vld [vmem:[%s12104_s1 + $0x15c] sm:$0xf0]  ;;  %v5327_v17 = vor.u32 %v7698_v3, %v5324_v4  ;;  %v4020_v21 = vpop.f32.mrf.mxu3  ;;  %v7689_v3 = vld [vmem:[%s12104_s1 + $0x4c] sm:$0xf]  ;;  %v5288_v4 = vld [vmem:[%s12104_s1 + $0x54] sm:$0xf0] }
  0xb5   :  { %4247 = vmatpush.bf16.msrb.mxu1 %v7303_v39  ;;  %v7701_v39 = vld [vmem:[%s12104_s1 + $0xac] sm:$0xf]  ;;  %v5291_v21 = vor.u32 %v7689_v3, %v5288_v4  ;;  %v7755_v3 = vld [vmem:[%s12104_s1 + $0x25c] sm:$0xf]  ;;  %v5552_v4 = vld [vmem:[%s12104_s1 + $0x264] sm:$0xf0] }
  0xb6   :  { %4260 = vmatpush.bf16.msrb.mxu2 %v7399_v40  ;;  %v5336_v40 = vld [vmem:[%s12104_s1 + $0xb4] sm:$0xf0]  ;;  %v9605_v53 = vadd.f32 %v4018_v36, %v4006_v34  ;;  %v3994_v61 = vpop.f32.mrf.mxu1  ;;  %v9622_v7 = vpack.c.b16 %v846_v52, %v846_v52  ;;  %v9635_v12 = vpack.c.b16 %v847_v60, %v847_v60  ;;  %v7719_v34 = vld [vmem:[%s12104_s1 + $0x13c] sm:$0xf]  ;;  %v5492_v60 = vld [vmem:[%s12104_s1 + $0x1ec] sm:$0xf0] }
  0xb7   :  { %4273 = vmatpush.bf16.msrb.mxu3 %v7495_v50  ;;  %v7749_v50 = vld [vmem:[%s12104_s1 + $0x22c] sm:$0xf]  ;;  %v5339_v63 = vor.u32 %v7701_v39, %v5336_v40  ;;  %v5408_v39 = vld [vmem:[%s12104_s1 + $0x144] sm:$0xf0]  ;;  %v7743_v40 = vld [vmem:[%s12104_s1 + $0x1fc] sm:$0xf] }
  0xb8   :  { %4235 = vmatpush.bf16.msrb.mxu0 %v7195_v56  ;;  %v7363_v56 = vor.u32 %v8209_v16, %v7362_v15  ;;  %v5531_v2 = vor.u32 %v7749_v50, %v5528_v51  ;;  %v4007_v15 = vpop.f32.mrf.mxu2  ;;  %v9643_v16 = vpack.c.b16 %v849_v0, %v849_v0  ;;  %v5411_v51 = vor.u32 %v7719_v34, %v5408_v39  ;;  %v7764_v61 = vld [vmem:[%s12104_s1 + $0x2a4] sm:$0xf]  ;;  %v7710_v34 = vld [vmem:[%s12104_s1 + $0xf4] sm:$0xf] }
  0xb9   :  { %4248 = vmatpush.bf16.msrb.mxu1 %v7291_v58  ;;  %v5624_v58 = vld [vmem:[%s12104_s1 + $0x2f4] sm:$0xf0]  ;;  %v7761_v15 = vld [vmem:[%s12104_s1 + $0x28c] sm:$0xf] }
  0xba   :  { %4261 = vmatpush.bf16.msrb.mxu2 %v7387_v59  ;;  %v848_v59 = vunpack.c.l.b16 %v37_v32  ;;  %v5627_v6 = vor.u32 %v7773_v57, %v5624_v58  ;;  %v5312_v32 = vld [vmem:[%s12104_s1 + $0x84] sm:$0xf0]  ;;  %v5396_v58 = vld [vmem:[%s12104_s1 + $0x12c] sm:$0xf0] }
  0xbb   :  { %4274 = vmatpush.bf16.msrb.mxu3 %v7483_v1  ;;  %v5435_v1 = vor.u32 %v7725_v43, %v5432_v48  ;;  %v5504_v43 = vld [vmem:[%s12104_s1 + $0x204] sm:$0xf0]  ;;  %v5315_v50 = vor.u32 %v7695_v27, %v5312_v32  ;;  %v7686_v27 = vld [vmem:[%s12104_s1 + $0x34] sm:$0xf]  ;;  %v5276_v32 = vld [vmem:[%s12104_s1 + $0x3c] sm:$0xf0] }
  0xbc   :  { %4236 = vmatpush.bf16.msrb.mxu0 %v7183_v9  ;;  %v7746_v9 = vld [vmem:[%s12104_s1 + $0x214] sm:$0xf]  ;;  %v9633_v11 = vpack.c.b16 %v848_v59, %v848_v59  ;;  %v5600_v48 = vld [vmem:[%s12104_s1 + $0x2c4] sm:$0xf0]  ;;  %v5507_v52 = vor.u32 %v7743_v40, %v5504_v43  ;;  %v7740_v59 = vld [vmem:[%s12104_s1 + $0x1e4] sm:$0xf] }
  0xbd   :  { %4249 = vmatpush.bf16.msrb.mxu1 %v7279_v13  ;;  %v7770_v13 = vld [vmem:[%s12104_s1 + $0x2d4] sm:$0xf]  ;;  %v5519_v26 = vor.u32 %v7746_v9, %v5516_v10  ;;  %v5384_v10 = vld [vmem:[%s12104_s1 + $0x114] sm:$0xf0]  ;;  %v5372_v40 = vld [vmem:[%s12104_s1 + $0xfc] sm:$0xf0] }
  0xbe   :  { %4262 = vmatpush.bf16.msrb.mxu2 %v7375_v14  ;;  %v5612_v14 = vld [vmem:[%s12104_s1 + $0x2dc] sm:$0xf0]  ;;  %v7734_v43 = vld [vmem:[%s12104_s1 + $0x1b4] sm:$0xf] }
  0xbf   :  { %4275 = vmatpush.bf16.msrb.mxu3 %v7471_v24  ;;  %v5423_v24 = vor.u32 %v7722_v5, %v5420_v8  ;;  %v5615_v36 = vor.u32 %v7770_v13, %v5612_v14  ;;  %v7713_v5 = vld [vmem:[%s12104_s1 + $0x10c] sm:$0xf]  ;;  %v5480_v14 = vld [vmem:[%s12104_s1 + $0x1d4] sm:$0xf0] }
  0xc0   :  { %4237 = vmatpush.bf16.msrb.mxu0 %v7171_v47  ;;  %v7767_v47 = vld [vmem:[%s12104_s1 + $0x2bc] sm:$0xf]  ;;  %v4031_v0 = vpop.f32.mrf.mxu0  ;;  %v7737_v13 = vld [vmem:[%s12104_s1 + $0x1cc] sm:$0xf] }
  0xc1   :  { %4250 = vmatpush.bf16.msrb.mxu1 %v7267_v55  ;;  %v5300_v55 = vld [vmem:[%s12104_s1 + $0x6c] sm:$0xf0]  ;;  %v5603_v57 = vor.u32 %v7767_v47, %v5600_v48  ;;  %v4044_v8 = vpop.f32.mrf.mxu1  ;;  %v5468_v47 = vld [vmem:[%s12104_s1 + $0x1bc] sm:$0xf0] }
  0xc2   :  { %4263 = vmatpush.bf16.msrb.mxu2 %v7363_v56  ;;  %v7716_v56 = vld [vmem:[%s12104_s1 + $0x124] sm:$0xf] }
  0xc3   :  { %4276 = vmatpush.bf16.msrb.mxu3 %v7459_v62  ;;  %4238 = vmatmul.bf16.vlgmr.msrb.gmra.mxu0 %v9622_v7  ;;  %v5588_v62 = vld [vmem:[%s12104_s1 + $0x2ac] sm:$0xf0] }
  0xc4   :  { %4282 = vmatpush.bf16.msra.mxu0 %v5339_v63  ;;  %4251 = vmatmul.bf16.vlgmr.msrb.gmra.mxu1 %v9635_v12  ;;  %v5303_v63 = vor.u32 %v7692_v54, %v5300_v55  ;;  %v5591_v9 = vor.u32 %v7764_v61, %v5588_v62  ;;  %v5279_v54 = vor.u32 %v7686_v27, %v5276_v32  ;;  %v7707_v61 = vld [vmem:[%s12104_s1 + $0xdc] sm:$0xf]  ;;  %v7797_v32 = vld [vmem:[%s12104_s1 + $0x3ac] sm:$0xf] }
  0xc5   :  { %4295 = vmatpush.bf16.msra.mxu1 %v5435_v1  ;;  %4264 = vmatmul.bf16.vlgmr.msrb.gmra.mxu2 %v9633_v11  ;;  %v5399_v1 = vor.u32 %v7716_v56, %v5396_v58  ;;  %v5471_v58 = vor.u32 %v7734_v43, %v5468_v47  ;;  %v7845_v43 = vld [vmem:[%s12104_s1 + $0x52c] sm:$0xf]  ;;  %v5912_v47 = vld [vmem:[%s12104_s1 + $0x534] sm:$0xf0] }
  0xc6   :  { %4308 = vmatpush.bf16.msra.mxu2 %v5531_v2  ;;  %4277 = vmatmul.bf16.vlgmr.msrb.gmra.mxu3 %v9643_v16  ;;  %v5495_v2 = vor.u32 %v7740_v59, %v5492_v60  ;;  %v7683_v59 = vld [vmem:[%s12104_s1 + $0x1c] sm:$0xf]  ;;  %v5264_v60 = vld [vmem:[%s12104_s1 + $0x24] sm:$0xf0] }
  0xc7   :  { %4321 = vmatpush.bf16.msra.mxu3 %v5627_v6  ;;  %v4032_v6 = vadd.f32 %v4031_v0, %v9605_v53  ;;  %v5576_v53 = vld [vmem:[%s12104_s1 + $0x294] sm:$0xf0]  ;;  %v5360_v0 = vld [vmem:[%s12104_s1 + $0xe4] sm:$0xf0] }
  0xc8   :  { %4283 = vmatpush.bf16.msra.mxu0 %v5327_v17  ;;  %v5579_v39 = vor.u32 %v7761_v15, %v5576_v53  ;;  %v4033_v56 = vpop.f32.mrf.mxu0  ;;  %v7728_v15 = vld [vmem:[%s12104_s1 + $0x184] sm:$0xf] }
  0xc9   :  { %4296 = vmatpush.bf16.msra.mxu1 %v5423_v24  ;;  %v4045_v17 = vadd.f32 %v4044_v8, %v4032_v6  ;;  %v5387_v24 = vor.u32 %v7713_v5, %v5384_v10  ;;  %v4046_v62 = vpop.f32.mrf.mxu1  ;;  %v5267_v5 = vor.u32 %v7683_v59, %v5264_v60  ;;  %v7680_v6 = vld [vmem:[%s12104_s1 + $0x4] sm:$0xf]  ;;  %v5252_v8 = vld [vmem:[%s12104_s1 + $0xc] sm:$0xf0]  ;;  %v7794_v59 = vld [vmem:[%s12104_s1 + $0x394] sm:$0xf] }
  0xca   :  { %4309 = vmatpush.bf16.msra.mxu2 %v5519_v26  ;;  %v5483_v26 = vor.u32 %v7737_v13, %v5480_v14  ;;  %v7704_v13 = vld [vmem:[%s12104_s1 + $0xc4] sm:$0xf]  ;;  %v5348_v14 = vld [vmem:[%s12104_s1 + $0xcc] sm:$0xf0]  ;;  %v5708_v60 = vld [vmem:[%s12104_s1 + $0x39c] sm:$0xf0] }
  0xcb   :  { %4322 = vmatpush.bf16.msra.mxu3 %v5615_v36  ;;  %v4057_v36 = vpop.f32.mrf.mxu2 }
  0xcc   :  { %4284 = vmatpush.bf16.msra.mxu0 %v5315_v50  ;;  %v4058_v48 = vadd.f32 %v4057_v36, %v4045_v17  ;;  %v4070_v50 = vpop.f32.mrf.mxu3  ;;  %v5555_v17 = vor.u32 %v7755_v3, %v5552_v4  ;;  %v7821_v36 = vld [vmem:[%s12104_s1 + $0x46c] sm:$0xf]  ;;  %v5996_v3 = vld [vmem:[%s12104_s1 + $0x5dc] sm:$0xf0]  ;;  %v5711_v4 = vor.u32 %v7794_v59, %v5708_v60  ;;  %v5672_v60 = vld [vmem:[%s12104_s1 + $0x354] sm:$0xf0] }
  0xcd   :  { %4297 = vmatpush.bf16.msra.mxu1 %v5411_v51  ;;  %v7758_v51 = vld [vmem:[%s12104_s1 + $0x274] sm:$0xf]  ;;  %v7785_v59 = vld [vmem:[%s12104_s1 + $0x34c] sm:$0xf] }
  0xce   :  { %4310 = vmatpush.bf16.msra.mxu2 %v5507_v52  ;;  %v5564_v52 = vld [vmem:[%s12104_s1 + $0x27c] sm:$0xf0]  ;;  %v9746_v55 = vadd.f32 %v4070_v50, %v4058_v48  ;;  %v5351_v48 = vor.u32 %v7704_v13, %v5348_v14  ;;  %v5792_v14 = vld [vmem:[%s12104_s1 + $0x444] sm:$0xf0] }
  0xcf   :  { %4323 = vmatpush.bf16.msra.mxu3 %v5603_v57  ;;  %v5375_v57 = vor.u32 %v7710_v34, %v5372_v40  ;;  %v5720_v34 = vld [vmem:[%s12104_s1 + $0x3b4] sm:$0xf0] }
  0xd0   :  { %4285 = vmatpush.bf16.msra.mxu0 %v5303_v63  ;;  %v5567_v63 = vor.u32 %v7758_v51, %v5564_v52  ;;  %v5816_v40 = vld [vmem:[%s12104_s1 + $0x474] sm:$0xf0]  ;;  %v7869_v51 = vld [vmem:[%s12104_s1 + $0x5ec] sm:$0xf]  ;;  %v5723_v56 = vor.u32 %v7797_v32, %v5720_v34  ;;  %v7788_v32 = vld [vmem:[%s12104_s1 + $0x364] sm:$0xf] }
  0xd1   :  { %4298 = vmatpush.bf16.msra.mxu1 %v5399_v1  ;;  %v7731_v1 = vld [vmem:[%s12104_s1 + $0x19c] sm:$0xf]  ;;  %v6008_v52 = vld [vmem:[%s12104_s1 + $0x5f4] sm:$0xf0]  ;;  %v5684_v34 = vld [vmem:[%s12104_s1 + $0x36c] sm:$0xf0] }
  0xd2   :  { %4311 = vmatpush.bf16.msra.mxu2 %v5495_v2  ;;  %v5456_v2 = vld [vmem:[%s12104_s1 + $0x1a4] sm:$0xf0]  ;;  %v6011_v62 = vor.u32 %v7869_v51, %v6008_v52  ;;  %v5972_v51 = vld [vmem:[%s12104_s1 + $0x5ac] sm:$0xf0] }
  0xd3   :  { %4324 = vmatpush.bf16.msra.mxu3 %v5591_v9  ;;  %v5363_v9 = vor.u32 %v7707_v61, %v5360_v0  ;;  %v5459_v10 = vor.u32 %v7731_v1, %v5456_v2  ;;  %v4059_v53 = vpop.f32.mrf.mxu2  ;;  %v7818_v61 = vld [vmem:[%s12104_s1 + $0x454] sm:$0xf]  ;;  %v5900_v1 = vld [vmem:[%s12104_s1 + $0x51c] sm:$0xf0] }
  0xd4   :  { %4286 = vmatpush.bf16.msra.mxu0 %v5291_v21  ;;  %v5444_v21 = vld [vmem:[%s12104_s1 + $0x18c] sm:$0xf0]  ;;  %v4072_v27 = vpop.f32.mrf.mxu3  ;;  %v7842_v0 = vld [vmem:[%s12104_s1 + $0x514] sm:$0xf]  ;;  %v5888_v53 = vld [vmem:[%s12104_s1 + $0x504] sm:$0xf0] }
  0xd5   :  { %4299 = vmatpush.bf16.msra.mxu1 %v5387_v24  ;;  %v7752_v24 = vld [vmem:[%s12104_s1 + $0x244] sm:$0xf]  ;;  %v5447_v50 = vor.u32 %v7728_v15, %v5444_v21  ;;  %v7866_v2 = vld [vmem:[%s12104_s1 + $0x5d4] sm:$0xf]  ;;  %v7839_v15 = vld [vmem:[%s12104_s1 + $0x4fc] sm:$0xf] }
  0xd6   :  { %4312 = vmatpush.bf16.msra.mxu2 %v5483_v26  ;;  %v5540_v26 = vld [vmem:[%s12104_s1 + $0x24c] sm:$0xf0]  ;;  %v5999_v13 = vor.u32 %v7866_v2, %v5996_v3  ;;  %v5984_v21 = vld [vmem:[%s12104_s1 + $0x5c4] sm:$0xf0]  ;;  %v5891_v27 = vor.u32 %v7839_v15, %v5888_v53  ;;  %v7857_v2 = vld [vmem:[%s12104_s1 + $0x58c] sm:$0xf] }
  0xd7   :  { %4325 = vmatpush.bf16.msra.mxu3 %v5579_v39  ;;  %v5255_v39 = vor.u32 %v7680_v6, %v5252_v8  ;;  %v5903_v6 = vor.u32 %v7842_v0, %v5900_v1  ;;  %v7791_v8 = vld [vmem:[%s12104_s1 + $0x37c] sm:$0xf]  ;;  %v7833_v0 = vld [vmem:[%s12104_s1 + $0x4cc] sm:$0xf]  ;;  %v5864_v1 = vld [vmem:[%s12104_s1 + $0x4d4] sm:$0xf0] }
  0xd8   :  { %4287 = vmatpush.bf16.msra.mxu0 %v5279_v54  ;;  %v5543_v54 = vor.u32 %v7752_v24, %v5540_v26  ;;  %v5960_v3 = vld [vmem:[%s12104_s1 + $0x594] sm:$0xf0]  ;;  %v5756_v15 = vld [vmem:[%s12104_s1 + $0x3fc] sm:$0xf0]  ;;  %v7830_v53 = vld [vmem:[%s12104_s1 + $0x4b4] sm:$0xf] }
  0xd9   :  { %4300 = vmatpush.bf16.msra.mxu1 %v5375_v57  ;;  %v5819_v57 = vor.u32 %v7821_v36, %v5816_v40  ;;  %v7812_v36 = vld [vmem:[%s12104_s1 + $0x424] sm:$0xf]  ;;  %v5780_v40 = vld [vmem:[%s12104_s1 + $0x42c] sm:$0xf0] }
  0xda   :  { %4313 = vmatpush.bf16.msra.mxu2 %v5471_v58  ;;  %v5915_v58 = vor.u32 %v7845_v43, %v5912_v47  ;;  %v7836_v43 = vld [vmem:[%s12104_s1 + $0x4e4] sm:$0xf]  ;;  %v5876_v47 = vld [vmem:[%s12104_s1 + $0x4ec] sm:$0xf0] }
  0xdb   :  { %4326 = vmatpush.bf16.msra.mxu3 %v5567_v63  ;;  %v5804_v63 = vld [vmem:[%s12104_s1 + $0x45c] sm:$0xf0] }
  0xdc   :  { %4288 = vmatpush.bf16.msra.mxu0 %v5267_v5  ;;  %v5807_v5 = vor.u32 %v7818_v61, %v5804_v63  ;;  %v7809_v61 = vld [vmem:[%s12104_s1 + $0x40c] sm:$0xf]  ;;  %v5768_v63 = vld [vmem:[%s12104_s1 + $0x414] sm:$0xf0] }
  0xdd   :  { %4301 = vmatpush.bf16.msra.mxu1 %v5363_v9  ;;  %v5696_v9 = vld [vmem:[%s12104_s1 + $0x384] sm:$0xf0] }
  0xde   :  { %4314 = vmatpush.bf16.msra.mxu2 %v5459_v10  ;;  %v7815_v10 = vld [vmem:[%s12104_s1 + $0x43c] sm:$0xf]  ;;  %v5699_v24 = vor.u32 %v7791_v8, %v5696_v9  ;;  %v7782_v8 = vld [vmem:[%s12104_s1 + $0x334] sm:$0xf]  ;;  %v5660_v9 = vld [vmem:[%s12104_s1 + $0x33c] sm:$0xf0] }
  0xdf   :  { %4327 = vmatpush.bf16.msra.mxu3 %v5555_v17  ;;  %v7863_v17 = vld [vmem:[%s12104_s1 + $0x5bc] sm:$0xf]  ;;  %v5795_v26 = vor.u32 %v7815_v10, %v5792_v14  ;;  %v7806_v10 = vld [vmem:[%s12104_s1 + $0x3f4] sm:$0xf] }
  0xe0   :  { %4289 = vmatpush.bf16.msra.mxu0 %v5255_v39  ;;  %v5987_v39 = vor.u32 %v7863_v17, %v5984_v21  ;;  %v5852_v17 = vld [vmem:[%s12104_s1 + $0x4bc] sm:$0xf0] }
  0xe1   :  { %4302 = vmatpush.bf16.msra.mxu1 %v5351_v48  ;;  %v4083_v48 = vpop.f32.mrf.mxu0 }
  0xe2   :  { %4315 = vmatpush.bf16.msra.mxu2 %v5447_v50  ;;  %v7860_v50 = vld [vmem:[%s12104_s1 + $0x5a4] sm:$0xf]  ;;  %v4084_v52 = vadd.f32 %v4083_v48, %v9746_v55  ;;  %v5648_v48 = vld [vmem:[%s12104_s1 + $0x324] sm:$0xf0] }
  0xe3   :  { %4328 = vmatpush.bf16.msra.mxu3 %v5543_v54  ;;  %4290 = vmatmul.bf16.vlgmr.msra.gmra.mxu0 %v8632_v19  ;;  %v5687_v54 = vor.u32 %v7788_v32, %v5684_v34  ;;  %v5975_v55 = vor.u32 %v7860_v50, %v5972_v51  ;;  %v5663_v34 = vor.u32 %v7782_v8, %v5660_v9  ;;  %v7803_v50 = vld [vmem:[%s12104_s1 + $0x3dc] sm:$0xf]  ;;  %v7893_v8 = vld [vmem:[%s12104_s1 + $0x6ac] sm:$0xf]  ;;  %v6104_v9 = vld [vmem:[%s12104_s1 + $0x6b4] sm:$0xf0] }
  0xe4   :  { %4334 = vmatpush.bf16.msrb.mxu0 %v5723_v56  ;;  %4303 = vmatmul.bf16.vlgmr.msra.gmra.mxu1 %v8636_v22  ;;  %v4096_v56 = vpop.f32.mrf.mxu1 }
  0xe5   :  { %4347 = vmatpush.bf16.msrb.mxu1 %v5819_v57  ;;  %4316 = vmatmul.bf16.vlgmr.msra.gmra.mxu2 %v8630_v18  ;;  %v5783_v57 = vor.u32 %v7812_v36, %v5780_v40  ;;  %v5759_v40 = vor.u32 %v7806_v10, %v5756_v15  ;;  %v7917_v10 = vld [vmem:[%s12104_s1 + $0x76c] sm:$0xf]  ;;  %v6200_v15 = vld [vmem:[%s12104_s1 + $0x774] sm:$0xf0] }
  0xe6   :  { %4360 = vmatpush.bf16.msrb.mxu2 %v5915_v58  ;;  %4329 = vmatmul.bf16.vlgmr.msra.gmra.mxu3 %v8634_v20  ;;  %v5879_v58 = vor.u32 %v7836_v43, %v5876_v47  ;;  %v5855_v43 = vor.u32 %v7830_v53, %v5852_v17  ;;  %v7779_v47 = vld [vmem:[%s12104_s1 + $0x31c] sm:$0xf]  ;;  %v7941_v53 = vld [vmem:[%s12104_s1 + $0x82c] sm:$0xf]  ;;  %v6296_v17 = vld [vmem:[%s12104_s1 + $0x834] sm:$0xf0] }
  0xe7   :  { %4373 = vmatpush.bf16.msrb.mxu3 %v6011_v62  ;;  %v4097_v62 = vadd.f32 %v4096_v56, %v4084_v52  ;;  %v5744_v52 = vld [vmem:[%s12104_s1 + $0x3e4] sm:$0xf0] }
  0xe8   :  { %4335 = vmatpush.bf16.msrb.mxu0 %v5711_v4  ;;  %v5675_v4 = vor.u32 %v7785_v59, %v5672_v60  ;;  %v4109_v14 = vpop.f32.mrf.mxu2  ;;  %v5840_v56 = vld [vmem:[%s12104_s1 + $0x4a4] sm:$0xf0]  ;;  %v5651_v59 = vor.u32 %v7779_v47, %v5648_v48  ;;  %v7776_v60 = vld [vmem:[%s12104_s1 + $0x304] sm:$0xf]  ;;  %v6092_v47 = vld [vmem:[%s12104_s1 + $0x69c] sm:$0xf0] }
  0xe9   :  { %4348 = vmatpush.bf16.msrb.mxu1 %v5807_v5  ;;  %v5771_v5 = vor.u32 %v7809_v61, %v5768_v63  ;;  %v4110_v21 = vadd.f32 %v4109_v14, %v4097_v62  ;;  %v4085_v32 = vpop.f32.mrf.mxu0  ;;  %v5636_v61 = vld [vmem:[%s12104_s1 + $0x30c] sm:$0xf0]  ;;  %v7800_v63 = vld [vmem:[%s12104_s1 + $0x3c4] sm:$0xf]  ;;  %v7914_v48 = vld [vmem:[%s12104_s1 + $0x754] sm:$0xf] }
  0xea   :  { %4361 = vmatpush.bf16.msrb.mxu2 %v5903_v6  ;;  %v5867_v6 = vor.u32 %v7833_v0, %v5864_v1  ;;  %v5732_v0 = vld [vmem:[%s12104_s1 + $0x3cc] sm:$0xf0]  ;;  %v7824_v1 = vld [vmem:[%s12104_s1 + $0x484] sm:$0xf]  ;;  %v5639_v14 = vor.u32 %v7776_v60, %v5636_v61  ;;  %v7887_v61 = vld [vmem:[%s12104_s1 + $0x67c] sm:$0xf] }
  0xeb   :  { %4374 = vmatpush.bf16.msrb.mxu3 %v5999_v13  ;;  %v5963_v13 = vor.u32 %v7857_v2, %v5960_v3  ;;  %v5828_v3 = vld [vmem:[%s12104_s1 + $0x48c] sm:$0xf0] }
  0xec   :  { %4336 = vmatpush.bf16.msrb.mxu0 %v5699_v24  ;;  %v4122_v24 = vpop.f32.mrf.mxu3  ;;  %v4098_v36 = vpop.f32.mrf.mxu1 }
  0xed   :  { %4349 = vmatpush.bf16.msrb.mxu1 %v5795_v26  ;;  %v7854_v26 = vld [vmem:[%s12104_s1 + $0x574] sm:$0xf]  ;;  %v6203_v36 = vor.u32 %v7917_v10, %v6200_v15  ;;  %v6068_v10 = vld [vmem:[%s12104_s1 + $0x66c] sm:$0xf0] }
  0xee   :  { %4362 = vmatpush.bf16.msrb.mxu2 %v5891_v27  ;;  %v5948_v27 = vld [vmem:[%s12104_s1 + $0x57c] sm:$0xf0]  ;;  %v6164_v15 = vld [vmem:[%s12104_s1 + $0x72c] sm:$0xf0] }
  0xef   :  { %4375 = vmatpush.bf16.msrb.mxu3 %v5987_v39  ;;  %v9945_v39 = vadd.f32 %v4122_v24, %v4110_v21  ;;  %v5951_v51 = vor.u32 %v7854_v26, %v5948_v27  ;;  %v5735_v21 = vor.u32 %v7800_v63, %v5732_v0  ;;  %v5831_v24 = vor.u32 %v7824_v1, %v5828_v3  ;;  %v7965_v26 = vld [vmem:[%s12104_s1 + $0x8ec] sm:$0xf]  ;;  %v6392_v27 = vld [vmem:[%s12104_s1 + $0x8f4] sm:$0xf0]  ;;  %v6176_v0 = vld [vmem:[%s12104_s1 + $0x744] sm:$0xf0] }
  0xf0   :  { %4337 = vmatpush.bf16.msrb.mxu0 %v5687_v54  ;;  %v7827_v54 = vld [vmem:[%s12104_s1 + $0x49c] sm:$0xf] }
  0xf1   :  { %4350 = vmatpush.bf16.msrb.mxu1 %v5783_v57  ;;  %v7851_v57 = vld [vmem:[%s12104_s1 + $0x55c] sm:$0xf]  ;;  %v5843_v62 = vor.u32 %v7827_v54, %v5840_v56  ;;  %v6284_v54 = vld [vmem:[%s12104_s1 + $0x81c] sm:$0xf0]  ;;  %v7962_v56 = vld [vmem:[%s12104_s1 + $0x8d4] sm:$0xf] }
  0xf2   :  { %4363 = vmatpush.bf16.msrb.mxu2 %v5879_v58  ;;  %v5936_v58 = vld [vmem:[%s12104_s1 + $0x564] sm:$0xf0]  ;;  %v7935_v1 = vld [vmem:[%s12104_s1 + $0x7fc] sm:$0xf] }
  0xf3   :  { %4376 = vmatpush.bf16.msrb.mxu3 %v5975_v55  ;;  %v5747_v55 = vor.u32 %v7803_v50, %v5744_v52  ;;  %v5939_v2 = vor.u32 %v7851_v57, %v5936_v58  ;;  %v6395_v50 = vor.u32 %v7965_v26, %v6392_v27  ;;  %v7938_v52 = vld [vmem:[%s12104_s1 + $0x814] sm:$0xf]  ;;  %v6380_v57 = vld [vmem:[%s12104_s1 + $0x8dc] sm:$0xf0]  ;;  %v7959_v3 = vld [vmem:[%s12104_s1 + $0x8bc] sm:$0xf] }
  0xf4   :  { %4338 = vmatpush.bf16.msrb.mxu0 %v5675_v4  ;;  %v7848_v4 = vld [vmem:[%s12104_s1 + $0x544] sm:$0xf]  ;;  %v6287_v60 = vor.u32 %v7938_v52, %v6284_v54  ;;  %v6383_v63 = vor.u32 %v7962_v56, %v6380_v57  ;;  %v6356_v26 = vld [vmem:[%s12104_s1 + $0x8ac] sm:$0xf0]  ;;  %v7929_v52 = vld [vmem:[%s12104_s1 + $0x7cc] sm:$0xf] }
  0xf5   :  { %4351 = vmatpush.bf16.msrb.mxu1 %v5771_v5  ;;  %v5924_v5 = vld [vmem:[%s12104_s1 + $0x54c] sm:$0xf0]  ;;  %v6248_v54 = vld [vmem:[%s12104_s1 + $0x7d4] sm:$0xf0]  ;;  %v7953_v56 = vld [vmem:[%s12104_s1 + $0x88c] sm:$0xf] }
  0xf6   :  { %4364 = vmatpush.bf16.msrb.mxu2 %v5867_v6  ;;  %v4111_v6 = vpop.f32.mrf.mxu2  ;;  %v5927_v32 = vor.u32 %v7848_v4, %v5924_v5  ;;  %v6368_v4 = vld [vmem:[%s12104_s1 + $0x8c4] sm:$0xf0]  ;;  %v6344_v57 = vld [vmem:[%s12104_s1 + $0x894] sm:$0xf0] }
  0xf7   :  { %4377 = vmatpush.bf16.msrb.mxu3 %v5963_v13  ;;  %v4124_v13 = vpop.f32.mrf.mxu3 }
  0xf8   :  { %4339 = vmatpush.bf16.msrb.mxu0 %v5663_v34  ;;  %v6107_v34 = vor.u32 %v7893_v8, %v6104_v9  ;;  %v7884_v9 = vld [vmem:[%s12104_s1 + $0x664] sm:$0xf] }
  0xf9   :  { %4352 = vmatpush.bf16.msrb.mxu1 %v5759_v40  ;;  %v6299_v40 = vor.u32 %v7941_v53, %v6296_v17  ;;  %v7908_v13 = vld [vmem:[%s12104_s1 + $0x724] sm:$0xf]  ;;  %v6260_v17 = vld [vmem:[%s12104_s1 + $0x7ec] sm:$0xf0] }
  0xfa   :  { %4365 = vmatpush.bf16.msrb.mxu2 %v5855_v43  ;;  %v7890_v43 = vld [vmem:[%s12104_s1 + $0x694] sm:$0xf]  ;;  %v7932_v53 = vld [vmem:[%s12104_s1 + $0x7e4] sm:$0xf] }
  0xfb   :  { %4378 = vmatpush.bf16.msrb.mxu3 %v5951_v51  ;;  %v6188_v51 = vld [vmem:[%s12104_s1 + $0x75c] sm:$0xf0]  ;;  %v6095_v58 = vor.u32 %v7890_v43, %v6092_v47  ;;  %v7881_v43 = vld [vmem:[%s12104_s1 + $0x64c] sm:$0xf]  ;;  %v6056_v47 = vld [vmem:[%s12104_s1 + $0x654] sm:$0xf0] }
  0xfc   :  { %4340 = vmatpush.bf16.msrb.mxu0 %v5651_v59  ;;  %v6191_v59 = vor.u32 %v7914_v48, %v6188_v51  ;;  %v7905_v48 = vld [vmem:[%s12104_s1 + $0x70c] sm:$0xf]  ;;  %v6152_v51 = vld [vmem:[%s12104_s1 + $0x714] sm:$0xf0] }
  0xfd   :  { %4353 = vmatpush.bf16.msrb.mxu1 %v5747_v55  ;;  %v6080_v55 = vld [vmem:[%s12104_s1 + $0x684] sm:$0xf0] }
  0xfe   :  { %4366 = vmatpush.bf16.msrb.mxu2 %v5843_v62  ;;  %v7911_v62 = vld [vmem:[%s12104_s1 + $0x73c] sm:$0xf]  ;;  %v6083_v5 = vor.u32 %v7887_v61, %v6080_v55  ;;  %v7878_v61 = vld [vmem:[%s12104_s1 + $0x634] sm:$0xf]  ;;  %v6044_v55 = vld [vmem:[%s12104_s1 + $0x63c] sm:$0xf0] }
  0xff   :  { %4379 = vmatpush.bf16.msrb.mxu3 %v5939_v2  ;;  %v6272_v2 = vld [vmem:[%s12104_s1 + $0x804] sm:$0xf0]  ;;  %v6179_v6 = vor.u32 %v7911_v62, %v6176_v0  ;;  %v7902_v62 = vld [vmem:[%s12104_s1 + $0x6f4] sm:$0xf] }
 0x100   :  { %4341 = vmatpush.bf16.msrb.mxu0 %v5639_v14  ;;  %v6275_v8 = vor.u32 %v7935_v1, %v6272_v2  ;;  %v6371_v14 = vor.u32 %v7959_v3, %v6368_v4  ;;  %v6140_v1 = vld [vmem:[%s12104_s1 + $0x6fc] sm:$0xf0]  ;;  %v7926_v2 = vld [vmem:[%s12104_s1 + $0x7b4] sm:$0xf] }
 0x101   :  { %4354 = vmatpush.bf16.msrb.mxu1 %v5735_v21  ;;  %v4135_v21 = vpop.f32.mrf.mxu0  ;;  %v6236_v3 = vld [vmem:[%s12104_s1 + $0x7bc] sm:$0xf0] }
 0x102   :  { %4367 = vmatpush.bf16.msrb.mxu2 %v5831_v24  ;;  %v7956_v24 = vld [vmem:[%s12104_s1 + $0x8a4] sm:$0xf]  ;;  %v4136_v27 = vadd.f32 %v4135_v21, %v9945_v39  ;;  %v6032_v21 = vld [vmem:[%s12104_s1 + $0x624] sm:$0xf0] }
 0x103   :  { %4380 = vmatpush.bf16.msrb.mxu3 %v5927_v32  ;;  %4342 = vmatmul.bf16.vlgmr.msrb.gmra.mxu0 %v8794_v41  ;;  %v6071_v32 = vor.u32 %v7884_v9, %v6068_v10  ;;  %v6359_v39 = vor.u32 %v7956_v24, %v6356_v26  ;;  %v6047_v10 = vor.u32 %v7878_v61, %v6044_v55  ;;  %v7899_v24 = vld [vmem:[%s12104_s1 + $0x6dc] sm:$0xf]  ;;  %v7989_v61 = vld [vmem:[%s12104_s1 + $0x9ac] sm:$0xf]  ;;  %v6488_v55 = vld [vmem:[%s12104_s1 + $0x9b4] sm:$0xf0] }
 0x104   :  { %4386 = vmatpush.bf16.msra.mxu0 %v6107_v34  ;;  %4355 = vmatmul.bf16.vlgmr.msrb.gmra.mxu1 %v8798_v44  ;;  %v4148_v34 = vpop.f32.mrf.mxu1 }
 0x105   :  { %4399 = vmatpush.bf16.msra.mxu1 %v6203_v36  ;;  %4368 = vmatmul.bf16.vlgmr.msrb.gmra.mxu2 %v8786_v38  ;;  %v6167_v36 = vor.u32 %v7908_v13, %v6164_v15  ;;  %v6143_v15 = vor.u32 %v7902_v62, %v6140_v1  ;;  %v8013_v62 = vld [vmem:[%s12104_s1 + $0xa6c] sm:$0xf]  ;;  %v6584_v1 = vld [vmem:[%s12104_s1 + $0xa74] sm:$0xf0] }
 0x106   :  { %4412 = vmatpush.bf16.msra.mxu2 %v6299_v40  ;;  %4381 = vmatmul.bf16.vlgmr.msrb.gmra.mxu3 %v8796_v42  ;;  %v6263_v40 = vor.u32 %v7932_v53, %v6260_v17  ;;  %v6239_v53 = vor.u32 %v7926_v2, %v6236_v3  ;;  %v7875_v17 = vld [vmem:[%s12104_s1 + $0x61c] sm:$0xf]  ;;  %v8037_v2 = vld [vmem:[%s12104_s1 + $0xb2c] sm:$0xf]  ;;  %v6680_v3 = vld [vmem:[%s12104_s1 + $0xb34] sm:$0xf0] }
 0x107   :  { %4425 = vmatpush.bf16.msra.mxu3 %v6395_v50  ;;  %v4149_v50 = vadd.f32 %v4148_v34, %v4136_v27  ;;  %v6128_v27 = vld [vmem:[%s12104_s1 + $0x6e4] sm:$0xf0] }
 0x108   :  { %4387 = vmatpush.bf16.msra.mxu0 %v6095_v58  ;;  %v6059_v58 = vor.u32 %v7881_v43, %v6056_v47  ;;  %v4161_v0 = vpop.f32.mrf.mxu2  ;;  %v6224_v34 = vld [vmem:[%s12104_s1 + $0x7a4] sm:$0xf0]  ;;  %v6035_v43 = vor.u32 %v7875_v17, %v6032_v21  ;;  %v7872_v47 = vld [vmem:[%s12104_s1 + $0x604] sm:$0xf]  ;;  %v6476_v17 = vld [vmem:[%s12104_s1 + $0x99c] sm:$0xf0] }
 0x109   :  { %4400 = vmatpush.bf16.msra.mxu1 %v6191_v59  ;;  %v6155_v59 = vor.u32 %v7905_v48, %v6152_v51  ;;  %v4162_v4 = vadd.f32 %v4161_v0, %v4149_v50  ;;  %v4137_v9 = vpop.f32.mrf.mxu0  ;;  %v6020_v48 = vld [vmem:[%s12104_s1 + $0x60c] sm:$0xf0]  ;;  %v7896_v51 = vld [vmem:[%s12104_s1 + $0x6c4] sm:$0xf]  ;;  %v8010_v21 = vld [vmem:[%s12104_s1 + $0xa54] sm:$0xf] }
 0x10a   :  { %4413 = vmatpush.bf16.msra.mxu2 %v6287_v60  ;;  %v6251_v60 = vor.u32 %v7929_v52, %v6248_v54  ;;  %v6116_v52 = vld [vmem:[%s12104_s1 + $0x6cc] sm:$0xf0]  ;;  %v7920_v54 = vld [vmem:[%s12104_s1 + $0x784] sm:$0xf]  ;;  %v6023_v0 = vor.u32 %v7872_v47, %v6020_v48  ;;  %v7983_v48 = vld [vmem:[%s12104_s1 + $0x97c] sm:$0xf] }
 0x10b   :  { %4426 = vmatpush.bf16.msra.mxu3 %v6383_v63  ;;  %v6347_v63 = vor.u32 %v7953_v56, %v6344_v57  ;;  %v6212_v57 = vld [vmem:[%s12104_s1 + $0x78c] sm:$0xf0] }
 0x10c   :  { %4388 = vmatpush.bf16.msra.mxu0 %v6083_v5  ;;  %v4174_v5 = vpop.f32.mrf.mxu3  ;;  %v4150_v13 = vpop.f32.mrf.mxu1 }
 0x10d   :  { %4401 = vmatpush.bf16.msra.mxu1 %v6179_v6  ;;  %v7950_v6 = vld [vmem:[%s12104_s1 + $0x874] sm:$0xf]  ;;  %v6587_v13 = vor.u32 %v8013_v62, %v6584_v1  ;;  %v6452_v62 = vld [vmem:[%s12104_s1 + $0x96c] sm:$0xf0] }
 0x10e   :  { %4414 = vmatpush.bf16.msra.mxu2 %v6275_v8  ;;  %v6332_v8 = vld [vmem:[%s12104_s1 + $0x87c] sm:$0xf0]  ;;  %v6548_v1 = vld [vmem:[%s12104_s1 + $0xa2c] sm:$0xf0] }
 0x10f   :  { %4427 = vmatpush.bf16.msra.mxu3 %v6371_v14  ;;  %v10144_v14 = vadd.f32 %v4174_v5, %v4162_v4  ;;  %v6335_v26 = vor.u32 %v7950_v6, %v6332_v8  ;;  %v6119_v4 = vor.u32 %v7896_v51, %v6116_v52  ;;  %v6215_v5 = vor.u32 %v7920_v54, %v6212_v57  ;;  %v8061_v6 = vld [vmem:[%s12104_s1 + $0xbec] sm:$0xf]  ;;  %v6776_v8 = vld [vmem:[%s12104_s1 + $0xbf4] sm:$0xf0]  ;;  %v6560_v52 = vld [vmem:[%s12104_s1 + $0xa44] sm:$0xf0] }
 0x110   :  { %4389 = vmatpush.bf16.msra.mxu0 %v6071_v32  ;;  %v7923_v32 = vld [vmem:[%s12104_s1 + $0x79c] sm:$0xf] }
 0x111   :  { %4402 = vmatpush.bf16.msra.mxu1 %v6167_v36  ;;  %v7947_v36 = vld [vmem:[%s12104_s1 + $0x85c] sm:$0xf]  ;;  %v6227_v50 = vor.u32 %v7923_v32, %v6224_v34  ;;  %v6668_v32 = vld [vmem:[%s12104_s1 + $0xb1c] sm:$0xf0]  ;;  %v8058_v34 = vld [vmem:[%s12104_s1 + $0xbd4] sm:$0xf] }
 0x112   :  { %4415 = vmatpush.bf16.msra.mxu2 %v6263_v40  ;;  %v6320_v40 = vld [vmem:[%s12104_s1 + $0x864] sm:$0xf0]  ;;  %v8031_v54 = vld [vmem:[%s12104_s1 + $0xafc] sm:$0xf] }
 0x113   :  { %4428 = vmatpush.bf16.msra.mxu3 %v6359_v39  ;;  %v6131_v39 = vor.u32 %v7899_v24, %v6128_v27  ;;  %v6323_v56 = vor.u32 %v7947_v36, %v6320_v40  ;;  %v6779_v24 = vor.u32 %v8061_v6, %v6776_v8  ;;  %v8034_v27 = vld [vmem:[%s12104_s1 + $0xb14] sm:$0xf]  ;;  %v6764_v36 = vld [vmem:[%s12104_s1 + $0xbdc] sm:$0xf0]  ;;  %v8055_v57 = vld [vmem:[%s12104_s1 + $0xbbc] sm:$0xf] }
 0x114   :  { %4390 = vmatpush.bf16.msra.mxu0 %v6059_v58  ;;  %v7944_v58 = vld [vmem:[%s12104_s1 + $0x844] sm:$0xf]  ;;  %v6671_v47 = vor.u32 %v8034_v27, %v6668_v32  ;;  %v6767_v51 = vor.u32 %v8058_v34, %v6764_v36  ;;  %v6740_v6 = vld [vmem:[%s12104_s1 + $0xbac] sm:$0xf0]  ;;  %v8025_v27 = vld [vmem:[%s12104_s1 + $0xacc] sm:$0xf] }
 0x115   :  { %4403 = vmatpush.bf16.msra.mxu1 %v6155_v59  ;;  %v6308_v59 = vld [vmem:[%s12104_s1 + $0x84c] sm:$0xf0]  ;;  %v6632_v32 = vld [vmem:[%s12104_s1 + $0xad4] sm:$0xf0]  ;;  %v8049_v34 = vld [vmem:[%s12104_s1 + $0xb8c] sm:$0xf] }
 0x116   :  { %4416 = vmatpush.bf16.msra.mxu2 %v6251_v60  ;;  %v4163_v60 = vpop.f32.mrf.mxu2  ;;  %v6311_v9 = vor.u32 %v7944_v58, %v6308_v59  ;;  %v6752_v58 = vld [vmem:[%s12104_s1 + $0xbc4] sm:$0xf0]  ;;  %v6728_v36 = vld [vmem:[%s12104_s1 + $0xb94] sm:$0xf0] }
 0x117   :  { %4429 = vmatpush.bf16.msra.mxu3 %v6347_v63  ;;  %v4176_v63 = vpop.f32.mrf.mxu3 }
 0x118   :  { %4391 = vmatpush.bf16.msra.mxu0 %v6047_v10  ;;  %v6491_v10 = vor.u32 %v7989_v61, %v6488_v55  ;;  %v7980_v55 = vld [vmem:[%s12104_s1 + $0x964] sm:$0xf] }
 0x119   :  { %4404 = vmatpush.bf16.msra.mxu1 %v6143_v15  ;;  %v6683_v15 = vor.u32 %v8037_v2, %v6680_v3  ;;  %v8004_v63 = vld [vmem:[%s12104_s1 + $0xa24] sm:$0xf]  ;;  %v6644_v3 = vld [vmem:[%s12104_s1 + $0xaec] sm:$0xf0] }
 0x11a   :  { %4417 = vmatpush.bf16.msra.mxu2 %v6239_v53  ;;  %v7986_v53 = vld [vmem:[%s12104_s1 + $0x994] sm:$0xf]  ;;  %v8028_v2 = vld [vmem:[%s12104_s1 + $0xae4] sm:$0xf] }
 0x11b   :  { %4430 = vmatpush.bf16.msra.mxu3 %v6335_v26  ;;  %v6572_v26 = vld [vmem:[%s12104_s1 + $0xa5c] sm:$0xf0]  ;;  %v6479_v40 = vor.u32 %v7986_v53, %v6476_v17  ;;  %v7977_v53 = vld [vmem:[%s12104_s1 + $0x94c] sm:$0xf]  ;;  %v6440_v17 = vld [vmem:[%s12104_s1 + $0x954] sm:$0xf0] }
 0x11c   :  { %4392 = vmatpush.bf16.msra.mxu0 %v6035_v43  ;;  %v6575_v43 = vor.u32 %v8010_v21, %v6572_v26  ;;  %v8001_v21 = vld [vmem:[%s12104_s1 + $0xa0c] sm:$0xf]  ;;  %v6536_v26 = vld [vmem:[%s12104_s1 + $0xa14] sm:$0xf0] }
 0x11d   :  { %4405 = vmatpush.bf16.msra.mxu1 %v6131_v39  ;;  %v6464_v39 = vld [vmem:[%s12104_s1 + $0x984] sm:$0xf0] }
 0x11e   :  { %4418 = vmatpush.bf16.msra.mxu2 %v6227_v50  ;;  %v8007_v50 = vld [vmem:[%s12104_s1 + $0xa3c] sm:$0xf]  ;;  %v6467_v59 = vor.u32 %v7983_v48, %v6464_v39  ;;  %v7974_v48 = vld [vmem:[%s12104_s1 + $0x934] sm:$0xf]  ;;  %v6428_v39 = vld [vmem:[%s12104_s1 + $0x93c] sm:$0xf0] }
 0x11f   :  { %4431 = vmatpush.bf16.msra.mxu3 %v6323_v56  ;;  %v6656_v56 = vld [vmem:[%s12104_s1 + $0xb04] sm:$0xf0]  ;;  %v6563_v60 = vor.u32 %v8007_v50, %v6560_v52  ;;  %v7998_v50 = vld [vmem:[%s12104_s1 + $0x9f4] sm:$0xf] }
 0x120   :  { %4393 = vmatpush.bf16.msra.mxu0 %v6023_v0  ;;  %v6659_v61 = vor.u32 %v8031_v54, %v6656_v56  ;;  %v6755_v0 = vor.u32 %v8055_v57, %v6752_v58  ;;  %v6524_v54 = vld [vmem:[%s12104_s1 + $0x9fc] sm:$0xf0]  ;;  %v8022_v56 = vld [vmem:[%s12104_s1 + $0xab4] sm:$0xf] }
 0x121   :  { %4406 = vmatpush.bf16.msra.mxu1 %v6119_v4  ;;  %v4187_v4 = vpop.f32.mrf.mxu0  ;;  %v6620_v57 = vld [vmem:[%s12104_s1 + $0xabc] sm:$0xf0] }
 0x122   :  { %4419 = vmatpush.bf16.msra.mxu2 %v6215_v5  ;;  %v8052_v5 = vld [vmem:[%s12104_s1 + $0xba4] sm:$0xf]  ;;  %v4188_v8 = vadd.f32 %v4187_v4, %v10144_v14  ;;  %v6416_v4 = vld [vmem:[%s12104_s1 + $0x924] sm:$0xf0] }
 0x123   :  { %4432 = vmatpush.bf16.msra.mxu3 %v6311_v9  ;;  %4394 = vmatmul.bf16.vlgmr.msra.gmra.mxu0 %v8987_v25  ;;  %v6455_v9 = vor.u32 %v7980_v55, %v6452_v62  ;;  %v6743_v14 = vor.u32 %v8052_v5, %v6740_v6  ;;  %v6431_v62 = vor.u32 %v7974_v48, %v6428_v39  ;;  %v7995_v5 = vld [vmem:[%s12104_s1 + $0x9dc] sm:$0xf]  ;;  %v8085_v48 = vld [vmem:[%s12104_s1 + $0xcac] sm:$0xf]  ;;  %v6872_v39 = vld [vmem:[%s12104_s1 + $0xcb4] sm:$0xf0] }
 0x124   :  { %4438 = vmatpush.bf16.msrb.mxu0 %v6491_v10  ;;  %4407 = vmatmul.bf16.vlgmr.msra.gmra.mxu1 %v9000_v30  ;;  %v4200_v10 = vpop.f32.mrf.mxu1 }
 0x125   :  { %4451 = vmatpush.bf16.msrb.mxu1 %v6587_v13  ;;  %4420 = vmatmul.bf16.vlgmr.msra.gmra.mxu2 %v8998_v29  ;;  %v6551_v13 = vor.u32 %v8004_v63, %v6548_v1  ;;  %v6527_v1 = vor.u32 %v7998_v50, %v6524_v54  ;;  %v8109_v50 = vld [vmem:[%s12104_s1 + $0xd6c] sm:$0xf]  ;;  %v6968_v54 = vld [vmem:[%s12104_s1 + $0xd74] sm:$0xf0] }
 0x126   :  { %4464 = vmatpush.bf16.msrb.mxu2 %v6683_v15  ;;  %4433 = vmatmul.bf16.vlgmr.msra.gmra.mxu3 %v9008_v33  ;;  %v6647_v15 = vor.u32 %v8028_v2, %v6644_v3  ;;  %v6623_v2 = vor.u32 %v8022_v56, %v6620_v57  ;;  %v7971_v3 = vld [vmem:[%s12104_s1 + $0x91c] sm:$0xf]  ;;  %v8133_v56 = vld [vmem:[%s12104_s1 + $0xe2c] sm:$0xf]  ;;  %v7064_v57 = vld [vmem:[%s12104_s1 + $0xe34] sm:$0xf0] }
 0x127   :  { %4477 = vmatpush.bf16.msrb.mxu3 %v6779_v24  ;;  %v4201_v24 = vadd.f32 %v4200_v10, %v4188_v8  ;;  %v6512_v8 = vld [vmem:[%s12104_s1 + $0x9e4] sm:$0xf0] }
 0x128   :  { %4439 = vmatpush.bf16.msrb.mxu0 %v6479_v40  ;;  %v6443_v40 = vor.u32 %v7977_v53, %v6440_v17  ;;  %v4213_v52 = vpop.f32.mrf.mxu2  ;;  %v6608_v10 = vld [vmem:[%s12104_s1 + $0xaa4] sm:$0xf0]  ;;  %v6419_v53 = vor.u32 %v7971_v3, %v6416_v4  ;;  %v7968_v17 = vld [vmem:[%s12104_s1 + $0x904] sm:$0xf]  ;;  %v6860_v3 = vld [vmem:[%s12104_s1 + $0xc9c] sm:$0xf0] }
 0x129   :  { %4452 = vmatpush.bf16.msrb.mxu1 %v6575_v43  ;;  %v6539_v43 = vor.u32 %v8001_v21, %v6536_v26  ;;  %v4214_v58 = vadd.f32 %v4213_v52, %v4201_v24  ;;  %v4189_v55 = vpop.f32.mrf.mxu0  ;;  %v6404_v21 = vld [vmem:[%s12104_s1 + $0x90c] sm:$0xf0]  ;;  %v7992_v26 = vld [vmem:[%s12104_s1 + $0x9c4] sm:$0xf]  ;;  %v8106_v4 = vld [vmem:[%s12104_s1 + $0xd54] sm:$0xf] }
 0x12a   :  { %4465 = vmatpush.bf16.msrb.mxu2 %v6671_v47  ;;  %v6635_v47 = vor.u32 %v8025_v27, %v6632_v32  ;;  %v6500_v27 = vld [vmem:[%s12104_s1 + $0x9cc] sm:$0xf0]  ;;  %v8016_v32 = vld [vmem:[%s12104_s1 + $0xa84] sm:$0xf]  ;;  %v6407_v52 = vor.u32 %v7968_v17, %v6404_v21  ;;  %v8079_v21 = vld [vmem:[%s12104_s1 + $0xc7c] sm:$0xf] }
 0x12b   :  { %4478 = vmatpush.bf16.msrb.mxu3 %v6767_v51  ;;  %v6731_v51 = vor.u32 %v8049_v34, %v6728_v36  ;;  %v6596_v36 = vld [vmem:[%s12104_s1 + $0xa8c] sm:$0xf0] }
 0x12c   :  { %4440 = vmatpush.bf16.msrb.mxu0 %v6467_v59  ;;  %v4226_v59 = vpop.f32.mrf.mxu3  ;;  %v4202_v63 = vpop.f32.mrf.mxu1 }
 0x12d   :  { %4453 = vmatpush.bf16.msrb.mxu1 %v6563_v60  ;;  %v8046_v60 = vld [vmem:[%s12104_s1 + $0xb74] sm:$0xf]  ;;  %v6971_v63 = vor.u32 %v8109_v50, %v6968_v54  ;;  %v6836_v50 = vld [vmem:[%s12104_s1 + $0xc6c] sm:$0xf0] }
 0x12e   :  { %4466 = vmatpush.bf16.msrb.mxu2 %v6659_v61  ;;  %v6716_v61 = vld [vmem:[%s12104_s1 + $0xb7c] sm:$0xf0]  ;;  %v6932_v54 = vld [vmem:[%s12104_s1 + $0xd2c] sm:$0xf0] }
 0x12f   :  { %4479 = vmatpush.bf16.msrb.mxu3 %v6755_v0  ;;  %v10343_v0 = vadd.f32 %v4226_v59, %v4214_v58  ;;  %v6719_v6 = vor.u32 %v8046_v60, %v6716_v61  ;;  %v6503_v58 = vor.u32 %v7992_v26, %v6500_v27  ;;  %v6599_v59 = vor.u32 %v8016_v32, %v6596_v36  ;;  %v8157_v60 = vld [vmem:[%s12104_s1 + $0xeec] sm:$0xf]  ;;  %v7160_v61 = vld [vmem:[%s12104_s1 + $0xef4] sm:$0xf0]  ;;  %v6944_v27 = vld [vmem:[%s12104_s1 + $0xd44] sm:$0xf0] }
 0x130   :  { %4441 = vmatpush.bf16.msrb.mxu0 %v6455_v9  ;;  %v8019_v9 = vld [vmem:[%s12104_s1 + $0xa9c] sm:$0xf] }
 0x131   :  { %4454 = vmatpush.bf16.msrb.mxu1 %v6551_v13  ;;  %v8043_v13 = vld [vmem:[%s12104_s1 + $0xb5c] sm:$0xf]  ;;  %v6611_v24 = vor.u32 %v8019_v9, %v6608_v10  ;;  %v7052_v9 = vld [vmem:[%s12104_s1 + $0xe1c] sm:$0xf0]  ;;  %v8154_v10 = vld [vmem:[%s12104_s1 + $0xed4] sm:$0xf] }
 0x132   :  { %4467 = vmatpush.bf16.msrb.mxu2 %v6647_v15  ;;  %v6704_v15 = vld [vmem:[%s12104_s1 + $0xb64] sm:$0xf0]  ;;  %v8127_v32 = vld [vmem:[%s12104_s1 + $0xdfc] sm:$0xf] }
 0x133   :  { %4480 = vmatpush.bf16.msrb.mxu3 %v6743_v14  ;;  %v6515_v14 = vor.u32 %v7995_v5, %v6512_v8  ;;  %v6707_v34 = vor.u32 %v8043_v13, %v6704_v15  ;;  %v7163_v5 = vor.u32 %v8157_v60, %v7160_v61  ;;  %v8130_v8 = vld [vmem:[%s12104_s1 + $0xe14] sm:$0xf]  ;;  %v7148_v13 = vld [vmem:[%s12104_s1 + $0xedc] sm:$0xf0]  ;;  %v8151_v36 = vld [vmem:[%s12104_s1 + $0xebc] sm:$0xf] }
 0x134   :  { %4442 = vmatpush.bf16.msrb.mxu0 %v6443_v40  ;;  %v8040_v40 = vld [vmem:[%s12104_s1 + $0xb44] sm:$0xf]  ;;  %v7055_v17 = vor.u32 %v8130_v8, %v7052_v9  ;;  %v7151_v26 = vor.u32 %v8154_v10, %v7148_v13  ;;  %v7124_v60 = vld [vmem:[%s12104_s1 + $0xeac] sm:$0xf0]  ;;  %v8121_v8 = vld [vmem:[%s12104_s1 + $0xdcc] sm:$0xf] }
 0x135   :  { %4455 = vmatpush.bf16.msrb.mxu1 %v6539_v43  ;;  %v6692_v43 = vld [vmem:[%s12104_s1 + $0xb4c] sm:$0xf0]  ;;  %v7016_v9 = vld [vmem:[%s12104_s1 + $0xdd4] sm:$0xf0]  ;;  %v8145_v10 = vld [vmem:[%s12104_s1 + $0xe8c] sm:$0xf] }
 0x136   :  { %4468 = vmatpush.bf16.msrb.mxu2 %v6635_v47  ;;  %v4215_v47 = vpop.f32.mrf.mxu2  ;;  %v6695_v55 = vor.u32 %v8040_v40, %v6692_v43  ;;  %v7136_v40 = vld [vmem:[%s12104_s1 + $0xec4] sm:$0xf0]  ;;  %v7112_v13 = vld [vmem:[%s12104_s1 + $0xe94] sm:$0xf0] }
 0x137   :  { %4481 = vmatpush.bf16.msrb.mxu3 %v6731_v51  ;;  %v4228_v51 = vpop.f32.mrf.mxu3 }
 0x138   :  { %4443 = vmatpush.bf16.msrb.mxu0 %v6431_v62  ;;  %v6875_v62 = vor.u32 %v8085_v48, %v6872_v39  ;;  %v8076_v39 = vld [vmem:[%s12104_s1 + $0xc64] sm:$0xf] }
 0x139   :  { %4456 = vmatpush.bf16.msrb.mxu1 %v6527_v1  ;;  %v7067_v1 = vor.u32 %v8133_v56, %v7064_v57  ;;  %v8100_v51 = vld [vmem:[%s12104_s1 + $0xd24] sm:$0xf]  ;;  %v7028_v57 = vld [vmem:[%s12104_s1 + $0xdec] sm:$0xf0] }
 0x13a   :  { %4469 = vmatpush.bf16.msrb.mxu2 %v6623_v2  ;;  %v8082_v2 = vld [vmem:[%s12104_s1 + $0xc94] sm:$0xf]  ;;  %v8124_v56 = vld [vmem:[%s12104_s1 + $0xde4] sm:$0xf] }
 0x13b   :  { %4482 = vmatpush.bf16.msrb.mxu3 %v6719_v6  ;;  %v6956_v6 = vld [vmem:[%s12104_s1 + $0xd5c] sm:$0xf0]  ;;  %v6863_v15 = vor.u32 %v8082_v2, %v6860_v3  ;;  %v8073_v2 = vld [vmem:[%s12104_s1 + $0xc4c] sm:$0xf]  ;;  %v6824_v3 = vld [vmem:[%s12104_s1 + $0xc54] sm:$0xf0] }
 0x13c   :  { %4444 = vmatpush.bf16.msrb.mxu0 %v6419_v53  ;;  %v6959_v53 = vor.u32 %v8106_v4, %v6956_v6  ;;  %v8097_v4 = vld [vmem:[%s12104_s1 + $0xd0c] sm:$0xf]  ;;  %v6920_v6 = vld [vmem:[%s12104_s1 + $0xd14] sm:$0xf0] }
 0x13d   :  { %4457 = vmatpush.bf16.msrb.mxu1 %v6515_v14  ;;  %v6848_v14 = vld [vmem:[%s12104_s1 + $0xc84] sm:$0xf0] }
 0x13e   :  { %4470 = vmatpush.bf16.msrb.mxu2 %v6611_v24  ;;  %v8103_v24 = vld [vmem:[%s12104_s1 + $0xd3c] sm:$0xf]  ;;  %v6851_v43 = vor.u32 %v8079_v21, %v6848_v14  ;;  %v8070_v21 = vld [vmem:[%s12104_s1 + $0xc34] sm:$0xf]  ;;  %v6812_v14 = vld [vmem:[%s12104_s1 + $0xc3c] sm:$0xf0] }
 0x13f   :  { %4483 = vmatpush.bf16.msrb.mxu3 %v6707_v34  ;;  %v7040_v34 = vld [vmem:[%s12104_s1 + $0xe04] sm:$0xf0]  ;;  %v6947_v47 = vor.u32 %v8103_v24, %v6944_v27  ;;  %v8094_v24 = vld [vmem:[%s12104_s1 + $0xcf4] sm:$0xf] }
 0x140   :  { %4445 = vmatpush.bf16.msrb.mxu0 %v6407_v52  ;;  %v7043_v48 = vor.u32 %v8127_v32, %v7040_v34  ;;  %v7139_v52 = vor.u32 %v8151_v36, %v7136_v40  ;;  %v6908_v32 = vld [vmem:[%s12104_s1 + $0xcfc] sm:$0xf0]  ;;  %v8118_v34 = vld [vmem:[%s12104_s1 + $0xdb4] sm:$0xf] }
 0x141   :  { %4458 = vmatpush.bf16.msrb.mxu1 %v6503_v58  ;;  %v4239_v58 = vpop.f32.mrf.mxu0  ;;  %v7004_v36 = vld [vmem:[%s12104_s1 + $0xdbc] sm:$0xf0] }
 0x142   :  { %4471 = vmatpush.bf16.msrb.mxu2 %v6599_v59  ;;  %v8148_v59 = vld [vmem:[%s12104_s1 + $0xea4] sm:$0xf]  ;;  %v4240_v61 = vadd.f32 %v4239_v58, %v10343_v0  ;;  %v6800_v58 = vld [vmem:[%s12104_s1 + $0xc24] sm:$0xf0] }
 0x143   :  { %4484 = vmatpush.bf16.msrb.mxu3 %v6695_v55  ;;  %4446 = vmatmul.bf16.vlgmr.msrb.gmra.mxu0 %v9197_v23  ;;  %v6839_v55 = vor.u32 %v8076_v39, %v6836_v50  ;;  %v7127_v0 = vor.u32 %v8148_v59, %v7124_v60  ;;  %v6815_v50 = vor.u32 %v8070_v21, %v6812_v14  ;;  %v8091_v59 = vld [vmem:[%s12104_s1 + $0xcdc] sm:$0xf]  ;;  %v8181_v21 = vld [vmem:[%s12104_s1 + $0xfac] sm:$0xf]  ;;  %v7256_v14 = vld [vmem:[%s12104_s1 + $0xfb4] sm:$0xf0] }
 0x144   :  { %4490 = vmatpush.bf16.msra.mxu0 %v6875_v62  ;;  %4459 = vmatmul.bf16.vlgmr.msrb.gmra.mxu1 %v9210_v31  ;;  %v4252_v62 = vpop.f32.mrf.mxu1 }
 0x145   :  { %4503 = vmatpush.bf16.msra.mxu1 %v6971_v63  ;;  %4472 = vmatmul.bf16.vlgmr.msrb.gmra.mxu2 %v9208_v28  ;;  %v6935_v63 = vor.u32 %v8100_v51, %v6932_v54  ;;  %v6911_v54 = vor.u32 %v8094_v24, %v6908_v32  ;;  %v8205_v24 = vld [vmem:[%s12104_s1 + $0x106c] sm:$0xf]  ;;  %v7352_v32 = vld [vmem:[%s12104_s1 + $0x1074] sm:$0xf0] }
 0x146   :  { %4516 = vmatpush.bf16.msra.mxu2 %v7067_v1  ;;  %4485 = vmatmul.bf16.vlgmr.msrb.gmra.mxu3 %v9218_v35  ;;  %v7031_v1 = vor.u32 %v8124_v56, %v7028_v57  ;;  %v7007_v56 = vor.u32 %v8118_v34, %v7004_v36  ;;  %v8067_v57 = vld [vmem:[%s12104_s1 + $0xc1c] sm:$0xf]  ;;  %v8229_v34 = vld [vmem:[%s12104_s1 + $0x112c] sm:$0xf]  ;;  %v7448_v36 = vld [vmem:[%s12104_s1 + $0x1134] sm:$0xf0] }
 0x147   :  { %4529 = vmatpush.bf16.msra.mxu3 %v7163_v5  ;;  %v4253_v5 = vadd.f32 %v4252_v62, %v4240_v61  ;;  %v6896_v61 = vld [vmem:[%s12104_s1 + $0xce4] sm:$0xf0] }
 0x148   :  { %4491 = vmatpush.bf16.msra.mxu0 %v6863_v15  ;;  %v6827_v15 = vor.u32 %v8073_v2, %v6824_v3  ;;  %v4265_v27 = vpop.f32.mrf.mxu2  ;;  %v6992_v62 = vld [vmem:[%s12104_s1 + $0xda4] sm:$0xf0]  ;;  %v6803_v2 = vor.u32 %v8067_v57, %v6800_v58  ;;  %v8064_v3 = vld [vmem:[%s12104_s1 + $0xc04] sm:$0xf]  ;;  %v7244_v57 = vld [vmem:[%s12104_s1 + $0xf9c] sm:$0xf0] }
 0x149   :  { %4504 = vmatpush.bf16.msra.mxu1 %v6959_v53  ;;  %v6923_v53 = vor.u32 %v8097_v4, %v6920_v6  ;;  %v4266_v40 = vadd.f32 %v4265_v27, %v4253_v5  ;;  %v4241_v39 = vpop.f32.mrf.mxu0  ;;  %v6788_v4 = vld [vmem:[%s12104_s1 + $0xc0c] sm:$0xf0]  ;;  %v8088_v6 = vld [vmem:[%s12104_s1 + $0xcc4] sm:$0xf]  ;;  %v8202_v58 = vld [vmem:[%s12104_s1 + $0x1054] sm:$0xf] }
 0x14a   :  { %4517 = vmatpush.bf16.msra.mxu2 %v7055_v17  ;;  %v7019_v17 = vor.u32 %v8121_v8, %v7016_v9  ;;  %v6884_v8 = vld [vmem:[%s12104_s1 + $0xccc] sm:$0xf0]  ;;  %v8112_v9 = vld [vmem:[%s12104_s1 + $0xd84] sm:$0xf]  ;;  %v6791_v27 = vor.u32 %v8064_v3, %v6788_v4  ;;  %v8175_v4 = vld [vmem:[%s12104_s1 + $0xf7c] sm:$0xf] }
 0x14b   :  { %4530 = vmatpush.bf16.msra.mxu3 %v7151_v26  ;;  %v7115_v26 = vor.u32 %v8145_v10, %v7112_v13  ;;  %v6980_v13 = vld [vmem:[%s12104_s1 + $0xd8c] sm:$0xf0] }
 0x14c   :  { %4492 = vmatpush.bf16.msra.mxu0 %v6851_v43  ;;  %v4278_v43 = vpop.f32.mrf.mxu3  ;;  %v4254_v51 = vpop.f32.mrf.mxu1 }
 0x14d   :  { %4505 = vmatpush.bf16.msra.mxu1 %v6947_v47  ;;  %v8142_v47 = vld [vmem:[%s12104_s1 + $0xe74] sm:$0xf]  ;;  %v7355_v51 = vor.u32 %v8205_v24, %v7352_v32  ;;  %v7220_v24 = vld [vmem:[%s12104_s1 + $0xf6c] sm:$0xf0] }
 0x14e   :  { %4518 = vmatpush.bf16.msra.mxu2 %v7043_v48  ;;  %v7100_v48 = vld [vmem:[%s12104_s1 + $0xe7c] sm:$0xf0] }
 0x14f   :  { %4531 = vmatpush.bf16.msra.mxu3 %v7139_v52  ;;  %v10542_v52 = vadd.f32 %v4278_v43, %v4266_v40  ;;  %v7103_v60 = vor.u32 %v8142_v47, %v7100_v48  ;;  %v6887_v40 = vor.u32 %v8088_v6, %v6884_v8  ;;  %v6983_v43 = vor.u32 %v8112_v9, %v6980_v13  ;;  %v8253_v47 = vld [vmem:[%s12104_s1 + $0x11ec] sm:$0xf]  ;;  %v7544_v48 = vld [vmem:[%s12104_s1 + $0x11f4] sm:$0xf0]  ;;  %v7328_v8 = vld [vmem:[%s12104_s1 + $0x1044] sm:$0xf0] }
 0x150   :  { %4493 = vmatpush.bf16.msra.mxu0 %v6839_v55  ;;  %v8115_v55 = vld [vmem:[%s12104_s1 + $0xd9c] sm:$0xf] }
 0x151   :  { %4506 = vmatpush.bf16.msra.mxu1 %v6935_v63  ;;  %v8139_v63 = vld [vmem:[%s12104_s1 + $0xe5c] sm:$0xf]  ;;  %v6995_v5 = vor.u32 %v8115_v55, %v6992_v62  ;;  %v7436_v55 = vld [vmem:[%s12104_s1 + $0x111c] sm:$0xf0]  ;;  %v8250_v62 = vld [vmem:[%s12104_s1 + $0x11d4] sm:$0xf] }
 0x152   :  { %4519 = vmatpush.bf16.msra.mxu2 %v7031_v1  ;;  %v7088_v1 = vld [vmem:[%s12104_s1 + $0xe64] sm:$0xf0]  ;;  %v8223_v9 = vld [vmem:[%s12104_s1 + $0x10fc] sm:$0xf] }
 0x153   :  { %4532 = vmatpush.bf16.msra.mxu3 %v7127_v0  ;;  %v6899_v0 = vor.u32 %v8091_v59, %v6896_v61  ;;  %v7091_v10 = vor.u32 %v8139_v63, %v7088_v1  ;;  %v7547_v59 = vor.u32 %v8253_v47, %v7544_v48  ;;  %v8226_v61 = vld [vmem:[%s12104_s1 + $0x1114] sm:$0xf]  ;;  %v7532_v63 = vld [vmem:[%s12104_s1 + $0x11dc] sm:$0xf0]  ;;  %v8247_v13 = vld [vmem:[%s12104_s1 + $0x11bc] sm:$0xf] }
 0x154   :  { %4494 = vmatpush.bf16.msra.mxu0 %v6827_v15  ;;  %v8136_v15 = vld [vmem:[%s12104_s1 + $0xe44] sm:$0xf]  ;;  %v7439_v3 = vor.u32 %v8226_v61, %v7436_v55  ;;  %v7535_v6 = vor.u32 %v8250_v62, %v7532_v63  ;;  %v7508_v48 = vld [vmem:[%s12104_s1 + $0x11ac] sm:$0xf0]  ;;  %v7304_v55 = vld [vmem:[%s12104_s1 + $0x1014] sm:$0xf0] }
 0x155   :  { %4507 = vmatpush.bf16.msra.mxu1 %v6923_v53  ;;  %v7076_v53 = vld [vmem:[%s12104_s1 + $0xe4c] sm:$0xf0]  ;;  %v8244_v47 = vld [vmem:[%s12104_s1 + $0x11a4] sm:$0xf]  ;;  %v8217_v62 = vld [vmem:[%s12104_s1 + $0x10cc] sm:$0xf] }
 0x156   :  { %4520 = vmatpush.bf16.msra.mxu2 %v7019_v17  ;;  %v4267_v17 = vpop.f32.mrf.mxu2  ;;  %v7079_v39 = vor.u32 %v8136_v15, %v7076_v53  ;;  %v7520_v15 = vld [vmem:[%s12104_s1 + $0x11c4] sm:$0xf0]  ;;  %v7511_v61 = vor.u32 %v8244_v47, %v7508_v48  ;;  %v7400_v63 = vld [vmem:[%s12104_s1 + $0x10d4] sm:$0xf0]  ;;  %v8187_v48 = vld [vmem:[%s12104_s1 + $0xfdc] sm:$0xf] }
 0x157   :  { %4533 = vmatpush.bf16.msra.mxu3 %v7115_v26  ;;  %v4280_v26 = vpop.f32.mrf.mxu3  ;;  %v8172_v17 = vld [vmem:[%s12104_s1 + $0xf64] sm:$0xf]  ;;  %v7184_v47 = vld [vmem:[%s12104_s1 + $0xf24] sm:$0xf0] }
 0x158   :  { %4495 = vmatpush.bf16.msra.mxu0 %v6815_v50  ;;  %v7259_v50 = vor.u32 %v8181_v21, %v7256_v14  ;;  %v8196_v26 = vld [vmem:[%s12104_s1 + $0x1024] sm:$0xf] }
 0x159   :  { %4508 = vmatpush.bf16.msra.mxu1 %v6911_v54  ;;  %v7451_v54 = vor.u32 %v8229_v34, %v7448_v36  ;;  %v7523_v34 = vor.u32 %v8247_v13, %v7520_v15  ;;  %v7316_v36 = vld [vmem:[%s12104_s1 + $0x102c] sm:$0xf0]  ;;  %v7292_v15 = vld [vmem:[%s12104_s1 + $0xffc] sm:$0xf0] }
 0x15a   :  { %4521 = vmatpush.bf16.msra.mxu2 %v7007_v56  ;;  %v8178_v56 = vld [vmem:[%s12104_s1 + $0xf94] sm:$0xf] }
 0x15b   :  { %4534 = vmatpush.bf16.msra.mxu3 %v7103_v60  ;;  %v7340_v60 = vld [vmem:[%s12104_s1 + $0x105c] sm:$0xf0]  ;;  %v7247_v1 = vor.u32 %v8178_v56, %v7244_v57  ;;  %v8169_v56 = vld [vmem:[%s12104_s1 + $0xf4c] sm:$0xf]  ;;  %v7208_v57 = vld [vmem:[%s12104_s1 + $0xf54] sm:$0xf0] }
 0x15c   :  { %4496 = vmatpush.bf16.msra.mxu0 %v6803_v2  ;;  %v7343_v2 = vor.u32 %v8202_v58, %v7340_v60  ;;  %v8193_v58 = vld [vmem:[%s12104_s1 + $0x100c] sm:$0xf] }
 0x15d   :  { %4509 = vmatpush.bf16.msra.mxu1 %v6899_v0  ;;  %v7232_v0 = vld [vmem:[%s12104_s1 + $0xf84] sm:$0xf0] }
 0x15e   :  { %4522 = vmatpush.bf16.msra.mxu2 %v6995_v5  ;;  %v8199_v5 = vld [vmem:[%s12104_s1 + $0x103c] sm:$0xf]  ;;  %v7235_v53 = vor.u32 %v8175_v4, %v7232_v0  ;;  %v7211_v4 = vor.u32 %v8169_v56, %v7208_v57  ;;  %v7307_v0 = vor.u32 %v8193_v58, %v7304_v55  ;;  %v7376_v56 = vld [vmem:[%s12104_s1 + $0x10a4] sm:$0xf0] }
 0x15f   :  { %4535 = vmatpush.bf16.msra.mxu3 %v7091_v10  ;;  %v7424_v10 = vld [vmem:[%s12104_s1 + $0x1104] sm:$0xf0]  ;;  %v7331_v21 = vor.u32 %v8199_v5, %v7328_v8  ;;  %v7403_v5 = vor.u32 %v8217_v62, %v7400_v63  ;;  %v7196_v8 = vld [vmem:[%s12104_s1 + $0xf3c] sm:$0xf0]  ;;  %v8235_v57 = vld [vmem:[%s12104_s1 + $0x115c] sm:$0xf] }
 0x160   :  { %4497 = vmatpush.bf16.msra.mxu0 %v6791_v27  ;;  %v7427_v14 = vor.u32 %v8223_v9, %v7424_v10  ;;  %v8294_v27 = vld [vmem:[%s12106_s2] sm:$0x7]  ;;  %v8190_v9 = vld [vmem:[%s12104_s1 + $0xff4] sm:$0xf]  ;;  %v7472_v58 = vld [vmem:[%s12104_s1 + $0x1164] sm:$0xf0] }
 0x161   :  { %4510 = vmatpush.bf16.msra.mxu1 %v6887_v40  ;;  %v809_v32 = vperm.slane %v8294_v27, 1  ;;  %v8220_v40 = vld [vmem:[%s12104_s1 + $0x10e4] sm:$0xf]  ;;  %v4304_v60 = vpop.f32.mrf.mxu1 }
 0x162   :  { %4523 = vmatpush.bf16.msra.mxu2 %v6983_v43  ;;  %v7412_v43 = vld [vmem:[%s12104_s1 + $0x10ec] sm:$0xf0]  ;;  %v8184_v63 = vld [vmem:[%s12104_s1 + $0xfc4] sm:$0xf] }
 0x163   :  { %4536 = vmatpush.bf16.msra.mxu3 %v7079_v39  ;;  %4498 = vmatmul.bf16.vlgmr.msra.gmra.mxu0 %v9407_v37  ;;  %v7223_v39 = vor.u32 %v8172_v17, %v7220_v24  ;;  %v7388_v17 = vld [vmem:[%s12104_s1 + $0x10bc] sm:$0xf0]  ;;  %v8238_v24 = vld [vmem:[%s12104_s1 + $0x1174] sm:$0xf] }
 0x164   :  { %4542 = vmatpush.bf16.msrb.mxu0 %v7259_v50  ;;  %4511 = vmatmul.bf16.vlgmr.msra.gmra.mxu1 %v9420_v46  ;;  %v4291_v50 = vpop.f32.mrf.mxu0 }
 0x165   :  { %4555 = vmatpush.bf16.msrb.mxu1 %v7355_v51  ;;  %4524 = vmatmul.bf16.vlgmr.msra.gmra.mxu2 %v9418_v45  ;;  %v7319_v51 = vor.u32 %v8196_v26, %v7316_v36  ;;  %v7484_v26 = vld [vmem:[%s12104_s1 + $0x117c] sm:$0xf0]  ;;  %v7295_v36 = vor.u32 %v8190_v9, %v7292_v15  ;;  %v5342_v9 = vld [vmem:[%s12104_s1 + $0xb0] sm:$0xf] }
 0x166   :  { %4568 = vmatpush.bf16.msrb.mxu2 %v7451_v54  ;;  %4537 = vmatmul.bf16.vlgmr.msra.gmra.mxu3 %v9428_v49  ;;  %v7415_v54 = vor.u32 %v8220_v40, %v7412_v43  ;;  %v8163_v43 = vld [vmem:[%s12104_s1 + $0xf1c] sm:$0xf] }
 0x167   :  { %4581 = vmatpush.bf16.msrb.mxu3 %v7547_v59  ;;  %v4292_v59 = vadd.f32 %v4291_v50, %v809_v32  ;;  %v7487_v50 = vor.u32 %v8238_v24, %v7484_v26  ;;  %v5630_v26 = vld [vmem:[%s12104_s1 + $0x2f0] sm:$0xf] }
 0x168   :  { %4543 = vmatpush.bf16.msrb.mxu0 %v7247_v1  ;;  %v8241_v1 = vld [vmem:[%s12104_s1 + $0x118c] sm:$0xf]  ;;  %v4317_v10 = vpop.f32.mrf.mxu2 }
 0x169   :  { %4556 = vmatpush.bf16.msrb.mxu1 %v7343_v2  ;;  %v7496_v2 = vld [vmem:[%s12104_s1 + $0x1194] sm:$0xf0] }
 0x16a   :  { %4569 = vmatpush.bf16.msrb.mxu2 %v7439_v3  ;;  %v4305_v3 = vadd.f32 %v4304_v60, %v4292_v59  ;;  %v7499_v13 = vor.u32 %v8241_v1, %v7496_v2  ;;  %v7187_v59 = vor.u32 %v8163_v43, %v7184_v47  ;;  %v8160_v60 = vld [vmem:[%s12104_s1 + $0xf04] sm:$0xf]  ;;  %v7268_v1 = vld [vmem:[%s12104_s1 + $0xfcc] sm:$0xf0]  ;;  %v5330_v47 = vld [vmem:[%s12104_s1 + $0x98] sm:$0xf] }
 0x16b   :  { %4582 = vmatpush.bf16.msrb.mxu3 %v7535_v6  ;;  %v8166_v6 = vld [vmem:[%s12104_s1 + $0xf34] sm:$0xf]  ;;  %v8208_v2 = vld [vmem:[%s12104_s1 + $0x1084] sm:$0xf] }
 0x16c   :  { %4544 = vmatpush.bf16.msrb.mxu0 %v7235_v53  ;;  %v8214_v53 = vld [vmem:[%s12104_s1 + $0x10b4] sm:$0xf]  ;;  %v7199_v27 = vor.u32 %v8166_v6, %v7196_v8  ;;  %v7460_v6 = vld [vmem:[%s12104_s1 + $0x114c] sm:$0xf0] }
 0x16d   :  { %4557 = vmatpush.bf16.msrb.mxu1 %v7331_v21  ;;  %v4318_v21 = vadd.f32 %v4317_v10, %v4305_v3  ;;  %v7391_v40 = vor.u32 %v8214_v53, %v7388_v17  ;;  %v7703_v10 = vld [vmem:[%s12104_s1 + $0xb8] sm:$0xf0]  ;;  %v5534_v17 = vld [vmem:[%s12104_s1 + $0x230] sm:$0xf] }
 0x16e   :  { %4570 = vmatpush.bf16.msrb.mxu2 %v7427_v14  ;;  %v4330_v14 = vpop.f32.mrf.mxu3  ;;  %v7727_v53 = vld [vmem:[%s12104_s1 + $0x178] sm:$0xf0] }
 0x16f   :  { %4583 = vmatpush.bf16.msrb.mxu3 %v7523_v34  ;;  %v10743_v32 = vadd.f32 %v4330_v14, %v4318_v21  ;;  %v4293_v34 = vpop.f32.mrf.mxu0  ;;  %v7751_v21 = vld [vmem:[%s12104_s1 + $0x238] sm:$0xf0]  ;;  %v7271_v14 = vor.u32 %v8184_v63, %v7268_v1  ;;  %v5414_v63 = vld [vmem:[%s12104_s1 + $0x140] sm:$0xf] }
 0x170   :  { %4545 = vmatpush.bf16.msrb.mxu0 %v7223_v39  ;;  %v4306_v39 = vpop.f32.mrf.mxu1  ;;  %v4319_v3 = vpop.f32.mrf.mxu2  ;;  %v5535_v43 = vor.u32 %v7751_v21, %v5534_v17  ;;  %v7718_v17 = vld [vmem:[%s12104_s1 + $0x130] sm:$0xf0]  ;;  %v5498_v21 = vld [vmem:[%s12104_s1 + $0x1e8] sm:$0xf] }
 0x171   :  { %4558 = vmatpush.bf16.msrb.mxu1 %v7319_v51  ;;  %v7280_v51 = vld [vmem:[%s12104_s1 + $0xfe4] sm:$0xf0]  ;;  %v5426_v39 = vld [vmem:[%s12104_s1 + $0x158] sm:$0xf]  ;;  %v5510_v3 = vld [vmem:[%s12104_s1 + $0x200] sm:$0xf] }
 0x172   :  { %4571 = vmatpush.bf16.msrb.mxu2 %v7415_v54  ;;  %v8211_v54 = vld [vmem:[%s12104_s1 + $0x109c] sm:$0xf]  ;;  %v7283_v55 = vor.u32 %v8187_v48, %v7280_v51  ;;  %v7700_v48 = vld [vmem:[%s12104_s1 + $0xa0] sm:$0xf0] }
 0x173   :  { %4584 = vmatpush.bf16.msrb.mxu3 %v7511_v61  ;;  %v7172_v61 = vld [vmem:[%s12104_s1 + $0xf0c] sm:$0xf0]  ;;  %v7379_v62 = vor.u32 %v8211_v54, %v7376_v56  ;;  %v7724_v51 = vld [vmem:[%s12104_s1 + $0x160] sm:$0xf0]  ;;  %v5522_v54 = vld [vmem:[%s12104_s1 + $0x218] sm:$0xf] }
 0x174   :  { %4546 = vmatpush.bf16.msrb.mxu0 %v7211_v4  ;;  %v7475_v4 = vor.u32 %v8235_v57, %v7472_v58  ;;  %v7175_v15 = vor.u32 %v8160_v60, %v7172_v61  ;;  %v7748_v56 = vld [vmem:[%s12104_s1 + $0x220] sm:$0xf0]  ;;  %v5618_v57 = vld [vmem:[%s12104_s1 + $0x2d8] sm:$0xf]  ;;  %v5427_v60 = vor.u32 %v7724_v51, %v5426_v39 }
 0x175   :  { %4559 = vmatpush.bf16.msrb.mxu1 %v7307_v0  ;;  %v7364_v0 = vld [vmem:[%s12104_s1 + $0x108c] sm:$0xf0]  ;;  %v7772_v58 = vld [vmem:[%s12104_s1 + $0x2e0] sm:$0xf0]  ;;  %v5523_v61 = vor.u32 %v7748_v56, %v5522_v54  ;;  %v7715_v54 = vld [vmem:[%s12104_s1 + $0x118] sm:$0xf0] }
 0x176   :  { %4572 = vmatpush.bf16.msrb.mxu2 %v7403_v5  ;;  %v8232_v5 = vld [vmem:[%s12104_s1 + $0x1144] sm:$0xf]  ;;  %v4332_v8 = vpop.f32.mrf.mxu3  ;;  %v7367_v24 = vor.u32 %v8208_v2, %v7364_v0  ;;  %v5619_v1 = vor.u32 %v7772_v58, %v5618_v57  ;;  %v7721_v2 = vld [vmem:[%s12104_s1 + $0x148] sm:$0xf0]  ;;  %v5606_v0 = vld [vmem:[%s12104_s1 + $0x2c0] sm:$0xf] }
 0x177   :  { %4585 = vmatpush.bf16.msrb.mxu3 %v7499_v13  ;;  %v5438_v13 = vld [vmem:[%s12104_s1 + $0x170] sm:$0xf]  ;;  %v7463_v34 = vor.u32 %v8232_v5, %v7460_v6  ;;  %v7769_v5 = vld [vmem:[%s12104_s1 + $0x2c8] sm:$0xf0]  ;;  %v5415_v8 = vor.u32 %v7721_v2, %v5414_v63  ;;  %v7739_v57 = vld [vmem:[%s12104_s1 + $0x1d8] sm:$0xf0] }
 0x178   :  { %4547 = vmatpush.bf16.msrb.mxu0 %v7199_v27  ;;  %v7775_v27 = vld [vmem:[%s12104_s1 + $0x2f8] sm:$0xf0]  ;;  %v5486_v56 = vld [vmem:[%s12104_s1 + $0x1d0] sm:$0xf]  ;;  %v7688_v63 = vld [vmem:[%s12104_s1 + $0x40] sm:$0xf0] }
 0x179   :  { %4560 = vmatpush.bf16.msrb.mxu1 %v7295_v36  ;;  %v5343_v36 = vor.u32 %v7703_v10, %v5342_v9  ;;  %v5306_v10 = vld [vmem:[%s12104_s1 + $0x68] sm:$0xf]  ;;  %v5582_v58 = vld [vmem:[%s12104_s1 + $0x290] sm:$0xf] }
 0x17a   :  { %4573 = vmatpush.bf16.msrb.mxu2 %v7391_v40  ;;  %v5439_v40 = vor.u32 %v7727_v53, %v5438_v13  ;;  %v7694_v13 = vld [vmem:[%s12104_s1 + $0x70] sm:$0xf0]  ;;  %v5607_v53 = vor.u32 %v7769_v5, %v5606_v0  ;;  %v5474_v0 = vld [vmem:[%s12104_s1 + $0x1b8] sm:$0xf]  ;;  %v7736_v5 = vld [vmem:[%s12104_s1 + $0x1c0] sm:$0xf0] }
 0x17b   :  { %4586 = vmatpush.bf16.msrb.mxu3 %v7487_v50  ;;  %v5631_v50 = vor.u32 %v7775_v27, %v5630_v26  ;;  %v7766_v26 = vld [vmem:[%s12104_s1 + $0x2b0] sm:$0xf0]  ;;  %v5307_v27 = vor.u32 %v7694_v13, %v5306_v10  ;;  %v7760_v10 = vld [vmem:[%s12104_s1 + $0x280] sm:$0xf0] }
 0x17c   :  { %4548 = vmatpush.bf16.msrb.mxu0 %v7187_v59  ;;  %v5331_v59 = vor.u32 %v7700_v48, %v5330_v47  ;;  %v7691_v47 = vld [vmem:[%s12104_s1 + $0x58] sm:$0xf0]  ;;  %v5390_v48 = vld [vmem:[%s12104_s1 + $0x110] sm:$0xf] }
 0x17d   :  { %4561 = vmatpush.bf16.msrb.mxu1 %v7283_v55  ;;  %v5318_v55 = vld [vmem:[%s12104_s1 + $0x80] sm:$0xf] }
 0x17e   :  { %4574 = vmatpush.bf16.msrb.mxu2 %v7379_v62  ;;  %v7697_v62 = vld [vmem:[%s12104_s1 + $0x88] sm:$0xf0] }
 0x17f   :  { %4587 = vmatpush.bf16.msrb.mxu3 %v7475_v4  ;;  %v7745_v4 = vld [vmem:[%s12104_s1 + $0x208] sm:$0xf0]  ;;  %v5319_v6 = vor.u32 %v7697_v62, %v5318_v55  ;;  %v5487_v55 = vor.u32 %v7739_v57, %v5486_v56  ;;  %v5282_v62 = vld [vmem:[%s12104_s1 + $0x38] sm:$0xf]  ;;  %v5354_v57 = vld [vmem:[%s12104_s1 + $0xc8] sm:$0xf] }
 0x180   :  { %4549 = vmatpush.bf16.msrb.mxu0 %v7175_v15  ;;  %v5511_v9 = vor.u32 %v7745_v4, %v5510_v3  ;;  %v5402_v15 = vld [vmem:[%s12104_s1 + $0x128] sm:$0xf]  ;;  %v7712_v4 = vld [vmem:[%s12104_s1 + $0x100] sm:$0xf0]  ;;  %v5283_v13 = vor.u32 %v7688_v63, %v5282_v62  ;;  %v7754_v62 = vld [vmem:[%s12104_s1 + $0x250] sm:$0xf0] }
 0x181   :  { %4562 = vmatpush.bf16.msrb.mxu1 %v7271_v14  ;;  %v7742_v14 = vld [vmem:[%s12104_s1 + $0x1f0] sm:$0xf0] }
 0x182   :  { %4575 = vmatpush.bf16.msrb.mxu2 %v7367_v24  ;;  %v5594_v24 = vld [vmem:[%s12104_s1 + $0x2a8] sm:$0xf] }
 0x183   :  { %4588 = vmatpush.bf16.msrb.mxu3 %v7463_v34  ;;  %4550 = vmatmul.bf16.vlgmr.msrb.gmra.mxu0 %v9622_v7  ;;  %v4343_v34 = vpop.f32.mrf.mxu0  ;;  %v5595_v51 = vor.u32 %v7766_v26, %v5594_v24  ;;  %v7685_v24 = vld [vmem:[%s12104_s1 + $0x28] sm:$0xf0]  ;;  %v5366_v26 = vld [vmem:[%s12104_s1 + $0xe0] sm:$0xf] }
 0x184   :  { %4594 = vmatpush.bf16.msra.mxu0 %v5343_v36  ;;  %4563 = vmatmul.bf16.vlgmr.msrb.gmra.mxu1 %v9635_v12  ;;  %v5403_v36 = vor.u32 %v7718_v17, %v5402_v15  ;;  %v4344_v39 = vadd.f32 %v4343_v34, %v10743_v32  ;;  %v7763_v32 = vld [vmem:[%s12104_s1 + $0x298] sm:$0xf0] }
 0x185   :  { %4607 = vmatpush.bf16.msra.mxu1 %v5439_v40  ;;  %4576 = vmatmul.bf16.vlgmr.msrb.gmra.mxu2 %v9633_v11  ;;  %v5499_v40 = vor.u32 %v7742_v14, %v5498_v21  ;;  %v5583_v3 = vor.u32 %v7763_v32, %v5582_v58  ;;  %v5475_v21 = vor.u32 %v7736_v5, %v5474_v0  ;;  %v5270_v14 = vld [vmem:[%s12104_s1 + $0x20] sm:$0xf]  ;;  %v7706_v58 = vld [vmem:[%s12104_s1 + $0xd0] sm:$0xf0]  ;;  %v5450_v32 = vld [vmem:[%s12104_s1 + $0x188] sm:$0xf] }
 0x186   :  { %4620 = vmatpush.bf16.msra.mxu2 %v5535_v43  ;;  %4589 = vmatmul.bf16.vlgmr.msrb.gmra.mxu3 %v9643_v16  ;;  %v5294_v43 = vld [vmem:[%s12104_s1 + $0x50] sm:$0xf]  ;;  %v7823_v0 = vld [vmem:[%s12104_s1 + $0x478] sm:$0xf0] }
 0x187   :  { %4633 = vmatpush.bf16.msra.mxu3 %v5631_v50  ;;  %v4356_v50 = vpop.f32.mrf.mxu1  ;;  %v5918_v5 = vld [vmem:[%s12104_s1 + $0x530] sm:$0xf] }
 0x188   :  { %4595 = vmatpush.bf16.msra.mxu0 %v5331_v59  ;;  %v4357_v59 = vadd.f32 %v4356_v50, %v4344_v39  ;;  %v4369_v2 = vpop.f32.mrf.mxu2  ;;  %v5271_v39 = vor.u32 %v7685_v24, %v5270_v14  ;;  %v5258_v50 = vld [vmem:[%s12104_s1 + $0x8] sm:$0xf]  ;;  %v5714_v24 = vld [vmem:[%s12104_s1 + $0x398] sm:$0xf] }
 0x189   :  { %4608 = vmatpush.bf16.msra.mxu1 %v5427_v60  ;;  %v5295_v60 = vor.u32 %v7691_v47, %v5294_v43  ;;  %v7733_v43 = vld [vmem:[%s12104_s1 + $0x1a8] sm:$0xf0]  ;;  %v5558_v47 = vld [vmem:[%s12104_s1 + $0x260] sm:$0xf] }
 0x18a   :  { %4621 = vmatpush.bf16.msra.mxu2 %v5523_v61  ;;  %v5391_v61 = vor.u32 %v7715_v54, %v5390_v48  ;;  %v7757_v48 = vld [vmem:[%s12104_s1 + $0x268] sm:$0xf0] }
 0x18b   :  { %4634 = vmatpush.bf16.msra.mxu3 %v5619_v1  ;;  %v5378_v1 = vld [vmem:[%s12104_s1 + $0xf8] sm:$0xf] }
 0x18c   :  { %4596 = vmatpush.bf16.msra.mxu0 %v5319_v6  ;;  %v4370_v6 = vadd.f32 %v4369_v2, %v4357_v59  ;;  %v5379_v17 = vor.u32 %v7712_v4, %v5378_v1  ;;  %v5726_v1 = vld [vmem:[%s12104_s1 + $0x3b0] sm:$0xf]  ;;  %v7799_v2 = vld [vmem:[%s12104_s1 + $0x3b8] sm:$0xf0] }
 0x18d   :  { %4609 = vmatpush.bf16.msra.mxu1 %v5415_v8  ;;  %v4382_v8 = vpop.f32.mrf.mxu3 }
 0x18e   :  { %4622 = vmatpush.bf16.msra.mxu2 %v5511_v9  ;;  %v5570_v9 = vld [vmem:[%s12104_s1 + $0x278] sm:$0xf]  ;;  %v10942_v15 = vadd.f32 %v4382_v8, %v4370_v6  ;;  %v7847_v6 = vld [vmem:[%s12104_s1 + $0x538] sm:$0xf0]  ;;  %v5355_v8 = vor.u32 %v7706_v58, %v5354_v57  ;;  %v5798_v57 = vld [vmem:[%s12104_s1 + $0x440] sm:$0xf] }
 0x18f   :  { %4635 = vmatpush.bf16.msra.mxu3 %v5607_v53  ;;  %v4345_v53 = vpop.f32.mrf.mxu0  ;;  %v5571_v34 = vor.u32 %v7760_v10, %v5570_v9  ;;  %v6014_v10 = vld [vmem:[%s12104_s1 + $0x5f0] sm:$0xf]  ;;  %v5919_v14 = vor.u32 %v7847_v6, %v5918_v5  ;;  %v5978_v5 = vld [vmem:[%s12104_s1 + $0x5a8] sm:$0xf]  ;;  %v7862_v6 = vld [vmem:[%s12104_s1 + $0x5b0] sm:$0xf0] }
 0x190   :  { %4597 = vmatpush.bf16.msra.mxu0 %v5307_v27  ;;  %v4358_v27 = vpop.f32.mrf.mxu1  ;;  %v4371_v59 = vpop.f32.mrf.mxu2 }
 0x191   :  { %4610 = vmatpush.bf16.msra.mxu1 %v5403_v36  ;;  %v7709_v36 = vld [vmem:[%s12104_s1 + $0xe8] sm:$0xf0]  ;;  %v5810_v27 = vld [vmem:[%s12104_s1 + $0x458] sm:$0xf]  ;;  %v5894_v59 = vld [vmem:[%s12104_s1 + $0x500] sm:$0xf] }
 0x192   :  { %4623 = vmatpush.bf16.msra.mxu2 %v5499_v40  ;;  %v5462_v40 = vld [vmem:[%s12104_s1 + $0x1a0] sm:$0xf]  ;;  %v5367_v54 = vor.u32 %v7709_v36, %v5366_v26  ;;  %v7796_v26 = vld [vmem:[%s12104_s1 + $0x3a0] sm:$0xf0] }
 0x193   :  { %4636 = vmatpush.bf16.msra.mxu3 %v5595_v51  ;;  %v7682_v51 = vld [vmem:[%s12104_s1 + $0x10] sm:$0xf0]  ;;  %v5463_v56 = vor.u32 %v7733_v43, %v5462_v40  ;;  %v7820_v36 = vld [vmem:[%s12104_s1 + $0x460] sm:$0xf0]  ;;  %v5906_v40 = vld [vmem:[%s12104_s1 + $0x518] sm:$0xf] }
 0x194   :  { %4598 = vmatpush.bf16.msra.mxu0 %v5295_v60  ;;  %v5559_v60 = vor.u32 %v7757_v48, %v5558_v47  ;;  %v5259_v4 = vor.u32 %v7682_v51, %v5258_v50  ;;  %v7844_v43 = vld [vmem:[%s12104_s1 + $0x520] sm:$0xf0]  ;;  %v6002_v47 = vld [vmem:[%s12104_s1 + $0x5d8] sm:$0xf]  ;;  %v5811_v50 = vor.u32 %v7820_v36, %v5810_v27  ;;  %v5870_v27 = vld [vmem:[%s12104_s1 + $0x4d0] sm:$0xf] }
 0x195   :  { %4611 = vmatpush.bf16.msra.mxu1 %v5391_v61  ;;  %v7730_v61 = vld [vmem:[%s12104_s1 + $0x190] sm:$0xf0]  ;;  %v4384_v63 = vpop.f32.mrf.mxu3  ;;  %v7868_v48 = vld [vmem:[%s12104_s1 + $0x5e0] sm:$0xf0]  ;;  %v5907_v51 = vor.u32 %v7844_v43, %v5906_v40  ;;  %v5966_v36 = vld [vmem:[%s12104_s1 + $0x590] sm:$0xf] }
 0x196   :  { %4624 = vmatpush.bf16.msra.mxu2 %v5487_v55  ;;  %v5546_v55 = vld [vmem:[%s12104_s1 + $0x248] sm:$0xf]  ;;  %v5451_v9 = vor.u32 %v7730_v61, %v5450_v32  ;;  %v6003_v58 = vor.u32 %v7868_v48, %v6002_v47  ;;  %v7817_v32 = vld [vmem:[%s12104_s1 + $0x448] sm:$0xf0]  ;;  %v5990_v61 = vld [vmem:[%s12104_s1 + $0x5c0] sm:$0xf] }
 0x197   :  { %4637 = vmatpush.bf16.msra.mxu3 %v5583_v3  ;;  %v5822_v3 = vld [vmem:[%s12104_s1 + $0x470] sm:$0xf]  ;;  %v5547_v53 = vor.u32 %v7754_v62, %v5546_v55  ;;  %v7865_v55 = vld [vmem:[%s12104_s1 + $0x5c8] sm:$0xf0]  ;;  %v5799_v63 = vor.u32 %v7817_v32, %v5798_v57  ;;  %v7859_v40 = vld [vmem:[%s12104_s1 + $0x598] sm:$0xf0] }
 0x198   :  { %4599 = vmatpush.bf16.msra.mxu0 %v5283_v13  ;;  %v7871_v13 = vld [vmem:[%s12104_s1 + $0x5f8] sm:$0xf0]  ;;  %v7808_v57 = vld [vmem:[%s12104_s1 + $0x400] sm:$0xf0] }
 0x199   :  { %4612 = vmatpush.bf16.msra.mxu1 %v5379_v17  ;;  %v5727_v17 = vor.u32 %v7799_v2, %v5726_v1  ;;  %v5690_v1 = vld [vmem:[%s12104_s1 + $0x368] sm:$0xf]  ;;  %v7790_v2 = vld [vmem:[%s12104_s1 + $0x370] sm:$0xf0]  ;;  %v7832_v32 = vld [vmem:[%s12104_s1 + $0x4c0] sm:$0xf0] }
 0x19a   :  { %4625 = vmatpush.bf16.msra.mxu2 %v5475_v21  ;;  %v5823_v21 = vor.u32 %v7823_v0, %v5822_v3  ;;  %v5882_v3 = vld [vmem:[%s12104_s1 + $0x4e8] sm:$0xf] }
 0x19b   :  { %4638 = vmatpush.bf16.msra.mxu3 %v5571_v34  ;;  %v6015_v34 = vor.u32 %v7871_v13, %v6014_v10 }
 0x19c   :  { %4600 = vmatpush.bf16.msra.mxu0 %v5271_v39  ;;  %v5715_v39 = vor.u32 %v7796_v26, %v5714_v24  ;;  %v7811_v26 = vld [vmem:[%s12104_s1 + $0x418] sm:$0xf0] }
 0x19d   :  { %4613 = vmatpush.bf16.msra.mxu1 %v5367_v54  ;;  %v5702_v54 = vld [vmem:[%s12104_s1 + $0x380] sm:$0xf] }
 0x19e   :  { %4626 = vmatpush.bf16.msra.mxu2 %v5463_v56  ;;  %v7793_v56 = vld [vmem:[%s12104_s1 + $0x388] sm:$0xf0] }
 0x19f   :  { %4639 = vmatpush.bf16.msra.mxu3 %v5559_v60  ;;  %v7841_v60 = vld [vmem:[%s12104_s1 + $0x508] sm:$0xf0]  ;;  %v5703_v62 = vor.u32 %v7793_v56, %v5702_v54  ;;  %v5967_v54 = vor.u32 %v7859_v40, %v5966_v36  ;;  %v7850_v36 = vld [vmem:[%s12104_s1 + $0x550] sm:$0xf0] }
 0x1a0   :  { %4601 = vmatpush.bf16.msra.mxu0 %v5259_v4  ;;  %v7838_v4 = vld [vmem:[%s12104_s1 + $0x4f0] sm:$0xf0]  ;;  %v4395_v0 = vpop.f32.mrf.mxu0 }
 0x1a1   :  { %4614 = vmatpush.bf16.msra.mxu1 %v5355_v8  ;;  %v4396_v8 = vadd.f32 %v4395_v0, %v10942_v15  ;;  %v4408_v10 = vpop.f32.mrf.mxu1  ;;  %v5979_v15 = vor.u32 %v7862_v6, %v5978_v5  ;;  %v7805_v0 = vld [vmem:[%s12104_s1 + $0x3e8] sm:$0xf0]  ;;  %v5846_v5 = vld [vmem:[%s12104_s1 + $0x4a0] sm:$0xf] }
 0x1a2   :  { %4627 = vmatpush.bf16.msra.mxu2 %v5451_v9  ;;  %v5691_v9 = vor.u32 %v7790_v2, %v5690_v1  ;;  %v7829_v6 = vld [vmem:[%s12104_s1 + $0x4a8] sm:$0xf0] }
 0x1a3   :  { %4640 = vmatpush.bf16.msra.mxu3 %v5547_v53  ;;  %4602 = vmatmul.bf16.vlgmr.msra.gmra.mxu0 %v8632_v19  ;;  %v5786_v19 = vld [vmem:[%s12104_s1 + $0x428] sm:$0xf]  ;;  %v5883_v53 = vor.u32 %v7838_v4, %v5882_v3  ;;  %v4409_v24 = vadd.f32 %v4408_v10, %v4396_v8  ;;  %v5750_v3 = vld [vmem:[%s12104_s1 + $0x3e0] sm:$0xf] }
 0x1a4   :  { %4646 = vmatpush.bf16.msrb.mxu0 %v5727_v17  ;;  %4615 = vmatmul.bf16.vlgmr.msra.gmra.mxu1 %v8636_v22  ;;  %v7814_v22 = vld [vmem:[%s12104_s1 + $0x430] sm:$0xf0]  ;;  %v5678_v17 = vld [vmem:[%s12104_s1 + $0x350] sm:$0xf]  ;;  %v5942_v8 = vld [vmem:[%s12104_s1 + $0x560] sm:$0xf] }
 0x1a5   :  { %4659 = vmatpush.bf16.msrb.mxu1 %v5823_v21  ;;  %4628 = vmatmul.bf16.vlgmr.msra.gmra.mxu2 %v8630_v18  ;;  %v5895_v18 = vor.u32 %v7841_v60, %v5894_v59  ;;  %v5787_v13 = vor.u32 %v7814_v22, %v5786_v19  ;;  %v7787_v21 = vld [vmem:[%s12104_s1 + $0x358] sm:$0xf0]  ;;  %v7781_v22 = vld [vmem:[%s12104_s1 + $0x328] sm:$0xf0] }
 0x1a6   :  { %4672 = vmatpush.bf16.msrb.mxu2 %v5919_v14  ;;  %4641 = vmatmul.bf16.vlgmr.msra.gmra.mxu3 %v8634_v20  ;;  %v5991_v20 = vor.u32 %v7865_v55, %v5990_v61  ;;  %v5774_v14 = vld [vmem:[%s12104_s1 + $0x410] sm:$0xf]  ;;  %v5679_v43 = vor.u32 %v7787_v21, %v5678_v17  ;;  %v5954_v61 = vld [vmem:[%s12104_s1 + $0x578] sm:$0xf]  ;;  %v7856_v55 = vld [vmem:[%s12104_s1 + $0x580] sm:$0xf0]  ;;  %v5751_v17 = vor.u32 %v7805_v0, %v5750_v3 }
 0x1a7   :  { %4685 = vmatpush.bf16.msrb.mxu3 %v6015_v34  ;;  %v7835_v34 = vld [vmem:[%s12104_s1 + $0x4d8] sm:$0xf0]  ;;  %v5775_v47 = vor.u32 %v7811_v26, %v5774_v14  ;;  %v5955_v4 = vor.u32 %v7856_v55, %v5954_v61  ;;  %v5847_v21 = vor.u32 %v7829_v6, %v5846_v5  ;;  %v5738_v14 = vld [vmem:[%s12104_s1 + $0x3c8] sm:$0xf]  ;;  %v7940_v3 = vld [vmem:[%s12104_s1 + $0x820] sm:$0xf0] }
 0x1a8   :  { %4647 = vmatpush.bf16.msrb.mxu0 %v5715_v39  ;;  %v5871_v48 = vor.u32 %v7835_v34, %v5870_v27  ;;  %v5666_v39 = vld [vmem:[%s12104_s1 + $0x338] sm:$0xf]  ;;  %v4421_v56 = vpop.f32.mrf.mxu2  ;;  %v7826_v27 = vld [vmem:[%s12104_s1 + $0x490] sm:$0xf0]  ;;  %v5930_v34 = vld [vmem:[%s12104_s1 + $0x548] sm:$0xf] }
 0x1a9   :  { %4660 = vmatpush.bf16.msrb.mxu1 %v5811_v50  ;;  %v7784_v50 = vld [vmem:[%s12104_s1 + $0x340] sm:$0xf0]  ;;  %v4422_v59 = vadd.f32 %v4421_v56, %v4409_v24  ;;  %v4434_v60 = vpop.f32.mrf.mxu3  ;;  %v5834_v24 = vld [vmem:[%s12104_s1 + $0x488] sm:$0xf]  ;;  %v7943_v56 = vld [vmem:[%s12104_s1 + $0x838] sm:$0xf0] }
 0x1aa   :  { %4673 = vmatpush.bf16.msrb.mxu2 %v5907_v51  ;;  %v5762_v51 = vld [vmem:[%s12104_s1 + $0x3f8] sm:$0xf]  ;;  %v7964_v0 = vld [vmem:[%s12104_s1 + $0x8e0] sm:$0xf0] }
 0x1ab   :  { %4686 = vmatpush.bf16.msrb.mxu3 %v6003_v58  ;;  %v5858_v58 = vld [vmem:[%s12104_s1 + $0x4b8] sm:$0xf]  ;;  %v11141_v1 = vadd.f32 %v4434_v60, %v4422_v59  ;;  %v5763_v2 = vor.u32 %v7808_v57, %v5762_v51  ;;  %v7919_v51 = vld [vmem:[%s12104_s1 + $0x778] sm:$0xf0]  ;;  %v5931_v60 = vor.u32 %v7850_v36, %v5930_v34  ;;  %v6074_v34 = vld [vmem:[%s12104_s1 + $0x668] sm:$0xf] }
 0x1ac   :  { %4648 = vmatpush.bf16.msrb.mxu0 %v5703_v62  ;;  %v4397_v62 = vpop.f32.mrf.mxu0  ;;  %v5859_v19 = vor.u32 %v7832_v32, %v5858_v58  ;;  %v5835_v58 = vor.u32 %v7826_v27, %v5834_v24  ;;  %v6398_v32 = vld [vmem:[%s12104_s1 + $0x8f0] sm:$0xf]  ;;  %v7967_v59 = vld [vmem:[%s12104_s1 + $0x8f8] sm:$0xf0]  ;;  %v7886_v36 = vld [vmem:[%s12104_s1 + $0x670] sm:$0xf0] }
 0x1ad   :  { %4661 = vmatpush.bf16.msrb.mxu1 %v5799_v63  ;;  %v5667_v63 = vor.u32 %v7784_v50, %v5666_v39 }
 0x1ae   :  { %4674 = vmatpush.bf16.msrb.mxu2 %v5895_v18  ;;  %v4410_v18 = vpop.f32.mrf.mxu1 }
 0x1af   :  { %4687 = vmatpush.bf16.msrb.mxu3 %v5991_v20  ;;  %v5654_v20 = vld [vmem:[%s12104_s1 + $0x320] sm:$0xf]  ;;  %v7892_v18 = vld [vmem:[%s12104_s1 + $0x6a0] sm:$0xf0] }
 0x1b0   :  { %4649 = vmatpush.bf16.msrb.mxu0 %v5691_v9  ;;  %v7853_v9 = vld [vmem:[%s12104_s1 + $0x568] sm:$0xf0]  ;;  %v5655_v10 = vor.u32 %v7781_v22, %v5654_v20  ;;  %v4423_v40 = vpop.f32.mrf.mxu2  ;;  %v7916_v20 = vld [vmem:[%s12104_s1 + $0x760] sm:$0xf0]  ;;  %v6290_v22 = vld [vmem:[%s12104_s1 + $0x818] sm:$0xf] }
 0x1b1   :  { %4662 = vmatpush.bf16.msrb.mxu1 %v5787_v13  ;;  %v5642_v13 = vld [vmem:[%s12104_s1 + $0x308] sm:$0xf]  ;;  %v5943_v26 = vor.u32 %v7853_v9, %v5942_v8  ;;  %v4436_v39 = vpop.f32.mrf.mxu3  ;;  %v6291_v8 = vor.u32 %v7940_v3, %v6290_v22  ;;  %v6086_v9 = vld [vmem:[%s12104_s1 + $0x680] sm:$0xf]  ;;  %v6050_v22 = vld [vmem:[%s12104_s1 + $0x638] sm:$0xf] }
 0x1b2   :  { %4675 = vmatpush.bf16.msrb.mxu2 %v5883_v53  ;;  %v7778_v53 = vld [vmem:[%s12104_s1 + $0x310] sm:$0xf0]  ;;  %v6266_v40 = vld [vmem:[%s12104_s1 + $0x7e8] sm:$0xf]  ;;  %v7880_v3 = vld [vmem:[%s12104_s1 + $0x640] sm:$0xf0] }
 0x1b3   :  { %4688 = vmatpush.bf16.msrb.mxu3 %v5979_v15  ;;  %v7802_v15 = vld [vmem:[%s12104_s1 + $0x3d0] sm:$0xf0]  ;;  %v5643_v50 = vor.u32 %v7778_v53, %v5642_v13  ;;  %v6182_v13 = vld [vmem:[%s12104_s1 + $0x740] sm:$0xf] }
 0x1b4   :  { %4650 = vmatpush.bf16.msrb.mxu0 %v5679_v43  ;;  %v6110_v43 = vld [vmem:[%s12104_s1 + $0x6b0] sm:$0xf]  ;;  %v5739_v57 = vor.u32 %v7802_v15, %v5738_v14  ;;  %v7937_v14 = vld [vmem:[%s12104_s1 + $0x808] sm:$0xf0]  ;;  %v6374_v15 = vld [vmem:[%s12104_s1 + $0x8c0] sm:$0xf] }
 0x1b5   :  { %4663 = vmatpush.bf16.msrb.mxu1 %v5775_v47  ;;  %v7895_v47 = vld [vmem:[%s12104_s1 + $0x6b8] sm:$0xf0]  ;;  %v7958_v39 = vld [vmem:[%s12104_s1 + $0x8b0] sm:$0xf0] }
 0x1b6   :  { %4676 = vmatpush.bf16.msrb.mxu2 %v5871_v48  ;;  %v6206_v48 = vld [vmem:[%s12104_s1 + $0x770] sm:$0xf]  ;;  %v6111_v61 = vor.u32 %v7895_v47, %v6110_v43  ;;  %v7934_v43 = vld [vmem:[%s12104_s1 + $0x7f0] sm:$0xf0] }
 0x1b7   :  { %4689 = vmatpush.bf16.msrb.mxu3 %v5967_v54  ;;  %v6302_v54 = vld [vmem:[%s12104_s1 + $0x830] sm:$0xf]  ;;  %v6207_v55 = vor.u32 %v7919_v51, %v6206_v48  ;;  %v6362_v48 = vld [vmem:[%s12104_s1 + $0x8a8] sm:$0xf]  ;;  %v6075_v51 = vor.u32 %v7886_v36, %v6074_v34  ;;  %v7877_v34 = vld [vmem:[%s12104_s1 + $0x628] sm:$0xf0] }
 0x1b8   :  { %4651 = vmatpush.bf16.msrb.mxu0 %v5667_v63  ;;  %v6303_v62 = vor.u32 %v7943_v56, %v6302_v54  ;;  %v6098_v63 = vld [vmem:[%s12104_s1 + $0x698] sm:$0xf]  ;;  %v6134_v36 = vld [vmem:[%s12104_s1 + $0x6e0] sm:$0xf] }
 0x1b9   :  { %4664 = vmatpush.bf16.msrb.mxu1 %v5763_v2  ;;  %v6194_v2 = vld [vmem:[%s12104_s1 + $0x758] sm:$0xf]  ;;  %v6099_v5 = vor.u32 %v7892_v18, %v6098_v63  ;;  %v6350_v63 = vld [vmem:[%s12104_s1 + $0x890] sm:$0xf]  ;;  %v7955_v18 = vld [vmem:[%s12104_s1 + $0x898] sm:$0xf0] }
 0x1ba   :  { %4677 = vmatpush.bf16.msrb.mxu2 %v5859_v19  ;;  %v6399_v19 = vor.u32 %v7967_v59, %v6398_v32  ;;  %v6195_v6 = vor.u32 %v7916_v20, %v6194_v2  ;;  %v7883_v32 = vld [vmem:[%s12104_s1 + $0x658] sm:$0xf0]  ;;  %v6158_v59 = vld [vmem:[%s12104_s1 + $0x710] sm:$0xf] }
 0x1bb   :  { %4690 = vmatpush.bf16.msrb.mxu3 %v5955_v4  ;;  %v6386_v4 = vld [vmem:[%s12104_s1 + $0x8d8] sm:$0xf] }
 0x1bc   :  { %4652 = vmatpush.bf16.msrb.mxu0 %v5655_v10  ;;  %v7889_v10 = vld [vmem:[%s12104_s1 + $0x688] sm:$0xf0]  ;;  %v6387_v53 = vor.u32 %v7964_v0, %v6386_v4  ;;  %v6146_v4 = vld [vmem:[%s12104_s1 + $0x6f8] sm:$0xf]  ;;  %v6351_v0 = vor.u32 %v7955_v18, %v6350_v63  ;;  %v6590_v63 = vld [vmem:[%s12104_s1 + $0xa70] sm:$0xf] }
 0x1bd   :  { %4665 = vmatpush.bf16.msrb.mxu1 %v5751_v17  ;;  %v7913_v17 = vld [vmem:[%s12104_s1 + $0x748] sm:$0xf0]  ;;  %v6087_v24 = vor.u32 %v7889_v10, %v6086_v9  ;;  %v7928_v9 = vld [vmem:[%s12104_s1 + $0x7c0] sm:$0xf0] }
 0x1be   :  { %4678 = vmatpush.bf16.msrb.mxu2 %v5847_v21  ;;  %v6278_v21 = vld [vmem:[%s12104_s1 + $0x800] sm:$0xf] }
 0x1bf   :  { %4691 = vmatpush.bf16.msrb.mxu3 %v5943_v26  ;;  %v6183_v26 = vor.u32 %v7913_v17, %v6182_v13  ;;  %v6279_v27 = vor.u32 %v7937_v14, %v6278_v21  ;;  %v7952_v17 = vld [vmem:[%s12104_s1 + $0x880] sm:$0xf0]  ;;  %v6051_v14 = vor.u32 %v7880_v3, %v6050_v22  ;;  %v8039_v22 = vld [vmem:[%s12104_s1 + $0xb38] sm:$0xf0] }
 0x1c0   :  { %4653 = vmatpush.bf16.msrb.mxu0 %v5643_v50  ;;  %v4447_v47 = vpop.f32.mrf.mxu0 }
 0x1c1   :  { %4666 = vmatpush.bf16.msrb.mxu1 %v5739_v57  ;;  %v4448_v50 = vadd.f32 %v4447_v47, %v11141_v1  ;;  %v4460_v54 = vpop.f32.mrf.mxu1  ;;  %v6267_v57 = vor.u32 %v7934_v43, %v6266_v40  ;;  %v6363_v1 = vor.u32 %v7958_v39, %v6362_v48  ;;  %v7925_v40 = vld [vmem:[%s12104_s1 + $0x7a8] sm:$0xf0]  ;;  %v6326_v43 = vld [vmem:[%s12104_s1 + $0x860] sm:$0xf]  ;;  %v6026_v39 = vld [vmem:[%s12104_s1 + $0x608] sm:$0xf] }
 0x1c2   :  { %4679 = vmatpush.bf16.msrb.mxu2 %v5835_v58  ;;  %v6062_v58 = vld [vmem:[%s12104_s1 + $0x650] sm:$0xf]  ;;  %v7949_v47 = vld [vmem:[%s12104_s1 + $0x868] sm:$0xf0] }
 0x1c3   :  { %4692 = vmatpush.bf16.msrb.mxu3 %v5931_v60  ;;  %4654 = vmatmul.bf16.vlgmr.msrb.gmra.mxu0 %v8794_v41  ;;  %v6170_v41 = vld [vmem:[%s12104_s1 + $0x728] sm:$0xf]  ;;  %v4461_v60 = vadd.f32 %v4460_v54, %v4448_v50  ;;  %v6063_v2 = vor.u32 %v7883_v32, %v6062_v58  ;;  %v7874_v50 = vld [vmem:[%s12104_s1 + $0x610] sm:$0xf0]  ;;  %v6327_v32 = vor.u32 %v7949_v47, %v6326_v43  ;;  %v8009_v47 = vld [vmem:[%s12104_s1 + $0xa48] sm:$0xf0] }
 0x1c4   :  { %4698 = vmatpush.bf16.msra.mxu0 %v6111_v61  ;;  %4667 = vmatmul.bf16.vlgmr.msrb.gmra.mxu1 %v8798_v44  ;;  %v7910_v44 = vld [vmem:[%s12104_s1 + $0x730] sm:$0xf0]  ;;  %v7907_v61 = vld [vmem:[%s12104_s1 + $0x718] sm:$0xf0]  ;;  %v6218_v58 = vld [vmem:[%s12104_s1 + $0x788] sm:$0xf] }
 0x1c5   :  { %4711 = vmatpush.bf16.msra.mxu1 %v6207_v55  ;;  %4680 = vmatmul.bf16.vlgmr.msrb.gmra.mxu2 %v8786_v38  ;;  %v7961_v38 = vld [vmem:[%s12104_s1 + $0x8c8] sm:$0xf0]  ;;  %v6171_v56 = vor.u32 %v7910_v44, %v6170_v41  ;;  %v6254_v55 = vld [vmem:[%s12104_s1 + $0x7d0] sm:$0xf]  ;;  %v6230_v44 = vld [vmem:[%s12104_s1 + $0x7a0] sm:$0xf] }
 0x1c6   :  { %4724 = vmatpush.bf16.msra.mxu2 %v6303_v62  ;;  %4693 = vmatmul.bf16.vlgmr.msrb.gmra.mxu3 %v8796_v42  ;;  %v6375_v42 = vor.u32 %v7961_v38, %v6374_v15  ;;  %v7931_v62 = vld [vmem:[%s12104_s1 + $0x7d8] sm:$0xf0]  ;;  %v6231_v54 = vor.u32 %v7925_v40, %v6230_v44  ;;  %v7985_v44 = vld [vmem:[%s12104_s1 + $0x988] sm:$0xf0]  ;;  %v6566_v40 = vld [vmem:[%s12104_s1 + $0xa40] sm:$0xf] }
 0x1c7   :  { %4737 = vmatpush.bf16.msra.mxu3 %v6399_v19  ;;  %v6159_v19 = vor.u32 %v7907_v61, %v6158_v59  ;;  %v6255_v20 = vor.u32 %v7931_v62, %v6254_v55  ;;  %v7922_v59 = vld [vmem:[%s12104_s1 + $0x790] sm:$0xf0]  ;;  %v6494_v55 = vld [vmem:[%s12104_s1 + $0x9b0] sm:$0xf]  ;;  %v7991_v62 = vld [vmem:[%s12104_s1 + $0x9b8] sm:$0xf0] }
 0x1c8   :  { %4699 = vmatpush.bf16.msra.mxu0 %v6099_v5  ;;  %v4473_v5 = vpop.f32.mrf.mxu2  ;;  %v4449_v21 = vpop.f32.mrf.mxu0 }
 0x1c9   :  { %4712 = vmatpush.bf16.msra.mxu1 %v6195_v6  ;;  %v7904_v6 = vld [vmem:[%s12104_s1 + $0x700] sm:$0xf0]  ;;  %v4474_v10 = vadd.f32 %v4473_v5, %v4461_v60  ;;  %v4486_v13 = vpop.f32.mrf.mxu3  ;;  %v4462_v15 = vpop.f32.mrf.mxu1  ;;  %v7946_v60 = vld [vmem:[%s12104_s1 + $0x850] sm:$0xf0]  ;;  %v8063_v5 = vld [vmem:[%s12104_s1 + $0xbf8] sm:$0xf0] }
 0x1ca   :  { %4725 = vmatpush.bf16.msra.mxu2 %v6291_v8  ;;  %v6242_v8 = vld [vmem:[%s12104_s1 + $0x7b8] sm:$0xf] }
 0x1cb   :  { %4738 = vmatpush.bf16.msra.mxu3 %v6387_v53  ;;  %v6338_v53 = vld [vmem:[%s12104_s1 + $0x878] sm:$0xf]  ;;  %v11340_v38 = vadd.f32 %v4486_v13, %v4474_v10 }
 0x1cc   :  { %4700 = vmatpush.bf16.msra.mxu0 %v6087_v24  ;;  %v6147_v24 = vor.u32 %v7904_v6, %v6146_v4  ;;  %v6339_v41 = vor.u32 %v7952_v17, %v6338_v53  ;;  %v6219_v4 = vor.u32 %v7922_v59, %v6218_v58  ;;  %v6482_v13 = vld [vmem:[%s12104_s1 + $0x998] sm:$0xf]  ;;  %v7988_v53 = vld [vmem:[%s12104_s1 + $0x9a0] sm:$0xf0]  ;;  %v8006_v58 = vld [vmem:[%s12104_s1 + $0xa30] sm:$0xf0] }
 0x1cd   :  { %4713 = vmatpush.bf16.msra.mxu1 %v6183_v26  ;;  %v6243_v26 = vor.u32 %v7928_v9, %v6242_v8  ;;  %v6495_v8 = vor.u32 %v7991_v62, %v6494_v55  ;;  %v6578_v17 = vld [vmem:[%s12104_s1 + $0xa58] sm:$0xf]  ;;  %v8030_v59 = vld [vmem:[%s12104_s1 + $0xaf0] sm:$0xf0] }
 0x1ce   :  { %4726 = vmatpush.bf16.msra.mxu2 %v6279_v27  ;;  %v6038_v27 = vld [vmem:[%s12104_s1 + $0x620] sm:$0xf]  ;;  %v6674_v15 = vld [vmem:[%s12104_s1 + $0xb18] sm:$0xf] }
 0x1cf   :  { %4739 = vmatpush.bf16.msra.mxu3 %v6375_v42  ;;  %v7901_v42 = vld [vmem:[%s12104_s1 + $0x6e8] sm:$0xf0]  ;;  %v6039_v48 = vor.u32 %v7877_v34, %v6038_v27  ;;  %v8060_v27 = vld [vmem:[%s12104_s1 + $0xbe0] sm:$0xf0]  ;;  %v6483_v34 = vor.u32 %v7988_v53, %v6482_v13  ;;  %v6434_v53 = vld [vmem:[%s12104_s1 + $0x938] sm:$0xf] }
 0x1d0   :  { %4701 = vmatpush.bf16.msra.mxu0 %v6075_v51  ;;  %v6135_v51 = vor.u32 %v7901_v42, %v6134_v36  ;;  %v4475_v61 = vpop.f32.mrf.mxu2  ;;  %v6470_v42 = vld [vmem:[%s12104_s1 + $0x980] sm:$0xf] }
 0x1d1   :  { %4714 = vmatpush.bf16.msra.mxu1 %v6171_v56  ;;  %v6122_v56 = vld [vmem:[%s12104_s1 + $0x6c8] sm:$0xf]  ;;  %v4488_v18 = vpop.f32.mrf.mxu3  ;;  %v8054_v61 = vld [vmem:[%s12104_s1 + $0xbb0] sm:$0xf0] }
 0x1d2   :  { %4727 = vmatpush.bf16.msra.mxu2 %v6267_v57  ;;  %v7898_v57 = vld [vmem:[%s12104_s1 + $0x6d0] sm:$0xf0] }
 0x1d3   :  { %4740 = vmatpush.bf16.msra.mxu3 %v6363_v1  ;;  %v6314_v1 = vld [vmem:[%s12104_s1 + $0x848] sm:$0xf]  ;;  %v6123_v3 = vor.u32 %v7898_v57, %v6122_v56 }
 0x1d4   :  { %4702 = vmatpush.bf16.msra.mxu0 %v6063_v2  ;;  %v6027_v2 = vor.u32 %v7874_v50, %v6026_v39  ;;  %v6315_v6 = vor.u32 %v7946_v60, %v6314_v1  ;;  %v8033_v39 = vld [vmem:[%s12104_s1 + $0xb08] sm:$0xf0]  ;;  %v6554_v57 = vld [vmem:[%s12104_s1 + $0xa28] sm:$0xf] }
 0x1d5   :  { %4715 = vmatpush.bf16.msra.mxu1 %v6159_v19  ;;  %v8015_v19 = vld [vmem:[%s12104_s1 + $0xa78] sm:$0xf0]  ;;  %v8057_v50 = vld [vmem:[%s12104_s1 + $0xbc8] sm:$0xf0]  ;;  %v6746_v60 = vld [vmem:[%s12104_s1 + $0xba8] sm:$0xf]  ;;  %v6555_v18 = vor.u32 %v8006_v58, %v6554_v57 }
 0x1d6   :  { %4728 = vmatpush.bf16.msra.mxu2 %v6255_v20  ;;  %v6686_v20 = vld [vmem:[%s12104_s1 + $0xb30] sm:$0xf]  ;;  %v6591_v9 = vor.u32 %v8015_v19, %v6590_v63  ;;  %v6710_v57 = vld [vmem:[%s12104_s1 + $0xb60] sm:$0xf] }
 0x1d7   :  { %4741 = vmatpush.bf16.msra.mxu3 %v6351_v0  ;;  %v6782_v0 = vld [vmem:[%s12104_s1 + $0xbf0] sm:$0xf]  ;;  %v6687_v10 = vor.u32 %v8039_v22, %v6686_v20  ;;  %v7979_v20 = vld [vmem:[%s12104_s1 + $0x958] sm:$0xf0] }
 0x1d8   :  { %4703 = vmatpush.bf16.msra.mxu0 %v6051_v14  ;;  %v6783_v21 = vor.u32 %v8063_v5, %v6782_v0  ;;  %v8012_v14 = vld [vmem:[%s12104_s1 + $0xa60] sm:$0xf0]  ;;  %v6446_v19 = vld [vmem:[%s12104_s1 + $0x950] sm:$0xf]  ;;  %v8027_v5 = vld [vmem:[%s12104_s1 + $0xad8] sm:$0xf0] }
 0x1d9   :  { %4716 = vmatpush.bf16.msra.mxu1 %v6147_v24  ;;  %v8036_v24 = vld [vmem:[%s12104_s1 + $0xb20] sm:$0xf0]  ;;  %v6579_v36 = vor.u32 %v8012_v14, %v6578_v17  ;;  %v6542_v22 = vld [vmem:[%s12104_s1 + $0xa10] sm:$0xf] }
 0x1da   :  { %4729 = vmatpush.bf16.msra.mxu2 %v6243_v26  ;;  %v6770_v26 = vld [vmem:[%s12104_s1 + $0xbd8] sm:$0xf]  ;;  %v6638_v0 = vld [vmem:[%s12104_s1 + $0xad0] sm:$0xf]  ;;  %v7976_v17 = vld [vmem:[%s12104_s1 + $0x940] sm:$0xf0] }
 0x1db   :  { %4742 = vmatpush.bf16.msra.mxu3 %v6339_v41  ;;  %v6675_v41 = vor.u32 %v8036_v24, %v6674_v15  ;;  %v6771_v43 = vor.u32 %v8060_v27, %v6770_v26  ;;  %v6639_v13 = vor.u32 %v8027_v5, %v6638_v0  ;;  %v8000_v24 = vld [vmem:[%s12104_s1 + $0xa00] sm:$0xf0]  ;;  %v6626_v26 = vld [vmem:[%s12104_s1 + $0xab8] sm:$0xf]  ;;  %v8111_v5 = vld [vmem:[%s12104_s1 + $0xd78] sm:$0xf0] }
 0x1dc   :  { %4704 = vmatpush.bf16.msra.mxu0 %v6039_v48  ;;  %v6662_v48 = vld [vmem:[%s12104_s1 + $0xb00] sm:$0xf]  ;;  %v8024_v27 = vld [vmem:[%s12104_s1 + $0xac0] sm:$0xf0] }
 0x1dd   :  { %4717 = vmatpush.bf16.msra.mxu1 %v6135_v51  ;;  %v6471_v51 = vor.u32 %v7985_v44, %v6470_v42  ;;  %v6663_v56 = vor.u32 %v8033_v39, %v6662_v48  ;;  %v8048_v42 = vld [vmem:[%s12104_s1 + $0xb80] sm:$0xf0]  ;;  %v6627_v39 = vor.u32 %v8024_v27, %v6626_v26  ;;  %v6962_v27 = vld [vmem:[%s12104_s1 + $0xd58] sm:$0xf] }
 0x1de   :  { %4730 = vmatpush.bf16.msra.mxu2 %v6231_v54  ;;  %v6567_v54 = vor.u32 %v8009_v47, %v6566_v40  ;;  %v6435_v40 = vor.u32 %v7976_v17, %v6434_v53  ;;  %v8159_v53 = vld [vmem:[%s12104_s1 + $0xef8] sm:$0xf0]  ;;  %v8084_v26 = vld [vmem:[%s12104_s1 + $0xca0] sm:$0xf0] }
 0x1df   :  { %4743 = vmatpush.bf16.msra.mxu3 %v6327_v32  ;;  %v6650_v32 = vld [vmem:[%s12104_s1 + $0xae8] sm:$0xf] }
 0x1e0   :  { %4705 = vmatpush.bf16.msra.mxu0 %v6027_v2  ;;  %v4499_v1 = vpop.f32.mrf.mxu0  ;;  %v6651_v2 = vor.u32 %v8030_v59, %v6650_v32  ;;  %v6410_v32 = vld [vmem:[%s12104_s1 + $0x908] sm:$0xf]  ;;  %v7970_v59 = vld [vmem:[%s12104_s1 + $0x910] sm:$0xf0] }
 0x1e1   :  { %4718 = vmatpush.bf16.msra.mxu1 %v6123_v3  ;;  %v4500_v55 = vadd.f32 %v4499_v1, %v11340_v38  ;;  %v4512_v63 = vpop.f32.mrf.mxu1  ;;  %v6747_v38 = vor.u32 %v8054_v61, %v6746_v60  ;;  %v6506_v61 = vld [vmem:[%s12104_s1 + $0x9c8] sm:$0xf]  ;;  %v6411_v0 = vor.u32 %v7970_v59, %v6410_v32 }
 0x1e2   :  { %4731 = vmatpush.bf16.msra.mxu2 %v6219_v4  ;;  %v8003_v4 = vld [vmem:[%s12104_s1 + $0xa18] sm:$0xf0]  ;;  %v6938_v59 = vld [vmem:[%s12104_s1 + $0xd28] sm:$0xf] }
 0x1e3   :  { %4744 = vmatpush.bf16.msra.mxu3 %v6315_v6  ;;  %4706 = vmatmul.bf16.vlgmr.msra.gmra.mxu0 %v8987_v25  ;;  %v6758_v25 = vld [vmem:[%s12104_s1 + $0xbc0] sm:$0xf]  ;;  %v4513_v3 = vadd.f32 %v4512_v63, %v4500_v55  ;;  %v6734_v6 = vld [vmem:[%s12104_s1 + $0xb90] sm:$0xf]  ;;  %v7994_v55 = vld [vmem:[%s12104_s1 + $0x9d0] sm:$0xf0] }
 0x1e4   :  { %4750 = vmatpush.bf16.msrb.mxu0 %v6495_v8  ;;  %4719 = vmatmul.bf16.vlgmr.msra.gmra.mxu1 %v9000_v30  ;;  %v7982_v30 = vld [vmem:[%s12104_s1 + $0x970] sm:$0xf0]  ;;  %v8051_v8 = vld [vmem:[%s12104_s1 + $0xb98] sm:$0xf0] }
 0x1e5   :  { %4763 = vmatpush.bf16.msrb.mxu1 %v6591_v9  ;;  %4732 = vmatmul.bf16.vlgmr.msra.gmra.mxu2 %v8998_v29  ;;  %v6458_v29 = vld [vmem:[%s12104_s1 + $0x968] sm:$0xf]  ;;  %v6447_v9 = vor.u32 %v7979_v20, %v6446_v19  ;;  %v6735_v14 = vor.u32 %v8051_v8, %v6734_v6  ;;  %v8042_v19 = vld [vmem:[%s12104_s1 + $0xb50] sm:$0xf0]  ;;  %v7070_v6 = vld [vmem:[%s12104_s1 + $0xe30] sm:$0xf] }
 0x1e6   :  { %4776 = vmatpush.bf16.msrb.mxu2 %v6687_v10  ;;  %4745 = vmatmul.bf16.vlgmr.msra.gmra.mxu3 %v9008_v33  ;;  %v6759_v33 = vor.u32 %v8057_v50, %v6758_v25  ;;  %v6459_v62 = vor.u32 %v7982_v30, %v6458_v29  ;;  %v6543_v10 = vor.u32 %v8003_v4, %v6542_v22  ;;  %v6422_v25 = vld [vmem:[%s12104_s1 + $0x920] sm:$0xf]  ;;  %v7973_v50 = vld [vmem:[%s12104_s1 + $0x928] sm:$0xf0]  ;;  %v6878_v22 = vld [vmem:[%s12104_s1 + $0xcb0] sm:$0xf] }
 0x1e7   :  { %4789 = vmatpush.bf16.msrb.mxu3 %v6783_v21  ;;  %v6530_v21 = vld [vmem:[%s12104_s1 + $0x9f8] sm:$0xf]  ;;  %v6614_v29 = vld [vmem:[%s12104_s1 + $0xaa0] sm:$0xf]  ;;  %v8021_v30 = vld [vmem:[%s12104_s1 + $0xaa8] sm:$0xf0]  ;;  %v6423_v58 = vor.u32 %v7973_v50, %v6422_v25 }
 0x1e8   :  { %4751 = vmatpush.bf16.msrb.mxu0 %v6483_v34  ;;  %v4525_v15 = vpop.f32.mrf.mxu2  ;;  %v4501_v44 = vpop.f32.mrf.mxu0  ;;  %v6531_v48 = vor.u32 %v8000_v24, %v6530_v21  ;;  %v6615_v60 = vor.u32 %v8021_v30, %v6614_v29  ;;  %v8135_v8 = vld [vmem:[%s12104_s1 + $0xe38] sm:$0xf0]  ;;  %v6866_v24 = vld [vmem:[%s12104_s1 + $0xc98] sm:$0xf]  ;;  %v6854_v25 = vld [vmem:[%s12104_s1 + $0xc80] sm:$0xf] }
 0x1e9   :  { %4764 = vmatpush.bf16.msrb.mxu1 %v6579_v36  ;;  %v4526_v34 = vadd.f32 %v4525_v15, %v4513_v3  ;;  %v4538_v36 = vpop.f32.mrf.mxu3  ;;  %v6974_v3 = vld [vmem:[%s12104_s1 + $0xd70] sm:$0xf]  ;;  %v7071_v15 = vor.u32 %v8135_v8, %v7070_v6  ;;  %v7154_v44 = vld [vmem:[%s12104_s1 + $0xed8] sm:$0xf]  ;;  %v8081_v50 = vld [vmem:[%s12104_s1 + $0xc88] sm:$0xf0] }
 0x1ea   :  { %4777 = vmatpush.bf16.msrb.mxu2 %v6675_v41  ;;  %v6722_v41 = vld [vmem:[%s12104_s1 + $0xb78] sm:$0xf]  ;;  %v7046_v29 = vld [vmem:[%s12104_s1 + $0xe00] sm:$0xf]  ;;  %v8129_v30 = vld [vmem:[%s12104_s1 + $0xe08] sm:$0xf0] }
 0x1eb   :  { %4790 = vmatpush.bf16.msrb.mxu3 %v6771_v43  ;;  %v4514_v43 = vpop.f32.mrf.mxu1  ;;  %v11539_v47 = vadd.f32 %v4538_v36, %v4526_v34  ;;  %v8108_v36 = vld [vmem:[%s12104_s1 + $0xd60] sm:$0xf0]  ;;  %v7047_v32 = vor.u32 %v8129_v30, %v7046_v29  ;;  %v7022_v6 = vld [vmem:[%s12104_s1 + $0xdd0] sm:$0xf]  ;;  %v8123_v8 = vld [vmem:[%s12104_s1 + $0xdd8] sm:$0xf0] }
 0x1ec   :  { %4752 = vmatpush.bf16.msrb.mxu0 %v6471_v51  ;;  %v6518_v51 = vld [vmem:[%s12104_s1 + $0x9e0] sm:$0xf]  ;;  %v6867_v43 = vor.u32 %v8084_v26, %v6866_v24 }
 0x1ed   :  { %4765 = vmatpush.bf16.msrb.mxu1 %v6567_v54  ;;  %v6723_v54 = vor.u32 %v8048_v42, %v6722_v41  ;;  %v7058_v41 = vld [vmem:[%s12104_s1 + $0xe18] sm:$0xf]  ;;  %v8132_v42 = vld [vmem:[%s12104_s1 + $0xe20] sm:$0xf0]  ;;  %v6902_v29 = vld [vmem:[%s12104_s1 + $0xce0] sm:$0xf] }
 0x1ee   :  { %4778 = vmatpush.bf16.msrb.mxu2 %v6663_v56  ;;  %v7997_v56 = vld [vmem:[%s12104_s1 + $0x9e8] sm:$0xf0] }
 0x1ef   :  { %4791 = vmatpush.bf16.msrb.mxu3 %v6759_v33  ;;  %v8045_v33 = vld [vmem:[%s12104_s1 + $0xb68] sm:$0xf0]  ;;  %v6519_v1 = vor.u32 %v7997_v56, %v6518_v51  ;;  %v6950_v51 = vld [vmem:[%s12104_s1 + $0xd40] sm:$0xf] }
 0x1f0   :  { %4753 = vmatpush.bf16.msrb.mxu0 %v6459_v62  ;;  %v6602_v62 = vld [vmem:[%s12104_s1 + $0xa88] sm:$0xf]  ;;  %v6711_v63 = vor.u32 %v8045_v33, %v6710_v57  ;;  %v4527_v20 = vpop.f32.mrf.mxu2  ;;  %v8105_v56 = vld [vmem:[%s12104_s1 + $0xd48] sm:$0xf0]  ;;  %v6855_v33 = vor.u32 %v8081_v50, %v6854_v25 }
 0x1f1   :  { %4766 = vmatpush.bf16.msrb.mxu1 %v6555_v18  ;;  %v8018_v18 = vld [vmem:[%s12104_s1 + $0xa90] sm:$0xf0]  ;;  %v4540_v4 = vpop.f32.mrf.mxu3  ;;  %v8153_v57 = vld [vmem:[%s12104_s1 + $0xec8] sm:$0xf0] }
 0x1f2   :  { %4779 = vmatpush.bf16.msrb.mxu2 %v6651_v2  ;;  %v6698_v2 = vld [vmem:[%s12104_s1 + $0xb48] sm:$0xf]  ;;  %v6926_v4 = vld [vmem:[%s12104_s1 + $0xd10] sm:$0xf] }
 0x1f3   :  { %4792 = vmatpush.bf16.msrb.mxu3 %v6747_v38  ;;  %v8087_v38 = vld [vmem:[%s12104_s1 + $0xcb8] sm:$0xf0]  ;;  %v6699_v17 = vor.u32 %v8042_v19, %v6698_v2 }
 0x1f4   :  { %4754 = vmatpush.bf16.msrb.mxu0 %v6447_v9  ;;  %v6507_v9 = vor.u32 %v7994_v55, %v6506_v61  ;;  %v6879_v21 = vor.u32 %v8087_v38, %v6878_v22  ;;  %v8126_v61 = vld [vmem:[%s12104_s1 + $0xdf0] sm:$0xf0]  ;;  %v6830_v38 = vld [vmem:[%s12104_s1 + $0xc50] sm:$0xf] }
 0x1f5   :  { %4767 = vmatpush.bf16.msrb.mxu1 %v6543_v10  ;;  %v6603_v10 = vor.u32 %v8018_v18, %v6602_v62  ;;  %v7130_v62 = vld [vmem:[%s12104_s1 + $0xea8] sm:$0xf] }
 0x1f6   :  { %4780 = vmatpush.bf16.msrb.mxu2 %v6639_v13  ;;  %v7166_v13 = vld [vmem:[%s12104_s1 + $0xef0] sm:$0xf] }
 0x1f7   :  { %4793 = vmatpush.bf16.msrb.mxu3 %v6735_v14  ;;  %v6975_v14 = vor.u32 %v8111_v5, %v6974_v3  ;;  %v7167_v34 = vor.u32 %v8159_v53, %v7166_v13  ;;  %v8075_v3 = vld [vmem:[%s12104_s1 + $0xc58] sm:$0xf0] }
 0x1f8   :  { %4755 = vmatpush.bf16.msrb.mxu0 %v6435_v40  ;;  %v8156_v40 = vld [vmem:[%s12104_s1 + $0xee0] sm:$0xf0]  ;;  %v8099_v5 = vld [vmem:[%s12104_s1 + $0xd18] sm:$0xf0]  ;;  %v6831_v13 = vor.u32 %v8075_v3, %v6830_v38  ;;  %v7358_v38 = vld [vmem:[%s12104_s1 + $0x1070] sm:$0xf] }
 0x1f9   :  { %4768 = vmatpush.bf16.msrb.mxu1 %v6531_v48  ;;  %v6963_v48 = vor.u32 %v8108_v36, %v6962_v27  ;;  %v6927_v53 = vor.u32 %v8099_v5, %v6926_v4  ;;  %v8096_v27 = vld [vmem:[%s12104_s1 + $0xd00] sm:$0xf0]  ;;  %v8231_v5 = vld [vmem:[%s12104_s1 + $0x1138] sm:$0xf0] }
 0x1fa   :  { %4781 = vmatpush.bf16.msrb.mxu2 %v6627_v39  ;;  %v7059_v39 = vor.u32 %v8132_v42, %v7058_v41  ;;  %v8120_v36 = vld [vmem:[%s12104_s1 + $0xdc0] sm:$0xf0] }
 0x1fb   :  { %4794 = vmatpush.bf16.msrb.mxu3 %v6723_v54  ;;  %v7155_v54 = vor.u32 %v8156_v40, %v7154_v44  ;;  %v7106_v44 = vld [vmem:[%s12104_s1 + $0xe78] sm:$0xf]  ;;  %v8144_v40 = vld [vmem:[%s12104_s1 + $0xe80] sm:$0xf0] }
 0x1fc   :  { %4756 = vmatpush.bf16.msrb.mxu0 %v6423_v58  ;;  %v6951_v58 = vor.u32 %v8105_v56, %v6950_v51  ;;  %v8069_v56 = vld [vmem:[%s12104_s1 + $0xc28] sm:$0xf0]  ;;  %v7107_v30 = vor.u32 %v8144_v40, %v7106_v44 }
 0x1fd   :  { %4769 = vmatpush.bf16.msrb.mxu1 %v6519_v1  ;;  %v8102_v1 = vld [vmem:[%s12104_s1 + $0xd30] sm:$0xf0] }
 0x1fe   :  { %4782 = vmatpush.bf16.msrb.mxu2 %v6615_v60  ;;  %v7034_v60 = vld [vmem:[%s12104_s1 + $0xde8] sm:$0xf]  ;;  %v6939_v20 = vor.u32 %v8102_v1, %v6938_v59  ;;  %v8066_v59 = vld [vmem:[%s12104_s1 + $0xc10] sm:$0xf0] }
 0x1ff   :  { %4795 = vmatpush.bf16.msrb.mxu3 %v6711_v63  ;;  %v8150_v63 = vld [vmem:[%s12104_s1 + $0xeb0] sm:$0xf0]  ;;  %v7035_v22 = vor.u32 %v8126_v61, %v7034_v60  ;;  %v6890_v60 = vld [vmem:[%s12104_s1 + $0xcc8] sm:$0xf] }
 0x200   :  { %4757 = vmatpush.bf16.msrb.mxu0 %v6411_v0  ;;  %v4551_v55 = vpop.f32.mrf.mxu0  ;;  %v8090_v61 = vld [vmem:[%s12104_s1 + $0xcd0] sm:$0xf0] }
 0x201   :  { %4770 = vmatpush.bf16.msrb.mxu1 %v6507_v9  ;;  %v4552_v18 = vadd.f32 %v4551_v55, %v11539_v47  ;;  %v4564_v19 = vpop.f32.mrf.mxu1  ;;  %v7131_v47 = vor.u32 %v8150_v63, %v7130_v62  ;;  %v7118_v9 = vld [vmem:[%s12104_s1 + $0xe90] sm:$0xf]  ;;  %v6986_v55 = vld [vmem:[%s12104_s1 + $0xd88] sm:$0xf]  ;;  %v8114_v63 = vld [vmem:[%s12104_s1 + $0xd90] sm:$0xf0] }
 0x202   :  { %4783 = vmatpush.bf16.msrb.mxu2 %v6603_v10  ;;  %v8147_v10 = vld [vmem:[%s12104_s1 + $0xe98] sm:$0xf0] }
 0x203   :  { %4796 = vmatpush.bf16.msrb.mxu3 %v6699_v17  ;;  %4758 = vmatmul.bf16.vlgmr.msrb.gmra.mxu0 %v9197_v23  ;;  %v7142_v23 = vld [vmem:[%s12104_s1 + $0xec0] sm:$0xf]  ;;  %v4565_v0 = vadd.f32 %v4564_v19, %v4552_v18  ;;  %v7023_v17 = vor.u32 %v8123_v8, %v7022_v6  ;;  %v7119_v24 = vor.u32 %v8147_v10, %v7118_v9  ;;  %v7082_v18 = vld [vmem:[%s12104_s1 + $0xe48] sm:$0xf]  ;;  %v7550_v9 = vld [vmem:[%s12104_s1 + $0x11f0] sm:$0xf] }
 0x204   :  { %4802 = vmatpush.bf16.msra.mxu0 %v6879_v21  ;;  %4771 = vmatmul.bf16.vlgmr.msrb.gmra.mxu1 %v9210_v31  ;;  %v8078_v31 = vld [vmem:[%s12104_s1 + $0xc70] sm:$0xf0]  ;;  %v6818_v21 = vld [vmem:[%s12104_s1 + $0xc38] sm:$0xf]  ;;  %v6891_v6 = vor.u32 %v8090_v61, %v6890_v60  ;;  %v6987_v8 = vor.u32 %v8114_v63, %v6986_v55  ;;  %v8255_v10 = vld [vmem:[%s12104_s1 + $0x11f8] sm:$0xf0] }
 0x205   :  { %4815 = vmatpush.bf16.msra.mxu1 %v6975_v14  ;;  %4784 = vmatmul.bf16.vlgmr.msrb.gmra.mxu2 %v9208_v28  ;;  %v6842_v28 = vld [vmem:[%s12104_s1 + $0xc68] sm:$0xf]  ;;  %v8072_v14 = vld [vmem:[%s12104_s1 + $0xc40] sm:$0xf0]  ;;  %v8246_v60 = vld [vmem:[%s12104_s1 + $0x11b0] sm:$0xf0] }
 0x206   :  { %4828 = vmatpush.bf16.msra.mxu2 %v7071_v15  ;;  %4797 = vmatmul.bf16.vlgmr.msrb.gmra.mxu3 %v9218_v35  ;;  %v7143_v35 = vor.u32 %v8153_v57, %v7142_v23  ;;  %v6843_v2 = vor.u32 %v8078_v31, %v6842_v28  ;;  %v6914_v15 = vld [vmem:[%s12104_s1 + $0xcf8] sm:$0xf]  ;;  %v8093_v23 = vld [vmem:[%s12104_s1 + $0xce8] sm:$0xf0]  ;;  %v6998_v57 = vld [vmem:[%s12104_s1 + $0xda0] sm:$0xf] }
 0x207   :  { %4841 = vmatpush.bf16.msra.mxu3 %v7167_v34  ;;  %v7010_v34 = vld [vmem:[%s12104_s1 + $0xdb8] sm:$0xf]  ;;  %v6915_v50 = vor.u32 %v8096_v27, %v6914_v15  ;;  %v6794_v31 = vld [vmem:[%s12104_s1 + $0xc08] sm:$0xf]  ;;  %v8180_v15 = vld [vmem:[%s12104_s1 + $0xfa0] sm:$0xf0] }
 0x208   :  { %4803 = vmatpush.bf16.msra.mxu0 %v6867_v43  ;;  %v4577_v26 = vpop.f32.mrf.mxu2  ;;  %v4553_v43 = vpop.f32.mrf.mxu0  ;;  %v7011_v51 = vor.u32 %v8120_v36, %v7010_v34  ;;  %v6795_v4 = vor.u32 %v8066_v59, %v6794_v31  ;;  %v8204_v27 = vld [vmem:[%s12104_s1 + $0x1060] sm:$0xf0]  ;;  %v7442_v34 = vld [vmem:[%s12104_s1 + $0x1118] sm:$0xf]  ;;  %v8198_v31 = vld [vmem:[%s12104_s1 + $0x1030] sm:$0xf0] }
 0x209   :  { %4816 = vmatpush.bf16.msra.mxu1 %v6963_v48  ;;  %v4578_v41 = vadd.f32 %v4577_v26, %v4565_v0  ;;  %v4590_v42 = vpop.f32.mrf.mxu3  ;;  %v6819_v48 = vor.u32 %v8072_v14, %v6818_v21  ;;  %v7454_v0 = vld [vmem:[%s12104_s1 + $0x1130] sm:$0xf]  ;;  %v7250_v14 = vld [vmem:[%s12104_s1 + $0xf98] sm:$0xf]  ;;  %v7551_v26 = vor.u32 %v8255_v10, %v7550_v9  ;;  %v8228_v36 = vld [vmem:[%s12104_s1 + $0x1120] sm:$0xf0] }
 0x20a   :  { %4829 = vmatpush.bf16.msra.mxu2 %v7059_v39  ;;  %v4566_v39 = vpop.f32.mrf.mxu1  ;;  %v7455_v21 = vor.u32 %v8231_v5, %v7454_v0  ;;  %v7251_v44 = vor.u32 %v8180_v15, %v7250_v14  ;;  %v7443_v43 = vor.u32 %v8228_v36, %v7442_v34  ;;  %v7418_v59 = vld [vmem:[%s12104_s1 + $0x10e8] sm:$0xf]  ;;  %v7502_v0 = vld [vmem:[%s12104_s1 + $0x1190] sm:$0xf]  ;;  %v8243_v5 = vld [vmem:[%s12104_s1 + $0x1198] sm:$0xf0] }
 0x20b   :  { %4842 = vmatpush.bf16.msra.mxu3 %v7155_v54  ;;  %v11738_v25 = vadd.f32 %v4590_v42, %v4578_v41  ;;  %v6806_v54 = vld [vmem:[%s12104_s1 + $0xc20] sm:$0xf]  ;;  %v7538_v41 = vld [vmem:[%s12104_s1 + $0x11d8] sm:$0xf]  ;;  %v8252_v42 = vld [vmem:[%s12104_s1 + $0x11e0] sm:$0xf0]  ;;  %v7503_v14 = vor.u32 %v8243_v5, %v7502_v0 }
 0x20c   :  { %4804 = vmatpush.bf16.msra.mxu0 %v6855_v33  ;;  %v8117_v33 = vld [vmem:[%s12104_s1 + $0xda8] sm:$0xf0]  ;;  %v6807_v28 = vor.u32 %v8069_v56, %v6806_v54  ;;  %v7430_v56 = vld [vmem:[%s12104_s1 + $0x1100] sm:$0xf]  ;;  %v8192_v15 = vld [vmem:[%s12104_s1 + $0x1000] sm:$0xf0] }
 0x20d   :  { %4817 = vmatpush.bf16.msra.mxu1 %v6951_v58  ;;  %v7094_v58 = vld [vmem:[%s12104_s1 + $0xe60] sm:$0xf]  ;;  %v6999_v1 = vor.u32 %v8117_v33, %v6998_v57  ;;  %v8177_v39 = vld [vmem:[%s12104_s1 + $0xf88] sm:$0xf0]  ;;  %v7226_v57 = vld [vmem:[%s12104_s1 + $0xf68] sm:$0xf] }
 0x20e   :  { %4830 = vmatpush.bf16.msra.mxu2 %v7047_v32  ;;  %v8141_v32 = vld [vmem:[%s12104_s1 + $0xe68] sm:$0xf0]  ;;  %v8174_v33 = vld [vmem:[%s12104_s1 + $0xf70] sm:$0xf0]  ;;  %v7490_v36 = vld [vmem:[%s12104_s1 + $0x1178] sm:$0xf] }
 0x20f   :  { %4843 = vmatpush.bf16.msra.mxu3 %v7143_v35  ;;  %v6903_v35 = vor.u32 %v8093_v23, %v6902_v29  ;;  %v7095_v62 = vor.u32 %v8141_v32, %v7094_v58  ;;  %v8201_v54 = vld [vmem:[%s12104_s1 + $0x1048] sm:$0xf0]  ;;  %v7322_v58 = vld [vmem:[%s12104_s1 + $0x1028] sm:$0xf]  ;;  %v7227_v61 = vor.u32 %v8174_v33, %v7226_v57  ;;  %v8259_v5 = vld [vmem:[%s12107_s3 + $0x18] sm:$0xff] }
 0x210   :  { %4805 = vmatpush.bf16.msra.mxu0 %v6843_v2  ;;  %v8138_v2 = vld [vmem:[%s12104_s1 + $0xe50] sm:$0xf0]  ;;  %v4579_v19 = vpop.f32.mrf.mxu2  ;;  %v8225_v29 = vld [vmem:[%s12104_s1 + $0x1108] sm:$0xf0] }
 0x211   :  { %4818 = vmatpush.bf16.msra.mxu1 %v6939_v20  ;;  %v7262_v20 = vld [vmem:[%s12104_s1 + $0xfb0] sm:$0xf]  ;;  %v4592_v3 = vpop.f32.mrf.mxu3  ;;  %v8237_v57 = vld [vmem:[%s12104_s1 + $0x1168] sm:$0xf0] }
 0x212   :  { %4831 = vmatpush.bf16.msra.mxu2 %v7035_v22  ;;  %v8183_v22 = vld [vmem:[%s12104_s1 + $0xfb8] sm:$0xf0]  ;;  %v7310_v19 = vld [vmem:[%s12104_s1 + $0x1010] sm:$0xf] }
 0x213   :  { %4844 = vmatpush.bf16.msra.mxu3 %v7131_v47  ;;  %v8207_v47 = vld [vmem:[%s12104_s1 + $0x1078] sm:$0xf0] }
 0x214   :  { %4806 = vmatpush.bf16.msra.mxu0 %v6831_v13  ;;  %v7083_v13 = vor.u32 %v8138_v2, %v7082_v18  ;;  %v7214_v18 = vld [vmem:[%s12104_s1 + $0xf50] sm:$0xf]  ;;  %v8171_v2 = vld [vmem:[%s12104_s1 + $0xf58] sm:$0xf0] }
 0x215   :  { %4819 = vmatpush.bf16.msra.mxu1 %v6927_v53  ;;  %v7263_v53 = vor.u32 %v8183_v22, %v7262_v20  ;;  %v8195_v3 = vld [vmem:[%s12104_s1 + $0x1018] sm:$0xf0] }
 0x216   :  { %4832 = vmatpush.bf16.msra.mxu2 %v7023_v17  ;;  %v7359_v17 = vor.u32 %v8207_v47, %v7358_v38  ;;  %v8219_v47 = vld [vmem:[%s12104_s1 + $0x10d8] sm:$0xf0]  ;;  %v7311_v9 = vor.u32 %v8195_v3, %v7310_v19  ;;  %v8261_v3 = vld [vmem:[%s12107_s3 + $0x28] sm:$0xff] }
 0x217   :  { %4845 = vmatpush.bf16.msra.mxu3 %v7119_v24  ;;  %v7346_v24 = vld [vmem:[%s12104_s1 + $0x1058] sm:$0xf] }
 0x218   :  { %4807 = vmatpush.bf16.msra.mxu0 %v6819_v48  ;;  %v7347_v40 = vor.u32 %v8204_v27, %v7346_v24  ;;  %v7238_v48 = vld [vmem:[%s12104_s1 + $0xf80] sm:$0xf]  ;;  %v7394_v24 = vld [vmem:[%s12104_s1 + $0x10b8] sm:$0xf] }
 0x219   :  { %4820 = vmatpush.bf16.msra.mxu1 %v6915_v50  ;;  %v7334_v50 = vld [vmem:[%s12104_s1 + $0x1040] sm:$0xf]  ;;  %v7239_v23 = vor.u32 %v8177_v39, %v7238_v48  ;;  %v8263_v19 = vld [vmem:[%s12107_s3 + $0x38] sm:$0xff] }
 0x21a   :  { %4833 = vmatpush.bf16.msra.mxu2 %v7011_v51  ;;  %v7539_v51 = vor.u32 %v8252_v42, %v7538_v41  ;;  %v8240_v41 = vld [vmem:[%s12104_s1 + $0x1180] sm:$0xf0]  ;;  %v7190_v39 = vld [vmem:[%s12104_s1 + $0xf20] sm:$0xf] }
 0x21b   :  { %4846 = vmatpush.bf16.msra.mxu3 %v7107_v30  ;;  %v8249_v30 = vld [vmem:[%s12104_s1 + $0x11c8] sm:$0xf0] }
 0x21c   :  { %4808 = vmatpush.bf16.msra.mxu0 %v6807_v28 }
 0x21d   :  { %4821 = vmatpush.bf16.msra.mxu1 %v6903_v35  ;;  %v8222_v35 = vld [vmem:[%s12104_s1 + $0x10f0] sm:$0xf0] }
 0x21e   :  { %4834 = vmatpush.bf16.msra.mxu2 %v6999_v1  ;;  %v7514_v1 = vld [vmem:[%s12104_s1 + $0x11a8] sm:$0xf]  ;;  %v7419_v63 = vor.u32 %v8222_v35, %v7418_v59  ;;  %v8186_v59 = vld [vmem:[%s12104_s1 + $0xfd0] sm:$0xf0] }
 0x21f   :  { %4847 = vmatpush.bf16.msra.mxu3 %v7095_v62  ;;  %v7323_v62 = vor.u32 %v8198_v31, %v7322_v58  ;;  %v7515_v38 = vor.u32 %v8246_v60, %v7514_v1  ;;  %v7178_v58 = vld [vmem:[%s12104_s1 + $0xf08] sm:$0xf]  ;;  %v8210_v1 = vld [vmem:[%s12104_s1 + $0x1090] sm:$0xf0] }
 0x220   :  { %4809 = vmatpush.bf16.msra.mxu0 %v6795_v4  ;;  %v4603_v55 = vpop.f32.mrf.mxu0  ;;  %v7406_v4 = vld [vmem:[%s12104_s1 + $0x10d0] sm:$0xf]  ;;  %v7370_v35 = vld [vmem:[%s12104_s1 + $0x1088] sm:$0xf] }
 0x221   :  { %4822 = vmatpush.bf16.msra.mxu1 %v6891_v6  ;;  %v4616_v22 = vpop.f32.mrf.mxu1  ;;  %v7407_v10 = vor.u32 %v8219_v47, %v7406_v4  ;;  %v8260_v4 = vld [vmem:[%s12107_s3 + $0x20] sm:$0xff] }
 0x222   :  { %4835 = vmatpush.bf16.msra.mxu2 %v6987_v8  ;;  %v7215_v8 = vor.u32 %v8171_v2, %v7214_v18  ;;  %v7371_v18 = vor.u32 %v8210_v1, %v7370_v35  ;;  %v8276_v35 = vld [vmem:[%s12107_s3 + $0xa0] sm:$0xff]  ;;  %v8275_v1 = vld [vmem:[%s12107_s3 + $0x98] sm:$0xff] }
 0x223   :  { %4848 = vmatpush.bf16.msra.mxu3 %v7083_v13  ;;  %4810 = vmatmul.bf16.vlgmr.msra.gmra.mxu0 %v9407_v37  ;;  %v7526_v37 = vld [vmem:[%s12104_s1 + $0x11c0] sm:$0xf]  ;;  %v7202_v13 = vld [vmem:[%s12104_s1 + $0xf38] sm:$0xf] }
 0x224   :  { %4854 = vmatpush.bf16.msrb.mxu0 %v7263_v53  ;;  %4823 = vmatmul.bf16.vlgmr.msra.gmra.mxu1 %v9420_v46  ;;  %v7431_v46 = vor.u32 %v8225_v29, %v7430_v56  ;;  %v7527_v28 = vor.u32 %v8249_v30, %v7526_v37  ;;  %v8168_v53 = vld [vmem:[%s12104_s1 + $0xf40] sm:$0xf0]  ;;  %v7491_v56 = vor.u32 %v8240_v41, %v7490_v36  ;;  %v8189_v29 = vld [vmem:[%s12104_s1 + $0xfe8] sm:$0xf0]  ;;  %v7382_v37 = vld [vmem:[%s12104_s1 + $0x10a0] sm:$0xf] }
 0x225   :  { %4867 = vmatpush.bf16.msrb.mxu1 %v7359_v17  ;;  %4836 = vmatmul.bf16.vlgmr.msra.gmra.mxu2 %v9418_v45  ;;  %v7335_v45 = vor.u32 %v8201_v54, %v7334_v50  ;;  %v7298_v17 = vld [vmem:[%s12104_s1 + $0xff8] sm:$0xf]  ;;  %v7203_v42 = vor.u32 %v8168_v53, %v7202_v13  ;;  %v8165_v50 = vld [vmem:[%s12104_s1 + $0xf28] sm:$0xf0]  ;;  %v8258_v13 = vld [vmem:[%s12107_s3 + $0x10] sm:$0xff]  ;;  %v4906_v36 = vmax.f32 %v10542_v52, 0.0 }
 0x226   :  { %4880 = vmatpush.bf16.msrb.mxu2 %v7455_v21  ;;  %4849 = vmatmul.bf16.vlgmr.msra.gmra.mxu3 %v9428_v49  ;;  %v8295_v49 = vld [vmem:[%s12106_s2] sm:$0x7]  ;;  %v8213_v30 = vld [vmem:[%s12104_s1 + $0x10a8] sm:$0xf0] }
 0x227   :  { %4893 = vmatpush.bf16.msrb.mxu3 %v7551_v26  ;;  %v810_v32 = vperm.slane %v8295_v49, 2  ;;  %v8216_v26 = vld [vmem:[%s12104_s1 + $0x10c0] sm:$0xf0]  ;;  %v7383_v33 = vor.u32 %v8213_v30, %v7382_v37  ;;  %v8162_v49 = vld [vmem:[%s12104_s1 + $0xf10] sm:$0xf0] }
 0x228   :  { %4855 = vmatpush.bf16.msrb.mxu0 %v7251_v44  ;;  %v4629_v21 = vpop.f32.mrf.mxu2  ;;  %v7395_v48 = vor.u32 %v8216_v26, %v7394_v24  ;;  %v8265_v24 = vld [vmem:[%s12107_s3 + $0x48] sm:$0xff]  ;;  %v8264_v41 = vld [vmem:[%s12107_s3 + $0x40] sm:$0xff] }
 0x229   :  { %4868 = vmatpush.bf16.msrb.mxu1 %v7347_v40  ;;  %v4604_v20 = vadd.f32 %v4603_v55, %v810_v32  ;;  %v4642_v34 = vpop.f32.mrf.mxu3  ;;  %v4605_v40 = vpop.f32.mrf.mxu0  ;;  %v7274_v32 = vld [vmem:[%s12104_s1 + $0xfc8] sm:$0xf]  ;;  %v8234_v55 = vld [vmem:[%s12104_s1 + $0x1150] sm:$0xf0] }
 0x22a   :  { %4881 = vmatpush.bf16.msrb.mxu2 %v7443_v43  ;;  %v7299_v43 = vor.u32 %v8192_v15, %v7298_v17  ;;  %v4618_v54 = vpop.f32.mrf.mxu1  ;;  %v8257_v15 = vld [vmem:[%s12107_s3 + $0x8] sm:$0xff] }
 0x22b   :  { %4894 = vmatpush.bf16.msrb.mxu3 %v7539_v51  ;;  %v4617_v6 = vadd.f32 %v4616_v22, %v4604_v20  ;;  %v7286_v51 = vld [vmem:[%s12104_s1 + $0xfe0] sm:$0xf]  ;;  %v8271_v20 = vld [vmem:[%s12107_s3 + $0x78] sm:$0xff]  ;;  %v8262_v22 = vld [vmem:[%s12107_s3 + $0x30] sm:$0xff] }
 0x22c   :  { %4856 = vmatpush.bf16.msrb.mxu0 %v7239_v23  ;;  %v7478_v23 = vld [vmem:[%s12104_s1 + $0x1160] sm:$0xf] }
 0x22d   :  { %4869 = vmatpush.bf16.msrb.mxu1 %v7335_v45  ;;  %v4630_v27 = vadd.f32 %v4629_v21, %v4617_v6  ;;  %v7191_v45 = vor.u32 %v8165_v50, %v7190_v39  ;;  %v7479_v31 = vor.u32 %v8237_v57, %v7478_v23  ;;  %v8267_v6 = vld [vmem:[%s12107_s3 + $0x58] sm:$0xff]  ;;  %v8266_v21 = vld [vmem:[%s12107_s3 + $0x50] sm:$0xff] }
 0x22e   :  { %4882 = vmatpush.bf16.msrb.mxu2 %v7431_v46  ;;  %v7287_v46 = vor.u32 %v8189_v29, %v7286_v51 }
 0x22f   :  { %4895 = vmatpush.bf16.msrb.mxu3 %v7527_v28  ;;  %v11939_v44 = vadd.f32 %v4642_v34, %v4630_v27  ;;  %v8256_v34 = vld [vmem:[%s12107_s3] sm:$0xff] }
 0x230   :  { %4857 = vmatpush.bf16.msrb.mxu0 %v7227_v61  ;;  %v4631_v28 = vpop.f32.mrf.mxu2  ;;  %v7466_v61 = vld [vmem:[%s12104_s1 + $0x1148] sm:$0xf] }
 0x231   :  { %4870 = vmatpush.bf16.msrb.mxu1 %v7323_v62  ;;  %v4644_v60 = vpop.f32.mrf.mxu3  ;;  %v7179_v62 = vor.u32 %v8162_v49, %v7178_v58  ;;  %v7467_v2 = vor.u32 %v8234_v55, %v7466_v61  ;;  %v8279_v58 = vld [vmem:[%s12107_s3 + $0xb8] sm:$0xff]  ;;  %v8277_v28 = vld [vmem:[%s12107_s3 + $0xa8] sm:$0xff]  ;;  %v8274_v61 = vld [vmem:[%s12107_s3 + $0x90] sm:$0xff] }
 0x232   :  { %4883 = vmatpush.bf16.msrb.mxu2 %v7419_v63  ;;  %v7275_v63 = vor.u32 %v8186_v59, %v7274_v32  ;;  %v8278_v32 = vld [vmem:[%s12107_s3 + $0xb0] sm:$0xff] }
 0x233   :  { %4896 = vmatpush.bf16.msrb.mxu3 %v7515_v38  ;;  %v8270_v38 = vld [vmem:[%s12107_s3 + $0x70] sm:$0xff] }
 0x234   :  { %4858 = vmatpush.bf16.msrb.mxu0 %v7215_v8 }
 0x235   :  { %4871 = vmatpush.bf16.msrb.mxu1 %v7311_v9 }
 0x236   :  { %4884 = vmatpush.bf16.msrb.mxu2 %v7407_v10 }
 0x237   :  { %4897 = vmatpush.bf16.msrb.mxu3 %v7503_v14 }
 0x238   :  { %4859 = vmatpush.bf16.msrb.mxu0 %v7203_v42  ;;  %v4907_v42 = vmax.f32 %v11738_v25, 0.0 }
 0x239   :  { %4872 = vmatpush.bf16.msrb.mxu1 %v7299_v43 }
 0x23a   :  { %4885 = vmatpush.bf16.msrb.mxu2 %v7395_v48  ;;  %v4910_v40 = vpack.c.bf16 %v4907_v42, %v4907_v42  ;;  %v8284_v42 = vld [vmem:[%s12109_s5 + $0x20] sm:$0xff] }
 0x23b   :  { %4898 = vmatpush.bf16.msrb.mxu3 %v7491_v56 }
 0x23c   :  { %4860 = vmatpush.bf16.msrb.mxu0 %v7191_v45 }
 0x23d   :  { %4873 = vmatpush.bf16.msrb.mxu1 %v7287_v46 }
 0x23e   :  { %4886 = vmatpush.bf16.msrb.mxu2 %v7383_v33 }
 0x23f   :  { %4899 = vmatpush.bf16.msrb.mxu3 %v7479_v31 }
 0x240   :  { %4861 = vmatpush.bf16.msrb.mxu0 %v7179_v62  ;;  %v8273_v62 = vld [vmem:[%s12107_s3 + $0x88] sm:$0xff] }
 0x241   :  { %4874 = vmatpush.bf16.msrb.mxu1 %v7275_v63  ;;  %v4668_v47 = vpop.f32.mrf.mxu1 }
 0x242   :  { %4887 = vmatpush.bf16.msrb.mxu2 %v7371_v18 }
 0x243   :  { %4900 = vmatpush.bf16.msrb.mxu3 %v7467_v2  ;;  %4862 = vmatmul.bf16.vlgmr.msrb.gmra.mxu0 %v9622_v7  ;;  %v8269_v7 = vld [vmem:[%s12107_s3 + $0x68] sm:$0xff] }
 0x244   :  { %5108 = vmatpush.bf16.msra.mxu0 %v8263_v19  ;;  %4875 = vmatmul.bf16.vlgmr.msrb.gmra.mxu1 %v9635_v12  ;;  %v4655_v12 = vpop.f32.mrf.mxu0 }
 0x245   :  { %5121 = vmatpush.bf16.msra.mxu1 %v8271_v20  ;;  %4888 = vmatmul.bf16.vlgmr.msrb.gmra.mxu2 %v9633_v11  ;;  %v8268_v11 = vld [vmem:[%s12107_s3 + $0x60] sm:$0xff] }
 0x246   :  { %4901 = vmatmul.bf16.vlgmr.msrb.gmra.mxu3 %v9643_v16  ;;  %v4656_v16 = vadd.f32 %v4655_v12, %v11939_v44  ;;  %v4909_v44 = vpack.c.bf16 %v4906_v36, %v4906_v36  ;;  %5134 = vmatpush.bf16.msra.mxu2 %v8279_v58 }
 0x248   :  { %5109 = vmatpush.bf16.msra.mxu0 %v8262_v22  ;;  %v4669_v0 = vadd.f32 %v4668_v47, %v4656_v16  ;;  %v4681_v8 = vpop.f32.mrf.mxu2  ;;  %v8272_v22 = vld [vmem:[%s12107_s3 + $0x80] sm:$0xff] }
 0x249   :  { %5122 = vmatpush.bf16.msra.mxu1 %v8270_v38  ;;  %v4694_v10 = vpop.f32.mrf.mxu3  ;;  %v4670_v14 = vpop.f32.mrf.mxu1 }
 0x24a   :  { %v4682_v9 = vadd.f32 %v4681_v8, %v4669_v0  ;;  %5135 = vmatpush.bf16.msra.mxu2 %v8278_v32 }
 0x24c   :  { %5110 = vmatpush.bf16.msra.mxu0 %v8261_v3  ;;  %v4695_v53 = vadd.f32 %v4694_v10, %v4682_v9  ;;  %v4657_v17 = vpop.f32.mrf.mxu0 }
 0x24d   :  { %5123 = vmatpush.bf16.msra.mxu1 %v8269_v7 }
 0x24e   :  { %5136 = vmatpush.bf16.msra.mxu2 %v8277_v28 }
 0x250   :  { %5111 = vmatpush.bf16.msra.mxu0 %v8260_v4  ;;  %v4683_v26 = vpop.f32.mrf.mxu2 }
 0x251   :  { %5124 = vmatpush.bf16.msra.mxu1 %v8268_v11  ;;  %v4696_v27 = vpop.f32.mrf.mxu3 }
 0x252   :  { %5137 = vmatpush.bf16.msra.mxu2 %v8276_v35  ;;  %v8285_v27 = vld [vmem:[%s12109_s5 + $0x28] sm:$0xff] }
 0x254   :  { %5112 = vmatpush.bf16.msra.mxu0 %v8259_v5 }
 0x255   :  { %5125 = vmatpush.bf16.msra.mxu1 %v8267_v6 }
 0x256   :  { %5138 = vmatpush.bf16.msra.mxu2 %v8275_v1 }
 0x258   :  { %5113 = vmatpush.bf16.msra.mxu0 %v8258_v13  ;;  %v8287_v13 = vld [vmem:[%s12109_s5 + $0x38] sm:$0xff] }
 0x259   :  { %5126 = vmatpush.bf16.msra.mxu1 %v8266_v21  ;;  %5217 = vmatpush.bf16.msra.mxu3 %v8287_v13 }
 0x25a   :  { %5139 = vmatpush.bf16.msra.mxu2 %v8274_v61 }
 0x25c   :  { %5114 = vmatpush.bf16.msra.mxu0 %v8257_v15  ;;  %v8286_v15 = vld [vmem:[%s12109_s5 + $0x30] sm:$0xff] }
 0x25d   :  { %5127 = vmatpush.bf16.msra.mxu1 %v8265_v24  ;;  %5218 = vmatpush.bf16.msra.mxu3 %v8286_v15 }
 0x25e   :  { %5140 = vmatpush.bf16.msra.mxu2 %v8273_v62 }
 0x260   :  { %5115 = vmatpush.bf16.msra.mxu0 %v8256_v34  ;;  %v4707_v43 = vpop.f32.mrf.mxu0 }
 0x261   :  { %5128 = vmatpush.bf16.msra.mxu1 %v8264_v41  ;;  %v4708_v48 = vadd.f32 %v4707_v43, %v4695_v53  ;;  %v4720_v39 = vpop.f32.mrf.mxu1  ;;  %5219 = vmatpush.bf16.msra.mxu3 %v8285_v27  ;;  %v8288_v43 = vld [vmem:[%s12108_s4] ss:$0 sm:$0xff] }
 0x262   :  { %5141 = vmatpush.bf16.msra.mxu2 %v8272_v22 }
 0x263   :  { %5116 = vmatmul.bf16.vlgmr.msra.gmra.mxu0 %v4909_v44  ;;  %v4721_v50 = vadd.f32 %v4720_v39, %v4708_v48  ;;  %v8283_v44 = vld [vmem:[%s12109_s5 + $0x18] sm:$0xff] }
 0x264   :  { %5129 = vmatmul.bf16.vlgmr.msra.gmra.mxu1 %v4910_v40  ;;  %v8282_v40 = vld [vmem:[%s12109_s5 + $0x10] sm:$0xff] }
 0x265   :  { %5220 = vmatpush.bf16.msra.mxu3 %v8284_v42 }
 0x268   :  { %v4733_v51 = vpop.f32.mrf.mxu2  ;;  %v4709_v56 = vpop.f32.mrf.mxu0 }
 0x269   :  { %v4734_v54 = vadd.f32 %v4733_v51, %v4721_v50  ;;  %v4746_v52 = vpop.f32.mrf.mxu3  ;;  %v4722_v29 = vpop.f32.mrf.mxu1  ;;  %5221 = vmatpush.bf16.msra.mxu3 %v8283_v44  ;;  %v8281_v56 = vld [vmem:[%s12109_s5 + $0x8] sm:$0xff] }
 0x26a   :  { %v8280_v29 = vld [vmem:[%s12109_s5] sm:$0xff] }
 0x26b   :  { %v4747_v37 = vadd.f32 %v4746_v52, %v4734_v54 }
 0x26d   :  { %5222 = vmatpush.bf16.msra.mxu3 %v8282_v40 }
 0x270   :  { %v4735_v30 = vpop.f32.mrf.mxu2 }
 0x271   :  { %v4748_v23 = vpop.f32.mrf.mxu3  ;;  %5223 = vmatpush.bf16.msra.mxu3 %v8281_v56 }
 0x275   :  { %5224 = vmatpush.bf16.msra.mxu3 %v8280_v29 }
 0x280   :  { %v4759_v57 = vpop.f32.mrf.mxu0 }
 0x281   :  { %v4772_v25 = vpop.f32.mrf.mxu1  ;;  %v4760_v63 = vadd.f32 %v4759_v57, %v4747_v37 }
 0x283   :  { %v4773_v38 = vadd.f32 %v4772_v25, %v4760_v63 }
 0x288   :  { %v4785_v45 = vpop.f32.mrf.mxu2  ;;  %v4761_v33 = vpop.f32.mrf.mxu0 }
 0x289   :  { %v4798_v46 = vpop.f32.mrf.mxu3  ;;  %v4774_v49 = vpop.f32.mrf.mxu1  ;;  %v4786_v3 = vadd.f32 %v4785_v45, %v4773_v38  ;;  %v8289_v45 = vld [vmem:[%s12110_s6] ss:$0 sm:$0xff] }
 0x28b   :  { %v4799_v12 = vadd.f32 %v4798_v46, %v4786_v3 }
 0x290   :  { %v4787_v31 = vpop.f32.mrf.mxu2 }
 0x291   :  { %v4800_v59 = vpop.f32.mrf.mxu3 }
 0x2a0   :  { %v4811_v60 = vpop.f32.mrf.mxu0 }
 0x2a1   :  { %v4824_v55 = vpop.f32.mrf.mxu1  ;;  %v4812_v11 = vadd.f32 %v4811_v60, %v4799_v12 }
 0x2a3   :  { %v4825_v16 = vadd.f32 %v4824_v55, %v4812_v11 }
 0x2a8   :  { %v4837_v18 = vpop.f32.mrf.mxu2  ;;  %v4813_v19 = vpop.f32.mrf.mxu0 }
 0x2a9   :  { %v4850_v2 = vpop.f32.mrf.mxu3  ;;  %v4826_v20 = vpop.f32.mrf.mxu1  ;;  %v4838_v47 = vadd.f32 %v4837_v18, %v4825_v16 }
 0x2ab   :  { %v4851_v0 = vadd.f32 %v4850_v2, %v4838_v47 }
 0x2b0   :  { %v4839_v7 = vpop.f32.mrf.mxu2 }
 0x2b1   :  { %v4852_v4 = vpop.f32.mrf.mxu3 }
 0x2c0   :  { %v4863_v5 = vpop.f32.mrf.mxu0 }
 0x2c1   :  { %v4876_v6 = vpop.f32.mrf.mxu1  ;;  %v4864_v8 = vadd.f32 %v4863_v5, %v4851_v0 }
 0x2c3   :  { %v4877_v9 = vadd.f32 %v4876_v6, %v4864_v8 }
 0x2c8   :  { %v4889_v10 = vpop.f32.mrf.mxu2  ;;  %v4865_v21 = vpop.f32.mrf.mxu0 }
 0x2c9   :  { %v4890_v53 = vadd.f32 %v4889_v10, %v4877_v9  ;;  %v4902_v17 = vpop.f32.mrf.mxu3  ;;  %v4878_v14 = vpop.f32.mrf.mxu1 }
 0x2cb   :  { %v4903_v24 = vadd.f32 %v4902_v17, %v4890_v53 }
 0x2cd   :  { %v4908_v26 = vmax.f32 %v4903_v24, 0.0 }
 0x2cf   :  { %v4911_v34 = vpack.c.bf16 %v4908_v26, %v4908_v26 }
 0x2d0   :  { %v4891_v36 = vpop.f32.mrf.mxu2 }
 0x2d1   :  { %v4904_v41 = vpop.f32.mrf.mxu3  ;;  %5142 = vmatmul.bf16.vlgmr.msra.gmra.mxu2 %v4911_v34 }
 0x2e0   :  { %v5117_v48 = vpop.f32.mrf.mxu0 }
 0x2e1   :  { %v5118_v39 = vadd.f32 %v8288_v43, %v5117_v48  ;;  %v5130_v50 = vpop.f32.mrf.mxu1 }
 0x2e3   :  { %v5131_v51 = vadd.f32 %v5130_v50, %v5118_v39 }
 0x2e8   :  { %v5119_v54 = vpop.f32.mrf.mxu0 }
 0x2e9   :  { %v5132_v52 = vpop.f32.mrf.mxu1 }
 0x354   :  { %v5143_v37 = vpop.f32.mrf.mxu2 }
 0x355   :  { %v5144_v30 = vadd.f32 %v5143_v37, %v5131_v51 }
 0x357   :  { %v5147_v23 = vmax.f32 %v5144_v30, 0.0 }
 0x359   :  { %v5148_v57 = vpack.c.bf16 %v5147_v23, %v5147_v23 }
 0x35b   :  { %5225 = vmatmul.bf16.vlgmr.msra.gmra.mxu3 %v5148_v57 }
 0x35c   :  { %v5145_v25 = vpop.f32.mrf.mxu2 }
 0x3de   :  { %v5226_v46 = vpop.f32.mrf.mxu3 }
 0x3df   :  { %v5227_v33 = vadd.f32 %v8289_v45, %v5226_v46 }
 0x3e1   :  { %v5231_v58 = vsel %vm5230_vm0, %v5227_v33, -inf }
 0x3e2   :  { %5232 = vmax.xlane.f32.xlu0 %v5231_v58 }
 0x3e6   :  { %v5228_v49 = vpop.f32.mrf.mxu3 }
 0x455   :  { %v5233_v32 = vpop.xlane.xlu0 %5232 }
 0x456   :  { %v5234_v28 = vsub.f32 %v5227_v33, %v5233_v32 }
 0x458   :  { %v5235_v31 = vmul.f32 1.442695, %v5234_v28 }
 0x45a   :  { %8290 = vpow2.f32 %v5235_v31 }
 0x460   :  { %v8291_v59 = vpop.eup %8290 }
 0x461   :  { %v5237_v35 = vsel %vm5230_vm0, %v8291_v59, 0.0 }
 0x462   :  { %5238 = vadd.xlane.f32.xlu0 %v5237_v35 }
 0x4d5   :  { %v5239_v1 = vpop.xlane.xlu0 %5238 }
 0x4d6   :  { %8292 = vlog2.f32 %v5239_v1 }
 0x4dc   :  { %v8293_v60 = vpop.eup %8292 }
 0x4dd   :  { %v5241_v61 = vmul.f32 0.6931472, %v8293_v60 }
 0x4df   :  { %v5242_v55 = vsub.f32 %v5234_v28, %v5241_v61 }
 0x4e1   :  { %5243 = vst.msk [vmem:[%s12111_s7] sm:$0xff] %vm5230_vm0, %v5242_v55 }

</bundles_post_ra>
